<compile_context>
chip_gen: v5e
topology: v5e:2x2
jax: 0.10.0
libtpu: 0.0.40
codegen_flags: <defaults>
</compile_context>

<pallas_src>
import math

import jax
import jax.numpy as jnp
from jax.experimental import pallas as pl
from jax.experimental.pallas import tpu as pltpu

K = 10            # categories per latent
N = 20            # number of categorical latents
NK = N * K
IN_DIM = 784
HID = 400
INITIAL_TEMP = 1.0


# ---------------------------------------------------------------- kernel ----
def vae_fused_kernel(temp_ref, x_ref, u_ref, g_ref,
                     w1_ref, b1_ref, w2_ref, b2_ref,
                     w3_ref, b3_ref, w4_ref, b4_ref,
                     recon_ref, probs_ref):
    f32 = jnp.float32
    bf16 = jnp.bfloat16

    # ----- encoder: logits = fc2(relu(fc1(x))) -------------------------------
    x = x_ref[...]                                                    # (TB, 784) f32
    h1 = jnp.dot(x.astype(bf16), w1_ref[...],
                 preferred_element_type=f32) + b1_ref[...]
    h1 = jnp.maximum(h1, 0.0)
    logits = jnp.dot(h1.astype(bf16), w2_ref[...],
                     preferred_element_type=f32) + b2_ref[...]        # (TB, NK) f32

    g = g_ref[...]   # (NK, NK) block-diagonal 0/1 group-sum matrix (f32, exact)

    # ----- probs = softmax(logits, -1) per group of K, lane-dense ------------
    # Row-wide max is constant within every K-group, so the group softmax is
    # mathematically identical; safe unless logits within one row span > ~80
    # (never the case for this linear encoder).
    m = jnp.max(logits, axis=-1, keepdims=True)
    e = jnp.exp(logits - m)
    denom = jnp.dot(e, g, preferred_element_type=f32)   # per-group sums, broadcast
    probs_ref[...] = e / denom                          # exact division: torch parity

    # ----- z = q_z.rsample(): gumbel-softmax ---------------------------------
    eps = jnp.finfo(jnp.float32).eps                    # torch clamp_probs epsilon
    u = jnp.clip(u_ref[...], eps, 1.0 - eps)
    gumbels = -jnp.log(-jnp.log(u))
    s = (logits + gumbels) / temp_ref[0]                # temp: runtime SMEM scalar
    ms = jnp.max(s, axis=-1, keepdims=True)
    es = jnp.exp(s - ms)
    zden = jnp.dot(es, g, preferred_element_type=f32)
    z = es * pl.reciprocal(zden, approx=True)           # EUP slot, effectively free
    # TODO(synk): hard=True straight-through branch not implemented (forward default hard=False).

    # ----- decoder: recon = sigmoid(fc4(relu(fc3(z)))) -----------------------
    h3 = jnp.dot(z.astype(bf16), w3_ref[...],
                 preferred_element_type=f32) + b3_ref[...]
    h3 = jnp.maximum(h3, 0.0)
    out = jnp.dot(h3.astype(bf16), w4_ref[...],
                  preferred_element_type=f32) + b4_ref[...]           # (TB, 784) f32
    # numerically stable sigmoid: exp(-|x|) never overflows
    eo = jnp.exp(-jnp.abs(out))
    inv = pl.reciprocal(1.0 + eo, approx=True)
    recon_ref[...] = jnp.where(out >= 0.0, inv, eo * inv)


# ---------------------------------------------------------------- wrapper ---
def _group_sum_matrix():
    """(NK, NK) block-diagonal 0/1 matrix: (e @ G)[b, j] = sum of e over j's K-group."""
    grp = jnp.arange(NK) // K
    return (grp[:, None] == grp[None, :]).astype(jnp.float32)


def vae_forward(params, x, u, temp=1.0):
    """Returns (recon (B,784), probs (B,N,K)) — same as the PyTorch forward (hard=False)."""
    w1, b1, w2, b2, w3, b3, w4, b4 = params
    B = x.shape[0]
    x2 = x.reshape(B, IN_DIM).astype(jnp.float32)        # x.view(-1, 784)
    u2 = u.reshape(B, NK).astype(jnp.float32)            # base uniforms, lane-dense
    temp_arr = jnp.asarray(temp, jnp.float32).reshape(1)  # traced scalar -> SMEM
    g = _group_sum_matrix()

    # Batch tiling: never grow the block with B — tile it (VMEM stays flat on v7x).
    if B <= 128:
        tb = B
    else:
        tb = 128
        assert B % tb == 0, "pad the batch to a multiple of 128 before calling"
    grid = (B // tb,)

    # Advisory cost estimate for XLA scheduling around the custom call.
    mm = IN_DIM * HID + HID * NK + NK * HID + HID * IN_DIM
    flops = 2 * B * mm + 2 * 2 * B * NK * NK
    transcendentals = B * (4 * NK + IN_DIM)
    bytes_accessed = (2 * mm                              # bf16 weights
                      + 4 * (HID + NK + HID + IN_DIM)     # f32 biases
                      + 4 * NK * NK                       # grouping matrix
                      + 4 * B * 2 * (IN_DIM + NK))        # x,u in + recon,probs out
    cost = pl.CostEstimate(flops=flops, transcendentals=transcendentals,
                           bytes_accessed=bytes_accessed)

    recon, probs_flat = pl.pallas_call(
        vae_fused_kernel,
        out_shape=(jax.ShapeDtypeStruct((B, IN_DIM), jnp.float32),
                   jax.ShapeDtypeStruct((B, NK), jnp.float32)),
        grid=grid,
        in_specs=[
            pl.BlockSpec(memory_space=pltpu.MemorySpace.SMEM),      # temp scalar
            pl.BlockSpec((tb, IN_DIM), lambda i: (i, 0)),           # x
            pl.BlockSpec((tb, NK), lambda i: (i, 0)),               # u
            pl.BlockSpec((NK, NK), lambda i: (0, 0)),               # G (resident)
            pl.BlockSpec((IN_DIM, HID), lambda i: (0, 0)),          # w1 (resident)
            pl.BlockSpec((1, HID), lambda i: (0, 0)),               # b1
            pl.BlockSpec((HID, NK), lambda i: (0, 0)),              # w2
            pl.BlockSpec((1, NK), lambda i: (0, 0)),                # b2
            pl.BlockSpec((NK, HID), lambda i: (0, 0)),              # w3
            pl.BlockSpec((1, HID), lambda i: (0, 0)),               # b3
            pl.BlockSpec((HID, IN_DIM), lambda i: (0, 0)),          # w4
            pl.BlockSpec((1, IN_DIM), lambda i: (0, 0)),            # b4
        ],
        out_specs=(pl.BlockSpec((tb, IN_DIM), lambda i: (i, 0)),    # recon (lane-dense)
                   pl.BlockSpec((tb, NK), lambda i: (i, 0))),       # probs (lane-dense)
        compiler_params=pltpu.CompilerParams(
            dimension_semantics=("parallel",),
            vmem_limit_bytes=32 * 1024 * 1024),
        cost_estimate=cost,
    )(temp_arr, x2, u2, g, w1, b1, w2, b2, w3, b3, w4, b4)

    probs = probs_flat.reshape(B, N, K)
    return recon, probs


# ----------------------------------------------------------------- params ---
def init_params(key):
    """PyTorch-nn.Linear-style init; weights stored transposed (in, out) in bf16
    (MXU operands), biases in f32 (accumulator / elementwise precision)."""
    def linear(k, fan_in, fan_out):
        kw, kb = jax.random.split(k)
        bound = 1.0 / math.sqrt(fan_in)
        w = jax.random.uniform(kw, (fan_in, fan_out), jnp.float32, -bound, bound)
        b = jax.random.uniform(kb, (1, fan_out), jnp.float32, -bound, bound)
        return w.astype(jnp.bfloat16), b

    k1, k2, k3, k4 = jax.random.split(key, 4)
    w1, b1 = linear(k1, IN_DIM, HID)
    w2, b2 = linear(k2, HID, NK)
    w3, b3 = linear(k3, NK, HID)
    w4, b4 = linear(k4, HID, IN_DIM)
    return (w1, b1, w2, b2, w3, b3, w4, b4)


if __name__ == "__main__":
    key = jax.random.PRNGKey(0)
    pkey, xkey, ukey = jax.random.split(key, 3)

    params = init_params(pkey)

    B = 8
    x = jax.random.uniform(xkey, (B, 1, 28, 28), jnp.float32)   # MNIST-like NCHW input
    u = jax.random.uniform(ukey, (B, N, K), jnp.float32)        # base uniforms for gumbel noise

    fwd = jax.jit(vae_forward)
    recon, probs = fwd(params, x, u, jnp.float32(INITIAL_TEMP))
    jax.block_until_ready((recon, probs))

    assert recon.shape == (B, IN_DIM) and recon.dtype == jnp.float32
    assert probs.shape == (B, N, K) and probs.dtype == jnp.float32
    print("KERNEL_OK")
</pallas_src>

<mosaic_0001>
module attributes {stable_mosaic.version = 11 : i64} {
  func.func @vae_fused_kernel(%arg0: i32, %arg1: memref<1xf32, #tpu.memory_space<smem>>, %arg2: memref<8x784xf32, #tpu.memory_space<vmem>>, %arg3: memref<8x200xf32, #tpu.memory_space<vmem>>, %arg4: memref<200x200xf32, #tpu.memory_space<vmem>>, %arg5: memref<784x400xbf16, #tpu.memory_space<vmem>>, %arg6: memref<1x400xf32, #tpu.memory_space<vmem>>, %arg7: memref<400x200xbf16, #tpu.memory_space<vmem>>, %arg8: memref<1x200xf32, #tpu.memory_space<vmem>>, %arg9: memref<200x400xbf16, #tpu.memory_space<vmem>>, %arg10: memref<1x400xf32, #tpu.memory_space<vmem>>, %arg11: memref<400x784xbf16, #tpu.memory_space<vmem>>, %arg12: memref<1x784xf32, #tpu.memory_space<vmem>>, %arg13: memref<8x784xf32, #tpu.memory_space<vmem>>, %arg14: memref<8x200xf32, #tpu.memory_space<vmem>>) attributes {dimension_semantics = [#tpu.dimension_semantics<parallel>], iteration_bounds = array<i64: 1>, scalar_prefetch = 0 : i64, scratch_operands = 0 : i64, tpu.core_type = #tpu.core_type<tc>, window_params = [{transform_indices = @transform_0, window_bounds = array<i64: 1>}, {transform_indices = @transform_1, window_bounds = array<i64: 8, 784>}, {transform_indices = @transform_2, window_bounds = array<i64: 8, 200>}, {pipeline_mode = #tpu.pipeline_mode<synchronous>, transform_indices = @transform_3, window_bounds = array<i64: 200, 200>}, {pipeline_mode = #tpu.pipeline_mode<synchronous>, transform_indices = @transform_4, window_bounds = array<i64: 784, 400>}, {pipeline_mode = #tpu.pipeline_mode<synchronous>, transform_indices = @transform_5, window_bounds = array<i64: 1, 400>}, {pipeline_mode = #tpu.pipeline_mode<synchronous>, transform_indices = @transform_6, window_bounds = array<i64: 400, 200>}, {pipeline_mode = #tpu.pipeline_mode<synchronous>, transform_indices = @transform_7, window_bounds = array<i64: 1, 200>}, {pipeline_mode = #tpu.pipeline_mode<synchronous>, transform_indices = @transform_8, window_bounds = array<i64: 200, 400>}, {pipeline_mode = #tpu.pipeline_mode<synchronous>, transform_indices = @transform_9, window_bounds = array<i64: 1, 400>}, {pipeline_mode = #tpu.pipeline_mode<synchronous>, transform_indices = @transform_10, window_bounds = array<i64: 400, 784>}, {pipeline_mode = #tpu.pipeline_mode<synchronous>, transform_indices = @transform_11, window_bounds = array<i64: 1, 784>}, {transform_indices = @transform_12, window_bounds = array<i64: 8, 784>}, {transform_indices = @transform_13, window_bounds = array<i64: 8, 200>}]} {
    %c0 = arith.constant 0 : index
    %c0_0 = arith.constant 0 : index
    %0 = vector.load %arg2[%c0, %c0_0] : memref<8x784xf32, #tpu.memory_space<vmem>>, vector<8x784xf32>
    %1 = arith.truncf %0 : vector<8x784xf32> to vector<8x784xbf16>
    %c0_1 = arith.constant 0 : index
    %c0_2 = arith.constant 0 : index
    %2 = vector.load %arg5[%c0_1, %c0_2] : memref<784x400xbf16, #tpu.memory_space<vmem>>, vector<784x400xbf16>
    %cst = arith.constant dense<0.000000e+00> : vector<8x400xf32>
    %3 = tpu.matmul %1, %2, %cst {dimension_numbers = #tpu.dot_dimension_numbers<[1], [0], [0], [1], [0, 0, 1, 1], [], []>} : vector<8x784xbf16>, vector<784x400xbf16>, vector<8x400xf32> -> vector<8x400xf32>
    %c0_3 = arith.constant 0 : index
    %c0_4 = arith.constant 0 : index
    %4 = vector.load %arg6[%c0_3, %c0_4] : memref<1x400xf32, #tpu.memory_space<vmem>>, vector<1x400xf32>
    %5 = vector.broadcast %4 : vector<1x400xf32> to vector<8x400xf32>
    %6 = arith.addf %3, %5 : vector<8x400xf32>
    %cst_5 = arith.constant 0.000000e+00 : f32
    %7 = vector.broadcast %cst_5 : f32 to vector<8x400xf32>
    %8 = arith.maximumf %6, %7 : vector<8x400xf32>
    %9 = arith.truncf %8 : vector<8x400xf32> to vector<8x400xbf16>
    %c0_6 = arith.constant 0 : index
    %c0_7 = arith.constant 0 : index
    %10 = vector.load %arg7[%c0_6, %c0_7] : memref<400x200xbf16, #tpu.memory_space<vmem>>, vector<400x200xbf16>
    %cst_8 = arith.constant dense<0.000000e+00> : vector<8x200xf32>
    %11 = tpu.matmul %9, %10, %cst_8 {dimension_numbers = #tpu.dot_dimension_numbers<[1], [0], [0], [1], [0, 0, 1, 1], [], []>} : vector<8x400xbf16>, vector<400x200xbf16>, vector<8x200xf32> -> vector<8x200xf32>
    %c0_9 = arith.constant 0 : index
    %c0_10 = arith.constant 0 : index
    %12 = vector.load %arg8[%c0_9, %c0_10] : memref<1x200xf32, #tpu.memory_space<vmem>>, vector<1x200xf32>
    %13 = vector.broadcast %12 : vector<1x200xf32> to vector<8x200xf32>
    %14 = arith.addf %11, %13 : vector<8x200xf32>
    %c0_11 = arith.constant 0 : index
    %c0_12 = arith.constant 0 : index
    %15 = vector.load %arg4[%c0_11, %c0_12] : memref<200x200xf32, #tpu.memory_space<vmem>>, vector<200x200xf32>
    %cst_13 = arith.constant dense<0xFF800000> : vector<8xf32>
    %16 = vector.multi_reduction <maximumf>, %14, %cst_13 [1] : vector<8x200xf32> to vector<8xf32>
    %17 = vector.shape_cast %16 : vector<8xf32> to vector<8x1xf32>
    %18 = vector.broadcast %17 : vector<8x1xf32> to vector<8x200xf32>
    %19 = arith.subf %14, %18 : vector<8x200xf32>
    %20 = math.exp %19 : vector<8x200xf32>
    %cst_14 = arith.constant dense<0.000000e+00> : vector<8x200xf32>
    %21 = tpu.matmul %20, %15, %cst_14 {dimension_numbers = #tpu.dot_dimension_numbers<[1], [0], [0], [1], [0, 0, 1, 1], [], []>} : vector<8x200xf32>, vector<200x200xf32>, vector<8x200xf32> -> vector<8x200xf32>
    %22 = arith.divf %20, %21 : vector<8x200xf32>
    %c0_15 = arith.constant 0 : index
    %c0_16 = arith.constant 0 : index
    %23 = vector.load %arg14[%c0_15, %c0_16] : memref<8x200xf32, #tpu.memory_space<vmem>>, vector<8x200xf32>
    tpu.vector_store %arg14[%c0_15, %c0_16], %22 {strides = array<i32>} : memref<8x200xf32, #tpu.memory_space<vmem>>, vector<8x200xf32>,
    %c0_17 = arith.constant 0 : index
    %c0_18 = arith.constant 0 : index
    %24 = vector.load %arg3[%c0_17, %c0_18] : memref<8x200xf32, #tpu.memory_space<vmem>>, vector<8x200xf32>
    %cst_19 = arith.constant 1.1920929E-7 : f32
    %cst_20 = arith.constant 0.99999988 : f32
    %25 = vector.broadcast %cst_19 : f32 to vector<8x200xf32>
    %26 = arith.maximumf %25, %24 : vector<8x200xf32>
    %27 = vector.broadcast %cst_20 : f32 to vector<8x200xf32>
    %28 = arith.minimumf %27, %26 : vector<8x200xf32>
    %29 = math.log %28 : vector<8x200xf32>
    %cst_21 = arith.constant 0.000000e+00 : f32
    %30 = vector.broadcast %cst_21 : f32 to vector<8x200xf32>
    %31 = arith.subf %30, %29 : vector<8x200xf32>
    %32 = math.log %31 : vector<8x200xf32>
    %cst_22 = arith.constant 0.000000e+00 : f32
    %33 = vector.broadcast %cst_22 : f32 to vector<8x200xf32>
    %34 = arith.subf %33, %32 : vector<8x200xf32>
    %35 = arith.addf %14, %34 : vector<8x200xf32>
    %c0_23 = arith.constant 0 : index
    %36 = memref.load %arg1[%c0_23] : memref<1xf32, #tpu.memory_space<smem>>
    %37 = vector.broadcast %36 : f32 to vector<8x200xf32>
    %38 = arith.divf %35, %37 : vector<8x200xf32>
    %cst_24 = arith.constant dense<0xFF800000> : vector<8xf32>
    %39 = vector.multi_reduction <maximumf>, %38, %cst_24 [1] : vector<8x200xf32> to vector<8xf32>
    %40 = vector.shape_cast %39 : vector<8xf32> to vector<8x1xf32>
    %41 = vector.broadcast %40 : vector<8x1xf32> to vector<8x200xf32>
    %42 = arith.subf %38, %41 : vector<8x200xf32>
    %43 = math.exp %42 : vector<8x200xf32>
    %cst_25 = arith.constant dense<0.000000e+00> : vector<8x200xf32>
    %44 = tpu.matmul %43, %15, %cst_25 {dimension_numbers = #tpu.dot_dimension_numbers<[1], [0], [0], [1], [0, 0, 1, 1], [], []>} : vector<8x200xf32>, vector<200x200xf32>, vector<8x200xf32> -> vector<8x200xf32>
    %45 = tpu.reciprocal %44 {approx = true} : vector<8x200xf32> -> vector<8x200xf32>
    %46 = arith.mulf %43, %45 : vector<8x200xf32>
    %47 = arith.truncf %46 : vector<8x200xf32> to vector<8x200xbf16>
    %c0_26 = arith.constant 0 : index
    %c0_27 = arith.constant 0 : index
    %48 = vector.load %arg9[%c0_26, %c0_27] : memref<200x400xbf16, #tpu.memory_space<vmem>>, vector<200x400xbf16>
    %cst_28 = arith.constant dense<0.000000e+00> : vector<8x400xf32>
    %49 = tpu.matmul %47, %48, %cst_28 {dimension_numbers = #tpu.dot_dimension_numbers<[1], [0], [0], [1], [0, 0, 1, 1], [], []>} : vector<8x200xbf16>, vector<200x400xbf16>, vector<8x400xf32> -> vector<8x400xf32>
    %c0_29 = arith.constant 0 : index
    %c0_30 = arith.constant 0 : index
    %50 = vector.load %arg10[%c0_29, %c0_30] : memref<1x400xf32, #tpu.memory_space<vmem>>, vector<1x400xf32>
    %51 = vector.broadcast %50 : vector<1x400xf32> to vector<8x400xf32>
    %52 = arith.addf %49, %51 : vector<8x400xf32>
    %cst_31 = arith.constant 0.000000e+00 : f32
    %53 = vector.broadcast %cst_31 : f32 to vector<8x400xf32>
    %54 = arith.maximumf %52, %53 : vector<8x400xf32>
    %55 = arith.truncf %54 : vector<8x400xf32> to vector<8x400xbf16>
    %c0_32 = arith.constant 0 : index
    %c0_33 = arith.constant 0 : index
    %56 = vector.load %arg11[%c0_32, %c0_33] : memref<400x784xbf16, #tpu.memory_space<vmem>>, vector<400x784xbf16>
    %cst_34 = arith.constant dense<0.000000e+00> : vector<8x784xf32>
    %57 = tpu.matmul %55, %56, %cst_34 {dimension_numbers = #tpu.dot_dimension_numbers<[1], [0], [0], [1], [0, 0, 1, 1], [], []>} : vector<8x400xbf16>, vector<400x784xbf16>, vector<8x784xf32> -> vector<8x784xf32>
    %c0_35 = arith.constant 0 : index
    %c0_36 = arith.constant 0 : index
    %58 = vector.load %arg12[%c0_35, %c0_36] : memref<1x784xf32, #tpu.memory_space<vmem>>, vector<1x784xf32>
    %59 = vector.broadcast %58 : vector<1x784xf32> to vector<8x784xf32>
    %60 = arith.addf %57, %59 : vector<8x784xf32>
    %61 = math.absf %60 : vector<8x784xf32>
    %cst_37 = arith.constant 0.000000e+00 : f32
    %62 = vector.broadcast %cst_37 : f32 to vector<8x784xf32>
    %63 = arith.subf %62, %61 : vector<8x784xf32>
    %64 = math.exp %63 : vector<8x784xf32>
    %cst_38 = arith.constant 1.000000e+00 : f32
    %65 = vector.broadcast %cst_38 : f32 to vector<8x784xf32>
    %66 = arith.addf %65, %64 : vector<8x784xf32>
    %67 = tpu.reciprocal %66 {approx = true} : vector<8x784xf32> -> vector<8x784xf32>
    %cst_39 = arith.constant 0.000000e+00 : f32
    %68 = vector.broadcast %cst_39 : f32 to vector<8x784xf32>
    %69 = arith.cmpf oge, %60, %68 : vector<8x784xf32>
    %70 = arith.mulf %64, %67 : vector<8x784xf32>
    %71 = arith.select %69, %67, %70 : vector<8x784xi1>, vector<8x784xf32>
    %c0_40 = arith.constant 0 : index
    %c0_41 = arith.constant 0 : index
    %72 = vector.load %arg13[%c0_40, %c0_41] : memref<8x784xf32, #tpu.memory_space<vmem>>, vector<8x784xf32>
    tpu.vector_store %arg13[%c0_40, %c0_41], %71 {strides = array<i32>} : memref<8x784xf32, #tpu.memory_space<vmem>>, vector<8x784xf32>,
    return
  }
  func.func @transform_0(%arg0: i32) -> i32 {
    %c0_i32 = arith.constant 0 : i32
    %c0_i32_0 = arith.constant 0 : i32
    return %c0_i32 : i32
  }
  func.func @transform_1(%arg0: i32) -> (i32, i32) {
    %c0_i32 = arith.constant 0 : i32
    %c0_i32_0 = arith.constant 0 : i32
    return %arg0, %c0_i32 : i32, i32
  }
  func.func @transform_2(%arg0: i32) -> (i32, i32) {
    %c0_i32 = arith.constant 0 : i32
    %c0_i32_0 = arith.constant 0 : i32
    return %arg0, %c0_i32 : i32, i32
  }
  func.func @transform_3(%arg0: i32) -> (i32, i32) {
    %c0_i32 = arith.constant 0 : i32
    %c0_i32_0 = arith.constant 0 : i32
    %c0_i32_1 = arith.constant 0 : i32
    return %c0_i32, %c0_i32_0 : i32, i32
  }
  func.func @transform_4(%arg0: i32) -> (i32, i32) {
    %c0_i32 = arith.constant 0 : i32
    %c0_i32_0 = arith.constant 0 : i32
    %c0_i32_1 = arith.constant 0 : i32
    return %c0_i32, %c0_i32_0 : i32, i32
  }
  func.func @transform_5(%arg0: i32) -> (i32, i32) {
    %c0_i32 = arith.constant 0 : i32
    %c0_i32_0 = arith.constant 0 : i32
    %c0_i32_1 = arith.constant 0 : i32
    return %c0_i32, %c0_i32_0 : i32, i32
  }
  func.func @transform_6(%arg0: i32) -> (i32, i32) {
    %c0_i32 = arith.constant 0 : i32
    %c0_i32_0 = arith.constant 0 : i32
    %c0_i32_1 = arith.constant 0 : i32
    return %c0_i32, %c0_i32_0 : i32, i32
  }
  func.func @transform_7(%arg0: i32) -> (i32, i32) {
    %c0_i32 = arith.constant 0 : i32
    %c0_i32_0 = arith.constant 0 : i32
    %c0_i32_1 = arith.constant 0 : i32
    return %c0_i32, %c0_i32_0 : i32, i32
  }
  func.func @transform_8(%arg0: i32) -> (i32, i32) {
    %c0_i32 = arith.constant 0 : i32
    %c0_i32_0 = arith.constant 0 : i32
    %c0_i32_1 = arith.constant 0 : i32
    return %c0_i32, %c0_i32_0 : i32, i32
  }
  func.func @transform_9(%arg0: i32) -> (i32, i32) {
    %c0_i32 = arith.constant 0 : i32
    %c0_i32_0 = arith.constant 0 : i32
    %c0_i32_1 = arith.constant 0 : i32
    return %c0_i32, %c0_i32_0 : i32, i32
  }
  func.func @transform_10(%arg0: i32) -> (i32, i32) {
    %c0_i32 = arith.constant 0 : i32
    %c0_i32_0 = arith.constant 0 : i32
    %c0_i32_1 = arith.constant 0 : i32
    return %c0_i32, %c0_i32_0 : i32, i32
  }
  func.func @transform_11(%arg0: i32) -> (i32, i32) {
    %c0_i32 = arith.constant 0 : i32
    %c0_i32_0 = arith.constant 0 : i32
    %c0_i32_1 = arith.constant 0 : i32
    return %c0_i32, %c0_i32_0 : i32, i32
  }
  func.func @transform_12(%arg0: i32) -> (i32, i32) {
    %c0_i32 = arith.constant 0 : i32
    %c0_i32_0 = arith.constant 0 : i32
    return %arg0, %c0_i32 : i32, i32
  }
  func.func @transform_13(%arg0: i32) -> (i32, i32) {
    %c0_i32 = arith.constant 0 : i32
    %c0_i32_0 = arith.constant 0 : i32
    return %arg0, %c0_i32 : i32, i32
  }
}

</mosaic_0001>

<bundles_post_ra>
// kernel: vae_forward.1
= control target key start
LH: loop header
LB: loop body
LE: loop exit
PB: predicated region body
PF: predicated region fallthrough
CT: control target
= control target key end

     0   :  { %vm1246_vm0 = vcmask 130048   ;;  %s10288_s0 = inlined_call_operand.<no memory space> [shape: f32[1], index: 0, kind: input, shape index: {}]   ;;  %s10289_s1 = inlined_call_operand.vmem [shape: f32[8,784], index: 1, kind: input, shape index: {}]   ;;  %s10290_s2 = inlined_call_operand.vmem [shape: f32[8,200], index: 2, kind: input, shape index: {}]   ;;  %s10291_s3 = inlined_call_operand.vmem [shape: f32[200,200], index: 3, kind: input, shape index: {}]   ;;  %s10292_s4 = inlined_call_operand.vmem [shape: bf16[784,400], index: 4, kind: input, shape index: {}]   ;;  %s10293_s5 = inlined_call_operand.vmem [shape: f32[1,400], index: 5, kind: input, shape index: {}]   ;;  %s10294_s6 = inlined_call_operand.vmem [shape: bf16[400,200], index: 6, kind: input, shape index: {}]   ;;  %s10295_s7 = inlined_call_operand.vmem [shape: f32[1,200], index: 7, kind: input, shape index: {}]   ;;  %s10296_s8 = inlined_call_operand.vmem [shape: bf16[200,400], index: 8, kind: input, shape index: {}]   ;;  %s10297_s9 = inlined_call_operand.vmem [shape: f32[1,400], index: 9, kind: input, shape index: {}]   ;;  %s10298_s10 = inlined_call_operand.vmem [shape: bf16[400,784], index: 10, kind: input, shape index: {}]   ;;  %s10299_s11 = inlined_call_operand.vmem [shape: f32[1,784], index: 11, kind: input, shape index: {}]   ;;  %s10300_s12 = inlined_call_operand.hbm [shape: f32[8,784], index: 12, kind: output, shape index: {0}]   ;;  %s10301_s13 = inlined_call_operand.vmem [shape: f32[8,200], index: 13, kind: output, shape index: {1}]  }
   0x1   :  { %v4473_v0 = vld [vmem:[%s10292_s4 + $0xe0] sm:$0xf]  ;;  %v6286_v1 = vld [vmem:[%s10292_s4 + $0xec] sm:$0xf0] }
   0x2   :  { %v4601_v2 = vld [vmem:[%s10292_s4 + $0x1e0] sm:$0xf]  ;;  %v4474_v3 = vor.u32 %v6286_v1, %v4473_v0  ;;  %v6318_v4 = vld [vmem:[%s10292_s4 + $0x1ec] sm:$0xf0] }
   0x3   :  { %v4729_v5 = vld [vmem:[%s10292_s4 + $0x2e0] sm:$0xf]  ;;  %v6350_v6 = vld [vmem:[%s10292_s4 + $0x2ec] sm:$0xf0]  ;;  %v4602_v7 = vor.u32 %v6318_v4, %v4601_v2 }
   0x4   :  { %v4730_v8 = vor.u32 %v6350_v6, %v4729_v5  ;;  %v4857_v9 = vld [vmem:[%s10292_s4 + $0x3e0] sm:$0xf]  ;;  %v6382_v10 = vld [vmem:[%s10292_s4 + $0x3ec] sm:$0xf0]  ;;  %1250 = vmatpush.bf16.msra.mxu0 %v4474_v3 }
   0x5   :  { %v4457_v11 = vld [vmem:[%s10292_s4 + $0xc0] sm:$0xf]  ;;  %v4858_v12 = vor.u32 %v6382_v10, %v4857_v9  ;;  %v6282_v13 = vld [vmem:[%s10292_s4 + $0xcc] sm:$0xf0]  ;;  %1263 = vmatpush.bf16.msra.mxu1 %v4602_v7 }
   0x6   :  { %v4585_v14 = vld [vmem:[%s10292_s4 + $0x1c0] sm:$0xf]  ;;  %v6314_v15 = vld [vmem:[%s10292_s4 + $0x1cc] sm:$0xf0]  ;;  %1276 = vmatpush.bf16.msra.mxu2 %v4730_v8  ;;  %v4458_v16 = vor.u32 %v6282_v13, %v4457_v11 }
   0x7   :  { %v4586_v17 = vor.u32 %v6314_v15, %v4585_v14  ;;  %v4713_v18 = vld [vmem:[%s10292_s4 + $0x2c0] sm:$0xf]  ;;  %v6346_v19 = vld [vmem:[%s10292_s4 + $0x2cc] sm:$0xf0]  ;;  %1289 = vmatpush.bf16.msra.mxu3 %v4858_v12 }
   0x8   :  { %v4841_v20 = vld [vmem:[%s10292_s4 + $0x3c0] sm:$0xf]  ;;  %v4714_v21 = vor.u32 %v6346_v19, %v4713_v18  ;;  %v6378_v22 = vld [vmem:[%s10292_s4 + $0x3cc] sm:$0xf0]  ;;  %1251 = vmatpush.bf16.msra.mxu0 %v4458_v16 }
   0x9   :  { %v4441_v23 = vld [vmem:[%s10292_s4 + $0xa0] sm:$0xf]  ;;  %v6278_v24 = vld [vmem:[%s10292_s4 + $0xac] sm:$0xf0]  ;;  %v4842_v25 = vor.u32 %v6378_v22, %v4841_v20  ;;  %1264 = vmatpush.bf16.msra.mxu1 %v4586_v17 }
   0xa   :  { %v4569_v26 = vld [vmem:[%s10292_s4 + $0x1a0] sm:$0xf]  ;;  %v6310_v27 = vld [vmem:[%s10292_s4 + $0x1ac] sm:$0xf0]  ;;  %v4442_v29 = vor.u32 %v6278_v24, %v4441_v23  ;;  %1277 = vmatpush.bf16.msra.mxu2 %v4714_v21 }
   0xb   :  { %v4697_v28 = vld [vmem:[%s10292_s4 + $0x2a0] sm:$0xf]  ;;  %v6342_v30 = vld [vmem:[%s10292_s4 + $0x2ac] sm:$0xf0]  ;;  %v4570_v33 = vor.u32 %v6310_v27, %v4569_v26  ;;  %1290 = vmatpush.bf16.msra.mxu3 %v4842_v25 }
   0xc   :  { %v4825_v31 = vld [vmem:[%s10292_s4 + $0x3a0] sm:$0xf]  ;;  %v6374_v32 = vld [vmem:[%s10292_s4 + $0x3ac] sm:$0xf0]  ;;  %v4698_v34 = vor.u32 %v6342_v30, %v4697_v28  ;;  %1252 = vmatpush.bf16.msra.mxu0 %v4442_v29 }
   0xd   :  { %v4425_v35 = vld [vmem:[%s10292_s4 + $0x80] sm:$0xf]  ;;  %v6274_v36 = vld [vmem:[%s10292_s4 + $0x8c] sm:$0xf0]  ;;  %v4826_v38 = vor.u32 %v6374_v32, %v4825_v31  ;;  %1265 = vmatpush.bf16.msra.mxu1 %v4570_v33  ;;  %v6284_v33 = vld [vmem:[%s10292_s4 + $0xe4] sm:$0xf] }
   0xe   :  { %v4553_v37 = vld [vmem:[%s10292_s4 + $0x180] sm:$0xf]  ;;  %v6306_v39 = vld [vmem:[%s10292_s4 + $0x18c] sm:$0xf0]  ;;  %v4426_v44 = vor.u32 %v6274_v36, %v4425_v35  ;;  %1278 = vmatpush.bf16.msra.mxu2 %v4698_v34  ;;  %v4475_v34 = vld [vmem:[%s10292_s4 + $0xf0] sm:$0xf0] }
   0xf   :  { %v4681_v40 = vld [vmem:[%s10292_s4 + $0x280] sm:$0xf]  ;;  %v6338_v41 = vld [vmem:[%s10292_s4 + $0x28c] sm:$0xf0]  ;;  %v4554_v45 = vor.u32 %v6306_v39, %v4553_v37  ;;  %1291 = vmatpush.bf16.msra.mxu3 %v4826_v38 }
  0x10   :  { %v4809_v42 = vld [vmem:[%s10292_s4 + $0x380] sm:$0xf]  ;;  %v6370_v43 = vld [vmem:[%s10292_s4 + $0x38c] sm:$0xf0]  ;;  %v4682_v46 = vor.u32 %v6338_v41, %v4681_v40  ;;  %1253 = vmatpush.bf16.msra.mxu0 %v4426_v44  ;;  %v4603_v44 = vld [vmem:[%s10292_s4 + $0x1f0] sm:$0xf0] }
  0x11   :  { %v4409_v47 = vld [vmem:[%s10292_s4 + $0x60] sm:$0xf]  ;;  %v6270_v48 = vld [vmem:[%s10292_s4 + $0x6c] sm:$0xf0]  ;;  %v4810_v50 = vor.u32 %v6370_v43, %v4809_v42  ;;  %1266 = vmatpush.bf16.msra.mxu1 %v4554_v45  ;;  %v6316_v43 = vld [vmem:[%s10292_s4 + $0x1e4] sm:$0xf] }
  0x12   :  { %v4537_v49 = vld [vmem:[%s10292_s4 + $0x160] sm:$0xf]  ;;  %v6302_v51 = vld [vmem:[%s10292_s4 + $0x16c] sm:$0xf0]  ;;  %v4410_v56 = vor.u32 %v6270_v48, %v4409_v47  ;;  %1279 = vmatpush.bf16.msra.mxu2 %v4682_v46  ;;  %v49_v45 = vld [vmem:[%s10289_s1 + $0x18] sm:$0xff]  ;;  %v4478_v47 = vor.u32 %v6284_v33, %v4475_v34 }
  0x13   :  { %v4665_v52 = vld [vmem:[%s10292_s4 + $0x260] sm:$0xf]  ;;  %v6334_v53 = vld [vmem:[%s10292_s4 + $0x26c] sm:$0xf0]  ;;  %v4538_v57 = vor.u32 %v6302_v51, %v4537_v49  ;;  %1292 = vmatpush.bf16.msra.mxu3 %v4810_v50 }
  0x14   :  { %v4793_v54 = vld [vmem:[%s10292_s4 + $0x360] sm:$0xf]  ;;  %v6366_v55 = vld [vmem:[%s10292_s4 + $0x36c] sm:$0xf0]  ;;  %v4666_v58 = vor.u32 %v6334_v53, %v4665_v52  ;;  %1254 = vmatpush.bf16.msra.mxu0 %v4410_v56  ;;  %v6280_v53 = vld [vmem:[%s10292_s4 + $0xc4] sm:$0xf] }
  0x15   :  { %v4393_v59 = vld [vmem:[%s10292_s4 + $0x40] sm:$0xf]  ;;  %v6266_v60 = vld [vmem:[%s10292_s4 + $0x4c] sm:$0xf0]  ;;  %v4794_v62 = vor.u32 %v6366_v55, %v4793_v54  ;;  %1267 = vmatpush.bf16.msra.mxu1 %v4538_v57  ;;  %v4459_v54 = vld [vmem:[%s10292_s4 + $0xd0] sm:$0xf0]  ;;  %v7130_v57 = vpack.c.bf16 %v49_v45, %v49_v45 }
  0x16   :  { %v4521_v61 = vld [vmem:[%s10292_s4 + $0x140] sm:$0xf]  ;;  %v6298_v63 = vld [vmem:[%s10292_s4 + $0x14c] sm:$0xf0]  ;;  %v4394_v4 = vor.u32 %v6266_v60, %v4393_v59  ;;  %1280 = vmatpush.bf16.msra.mxu2 %v4666_v58  ;;  %v47_v58 = vld [vmem:[%s10289_s1 + $0x8] sm:$0xff]  ;;  %v4606_v59 = vor.u32 %v6316_v43, %v4603_v44 }
  0x17   :  { %v4649_v0 = vld [vmem:[%s10292_s4 + $0x240] sm:$0xf]  ;;  %v6330_v1 = vld [vmem:[%s10292_s4 + $0x24c] sm:$0xf0]  ;;  %v4522_v5 = vor.u32 %v6298_v63, %v4521_v61  ;;  %1293 = vmatpush.bf16.msra.mxu3 %v4794_v62  ;;  %v6312_v61 = vld [vmem:[%s10292_s4 + $0x1c4] sm:$0xf] }
  0x18   :  { %v4777_v2 = vld [vmem:[%s10292_s4 + $0x340] sm:$0xf]  ;;  %v6362_v3 = vld [vmem:[%s10292_s4 + $0x34c] sm:$0xf0]  ;;  %v4650_v6 = vor.u32 %v6330_v1, %v4649_v0  ;;  %1255 = vmatpush.bf16.msra.mxu0 %v4394_v4  ;;  %v4587_v62 = vld [vmem:[%s10292_s4 + $0x1d0] sm:$0xf0]  ;;  %v4462_v0 = vor.u32 %v6280_v53, %v4459_v54 }
  0x19   :  { %v4377_v7 = vld [vmem:[%s10292_s4 + $0x20] sm:$0xf]  ;;  %v6262_v8 = vld [vmem:[%s10292_s4 + $0x2c] sm:$0xf0]  ;;  %v4778_v10 = vor.u32 %v6362_v3, %v4777_v2  ;;  %1268 = vmatpush.bf16.msra.mxu1 %v4522_v5  ;;  %v6276_v5 = vld [vmem:[%s10292_s4 + $0xa4] sm:$0xf] }
  0x1a   :  { %v4505_v9 = vld [vmem:[%s10292_s4 + $0x120] sm:$0xf]  ;;  %v6294_v11 = vld [vmem:[%s10292_s4 + $0x12c] sm:$0xf0]  ;;  %v4378_v16 = vor.u32 %v6262_v8, %v4377_v7  ;;  %1281 = vmatpush.bf16.msra.mxu2 %v4650_v6  ;;  %v4443_v6 = vld [vmem:[%s10292_s4 + $0xb0] sm:$0xf0]  ;;  %v7161_v7 = vpack.c.bf16 %v47_v58, %v47_v58  ;;  %v4590_v8 = vor.u32 %v6312_v61, %v4587_v62 }
  0x1b   :  { %v4633_v12 = vld [vmem:[%s10292_s4 + $0x220] sm:$0xf]  ;;  %v6326_v13 = vld [vmem:[%s10292_s4 + $0x22c] sm:$0xf0]  ;;  %v4506_v20 = vor.u32 %v6294_v11, %v4505_v9  ;;  %1294 = vmatpush.bf16.msra.mxu3 %v4778_v10  ;;  %v6308_v10 = vld [vmem:[%s10292_s4 + $0x1a4] sm:$0xf] }
  0x1c   :  { %v4761_v14 = vld [vmem:[%s10292_s4 + $0x320] sm:$0xf]  ;;  %v6358_v15 = vld [vmem:[%s10292_s4 + $0x32c] sm:$0xf0]  ;;  %v4634_v21 = vor.u32 %v6326_v13, %v4633_v12  ;;  %1256 = vmatpush.bf16.msra.mxu0 %v4378_v16  ;;  %v4571_v11 = vld [vmem:[%s10292_s4 + $0x1b0] sm:$0xf0]  ;;  %v4446_v13 = vor.u32 %v6276_v5, %v4443_v6 }
  0x1d   :  { %v4361_v17 = vld [vmem:[%s10292_s4] sm:$0xf]  ;;  %v6258_v18 = vld [vmem:[%s10292_s4 + $0xc] sm:$0xf0]  ;;  %v4762_v25 = vor.u32 %v6358_v15, %v4761_v14  ;;  %1269 = vmatpush.bf16.msra.mxu1 %v4506_v20  ;;  %v4574_v20 = vor.u32 %v6308_v10, %v4571_v11  ;;  %v6264_v43 = vld [vmem:[%s10292_s4 + $0x44] sm:$0xf] }
  0x1e   :  { %v4489_v19 = vld [vmem:[%s10292_s4 + $0x100] sm:$0xf]  ;;  %v6290_v22 = vld [vmem:[%s10292_s4 + $0x10c] sm:$0xf0]  ;;  %v4362_v32 = vor.u32 %v6258_v18, %v4361_v17  ;;  %1282 = vmatpush.bf16.msra.mxu2 %v4634_v21  ;;  %v6272_v18 = vld [vmem:[%s10292_s4 + $0x84] sm:$0xf] }
  0x1f   :  { %v4617_v23 = vld [vmem:[%s10292_s4 + $0x200] sm:$0xf]  ;;  %v6322_v24 = vld [vmem:[%s10292_s4 + $0x20c] sm:$0xf0]  ;;  %v4490_v36 = vor.u32 %v6290_v22, %v4489_v19  ;;  %1295 = vmatpush.bf16.msra.mxu3 %v4762_v25  ;;  %v4427_v19 = vld [vmem:[%s10292_s4 + $0x90] sm:$0xf0] }
  0x20   :  { %v4745_v26 = vld [vmem:[%s10292_s4 + $0x300] sm:$0xf]  ;;  %v6354_v27 = vld [vmem:[%s10292_s4 + $0x30c] sm:$0xf0]  ;;  %v4618_v37 = vor.u32 %v6322_v24, %v4617_v23  ;;  %1257 = vmatpush.bf16.msra.mxu0 %v4362_v32  ;;  %v6304_v22 = vld [vmem:[%s10292_s4 + $0x184] sm:$0xf]  ;;  %v4430_v25 = vor.u32 %v6272_v18, %v4427_v19 }
  0x21   :  { %v4985_v28 = vld [vmem:[%s10292_s4 + $0x4e0] sm:$0xf]  ;;  %v6414_v29 = vld [vmem:[%s10292_s4 + $0x4ec] sm:$0xf0]  ;;  %v4746_v41 = vor.u32 %v6354_v27, %v4745_v26  ;;  %1270 = vmatpush.bf16.msra.mxu1 %v4490_v36  ;;  %v4555_v23 = vld [vmem:[%s10292_s4 + $0x190] sm:$0xf0] }
  0x22   :  { %v5113_v30 = vld [vmem:[%s10292_s4 + $0x5e0] sm:$0xf]  ;;  %v6446_v31 = vld [vmem:[%s10292_s4 + $0x5ec] sm:$0xf0]  ;;  %v4986_v42 = vor.u32 %v6414_v29, %v4985_v28  ;;  %1283 = vmatpush.bf16.msra.mxu2 %v4618_v37  ;;  %v4558_v33 = vor.u32 %v6304_v22, %v4555_v23  ;;  %v4539_v36 = vld [vmem:[%s10292_s4 + $0x170] sm:$0xf0] }
  0x23   :  { %v48_v35 = vld [vmem:[%s10289_s1 + $0x10] sm:$0xff]  ;;  %v5129_v38 = vld [vmem:[%s10292_s4 + $0x600] sm:$0xf]  ;;  %v5114_v46 = vor.u32 %v6446_v31, %v5113_v30  ;;  %1296 = vmatpush.bf16.msra.mxu3 %v4746_v41  ;;  %v6268_v30 = vld [vmem:[%s10292_s4 + $0x64] sm:$0xf] }
  0x24   :  { %v6450_v39 = vld [vmem:[%s10292_s4 + $0x60c] sm:$0xf0]  ;;  %v46_v40 = vld [vmem:[%s10289_s1] sm:$0xff]  ;;  %v7117_v51 = vpack.c.bf16 %v48_v35, %v48_v35  ;;  %1302 = vmatpush.bf16.msrb.mxu0 %v4986_v42  ;;  %1271 = vmatmul.bf16.vlgmr.msra.gmra.mxu1 %v7161_v7  ;;  %v4411_v31 = vld [vmem:[%s10292_s4 + $0x70] sm:$0xf0] }
  0x25   :  { %v4969_v48 = vld [vmem:[%s10292_s4 + $0x4c0] sm:$0xf]  ;;  %v6410_v49 = vld [vmem:[%s10292_s4 + $0x4cc] sm:$0xf0]  ;;  %v7128_v55 = vpack.c.bf16 %v46_v40, %v46_v40  ;;  %v5130_v56 = vor.u32 %v6450_v39, %v5129_v38  ;;  %1315 = vmatpush.bf16.msrb.mxu1 %v5114_v46  ;;  %v6300_v35 = vld [vmem:[%s10292_s4 + $0x164] sm:$0xf]  ;;  %v4414_v38 = vor.u32 %v6268_v30, %v4411_v31 }
  0x26   :  { %v5097_v50 = vld [vmem:[%s10292_s4 + $0x5c0] sm:$0xf]  ;;  %v6442_v52 = vld [vmem:[%s10292_s4 + $0x5cc] sm:$0xf0]  ;;  %v4970_v60 = vor.u32 %v6410_v49, %v4969_v48  ;;  %1284 = vmatmul.bf16.vlgmr.msra.gmra.mxu2 %v7117_v51  ;;  %1297 = vmatmul.bf16.vlgmr.msra.gmra.mxu3 %v7130_v57  ;;  %v4395_v44 = vld [vmem:[%s10292_s4 + $0x50] sm:$0xf0]  ;;  %v4542_v46 = vor.u32 %v6300_v35, %v4539_v36 }
  0x27   :  { %1341 = vmatpush.bf16.msrb.mxu3 %v4478_v47  ;;  %v5098_v63 = vor.u32 %v6442_v52, %v5097_v50  ;;  %v4953_v1 = vld [vmem:[%s10292_s4 + $0x4a0] sm:$0xf]  ;;  %v6406_v2 = vld [vmem:[%s10292_s4 + $0x4ac] sm:$0xf0]  ;;  %1258 = vmatmul.bf16.vlgmr.msra.gmra.mxu0 %v7128_v55  ;;  %v6296_v48 = vld [vmem:[%s10292_s4 + $0x144] sm:$0xf]  ;;  %v4398_v52 = vor.u32 %v6264_v43, %v4395_v44 }
  0x28   :  { %v5081_v3 = vld [vmem:[%s10292_s4 + $0x5a0] sm:$0xf]  ;;  %v6438_v4 = vld [vmem:[%s10292_s4 + $0x5ac] sm:$0xf0]  ;;  %1335 = vmatpush.bf16.msrb.mxu2 %v5130_v56  ;;  %1303 = vmatpush.bf16.msrb.mxu0 %v4970_v60  ;;  %v4954_v9 = vor.u32 %v6406_v2, %v4953_v1  ;;  %v4523_v49 = vld [vmem:[%s10292_s4 + $0x150] sm:$0xf0] }
  0x29   :  { %1316 = vmatpush.bf16.msrb.mxu1 %v5098_v63  ;;  %v5082_v12 = vor.u32 %v6438_v4, %v5081_v3  ;;  %v4937_v14 = vld [vmem:[%s10292_s4 + $0x480] sm:$0xf]  ;;  %v6402_v15 = vld [vmem:[%s10292_s4 + $0x48c] sm:$0xf0]  ;;  %v4379_v60 = vld [vmem:[%s10292_s4 + $0x30] sm:$0xf0]  ;;  %v4526_v61 = vor.u32 %v6296_v48, %v4523_v49 }
  0x2a   :  { %v5065_v16 = vld [vmem:[%s10292_s4 + $0x580] sm:$0xf]  ;;  %v6434_v17 = vld [vmem:[%s10292_s4 + $0x58c] sm:$0xf0]  ;;  %v4938_v21 = vor.u32 %v6402_v15, %v4937_v14  ;;  %v6292_v63 = vld [vmem:[%s10292_s4 + $0x124] sm:$0xf] }
  0x2b   :  { %1342 = vmatpush.bf16.msrb.mxu3 %v4462_v0  ;;  %v5066_v24 = vor.u32 %v6434_v17, %v5065_v16  ;;  %v4921_v26 = vld [vmem:[%s10292_s4 + $0x460] sm:$0xf]  ;;  %v6398_v27 = vld [vmem:[%s10292_s4 + $0x46c] sm:$0xf0]  ;;  %v4507_v0 = vld [vmem:[%s10292_s4 + $0x130] sm:$0xf0] }
  0x2c   :  { %1354 = vmatpush.bf16.msra.mxu2 %v4606_v59  ;;  %1304 = vmatpush.bf16.msrb.mxu0 %v4954_v9  ;;  %v5049_v28 = vld [vmem:[%s10292_s4 + $0x560] sm:$0xf]  ;;  %v6430_v29 = vld [vmem:[%s10292_s4 + $0x56c] sm:$0xf0]  ;;  %v4922_v34 = vor.u32 %v6398_v27, %v4921_v26  ;;  %v6260_v59 = vld [vmem:[%s10292_s4 + $0x24] sm:$0xf]  ;;  %v4510_v14 = vor.u32 %v6292_v63, %v4507_v0 }
  0x2d   :  { %1317 = vmatpush.bf16.msrb.mxu1 %v5082_v12  ;;  %v52_v32 = vld [vmem:[%s10289_s1 + $0x30] sm:$0xff]  ;;  %v5050_v37 = vor.u32 %v6430_v29, %v5049_v28  ;;  %v4905_v39 = vld [vmem:[%s10292_s4 + $0x440] sm:$0xf]  ;;  %v4382_v3 = vor.u32 %v6260_v59, %v4379_v60  ;;  %v6348_v10 = vld [vmem:[%s10292_s4 + $0x2e4] sm:$0xf] }
  0x2e   :  { %v6394_v40 = vld [vmem:[%s10292_s4 + $0x44c] sm:$0xf0]  ;;  %v5033_v41 = vld [vmem:[%s10292_s4 + $0x540] sm:$0xf]  ;;  %v7240_v45 = vpack.c.bf16 %v52_v32, %v52_v32  ;;  %v4363_v9 = vld [vmem:[%s10292_s4 + $0x10] sm:$0xf0] }
  0x2f   :  { %1343 = vmatpush.bf16.msrb.mxu3 %v4446_v13  ;;  %v6426_v42 = vld [vmem:[%s10292_s4 + $0x54c] sm:$0xf0]  ;;  %v4906_v47 = vor.u32 %v6394_v40, %v4905_v39  ;;  %v4889_v53 = vld [vmem:[%s10292_s4 + $0x420] sm:$0xf]  ;;  %v4731_v11 = vld [vmem:[%s10292_s4 + $0x2f0] sm:$0xf0] }
  0x30   :  { %1355 = vmatpush.bf16.msra.mxu2 %v4590_v8  ;;  %1305 = vmatpush.bf16.msrb.mxu0 %v4938_v21  ;;  %v5034_v50 = vor.u32 %v6426_v42, %v5033_v41  ;;  %v6390_v54 = vld [vmem:[%s10292_s4 + $0x42c] sm:$0xf0]  ;;  %v5017_v56 = vld [vmem:[%s10292_s4 + $0x520] sm:$0xf]  ;;  %v6256_v8 = vld [vmem:[%s10292_s4 + $0x4] sm:$0xf] }
  0x31   :  { %1318 = vmatpush.bf16.msrb.mxu1 %v5066_v24  ;;  %v6422_v58 = vld [vmem:[%s10292_s4 + $0x52c] sm:$0xf0]  ;;  %v4890_v62 = vor.u32 %v6390_v54, %v4889_v53  ;;  %v4873_v1 = vld [vmem:[%s10292_s4 + $0x400] sm:$0xf]  ;;  %v6380_v12 = vld [vmem:[%s10292_s4 + $0x3e4] sm:$0xf]  ;;  %v4734_v24 = vor.u32 %v6348_v10, %v4731_v11 }
  0x32   :  { %v5018_v2 = vor.u32 %v6422_v58, %v5017_v56  ;;  %v6386_v4 = vld [vmem:[%s10292_s4 + $0x40c] sm:$0xf0]  ;;  %v5001_v5 = vld [vmem:[%s10292_s4 + $0x500] sm:$0xf]  ;;  %v4859_v13 = vld [vmem:[%s10292_s4 + $0x3f0] sm:$0xf0] }
  0x33   :  { %1344 = vmatpush.bf16.msrb.mxu3 %v4430_v25  ;;  %v6418_v6 = vld [vmem:[%s10292_s4 + $0x50c] sm:$0xf0]  ;;  %v4874_v15 = vor.u32 %v6386_v4, %v4873_v1  ;;  %v6412_v16 = vld [vmem:[%s10292_s4 + $0x4e4] sm:$0xf]  ;;  %v4987_v17 = vld [vmem:[%s10292_s4 + $0x4f0] sm:$0xf0]  ;;  %v4862_v25 = vor.u32 %v6380_v12, %v4859_v13 }
  0x34   :  { %1356 = vmatpush.bf16.msra.mxu2 %v4574_v20  ;;  %1306 = vmatpush.bf16.msrb.mxu0 %v4922_v34  ;;  %v50_v18 = vld [vmem:[%s10289_s1 + $0x20] sm:$0xff]  ;;  %v5002_v19 = vor.u32 %v6418_v6, %v5001_v5  ;;  %v4366_v20 = vor.u32 %v6256_v8, %v4363_v9  ;;  %v4491_v22 = vld [vmem:[%s10292_s4 + $0x110] sm:$0xf0]  ;;  %v51_v23 = vld [vmem:[%s10289_s1 + $0x28] sm:$0xff]  ;;  %v4990_v29 = vor.u32 %v6412_v16, %v4987_v17 }
  0x35   :  { %1319 = vmatpush.bf16.msrb.mxu1 %v5050_v37  ;;  %v6288_v21 = vld [vmem:[%s10292_s4 + $0x104] sm:$0xf]  ;;  %v5115_v27 = vld [vmem:[%s10292_s4 + $0x5f0] sm:$0xf0]  ;;  %v7331_v30 = vpack.c.bf16 %v50_v18, %v50_v18  ;;  %v7342_v35 = vpack.c.bf16 %v51_v23, %v51_v23 }
  0x36   :  { %5143 = vmatmul.msk.bf16.vlgmr.msrb.gmra.mxu2 %vm1246_vm0, %v7240_v45  ;;  %v6444_v26 = vld [vmem:[%s10292_s4 + $0x5e4] sm:$0xf]  ;;  %v4715_v31 = vld [vmem:[%s10292_s4 + $0x2d0] sm:$0xf0]  ;;  %v4494_v34 = vor.u32 %v6288_v21, %v4491_v22 }
  0x37   :  { %1345 = vmatpush.bf16.msrb.mxu3 %v4414_v38  ;;  %v6344_v28 = vld [vmem:[%s10292_s4 + $0x2c4] sm:$0xf]  ;;  %v4971_v37 = vld [vmem:[%s10292_s4 + $0x4d0] sm:$0xf0]  ;;  %v5118_v38 = vor.u32 %v6444_v26, %v5115_v27 }
  0x38   :  { %1357 = vmatpush.bf16.msra.mxu2 %v4558_v33  ;;  %1307 = vmatpush.bf16.msrb.mxu0 %v4906_v47  ;;  %v6376_v32 = vld [vmem:[%s10292_s4 + $0x3c4] sm:$0xf]  ;;  %v4843_v33 = vld [vmem:[%s10292_s4 + $0x3d0] sm:$0xf0]  ;;  %v4718_v39 = vor.u32 %v6344_v28, %v4715_v31 }
  0x39   :  { %1320 = vmatpush.bf16.msrb.mxu1 %v5034_v50  ;;  %v6408_v36 = vld [vmem:[%s10292_s4 + $0x4c4] sm:$0xf]  ;;  %v4846_v40 = vor.u32 %v6376_v32, %v4843_v33  ;;  %v5099_v42 = vld [vmem:[%s10292_s4 + $0x5d0] sm:$0xf0] }
  0x3a   :  { %v6440_v41 = vld [vmem:[%s10292_s4 + $0x5c4] sm:$0xf]  ;;  %v4974_v44 = vor.u32 %v6408_v36, %v4971_v37  ;;  %v4827_v48 = vld [vmem:[%s10292_s4 + $0x3b0] sm:$0xf0] }
  0x3b   :  { %1346 = vmatpush.bf16.msrb.mxu3 %v4398_v52  ;;  %v6340_v43 = vld [vmem:[%s10292_s4 + $0x2a4] sm:$0xf]  ;;  %v4955_v50 = vld [vmem:[%s10292_s4 + $0x4b0] sm:$0xf0]  ;;  %v5102_v52 = vor.u32 %v6440_v41, %v5099_v42 }
  0x3c   :  { %1358 = vmatpush.bf16.msra.mxu2 %v4542_v46  ;;  %1308 = vmatpush.bf16.msrb.mxu0 %v4890_v62  ;;  %v4699_v46 = vld [vmem:[%s10292_s4 + $0x2b0] sm:$0xf0]  ;;  %v6372_v47 = vld [vmem:[%s10292_s4 + $0x3a4] sm:$0xf] }
  0x3d   :  { %1321 = vmatpush.bf16.msrb.mxu1 %v5018_v2  ;;  %v6404_v49 = vld [vmem:[%s10292_s4 + $0x4a4] sm:$0xf]  ;;  %v4702_v53 = vor.u32 %v6340_v43, %v4699_v46  ;;  %v4830_v54 = vor.u32 %v6372_v47, %v4827_v48  ;;  %v5083_v58 = vld [vmem:[%s10292_s4 + $0x5b0] sm:$0xf0] }
  0x3e   :  { %v6436_v56 = vld [vmem:[%s10292_s4 + $0x5a4] sm:$0xf]  ;;  %v4958_v60 = vor.u32 %v6404_v49, %v4955_v50  ;;  %v4811_v63 = vld [vmem:[%s10292_s4 + $0x390] sm:$0xf0] }
  0x3f   :  { %1347 = vmatpush.bf16.msrb.mxu3 %v4382_v3  ;;  %v6336_v59 = vld [vmem:[%s10292_s4 + $0x284] sm:$0xf]  ;;  %v4939_v1 = vld [vmem:[%s10292_s4 + $0x490] sm:$0xf0]  ;;  %v5086_v2 = vor.u32 %v6436_v56, %v5083_v58  ;;  %v4481_v56 = vld [vmem:[%s10292_s4 + $0xe8] sm:$0xf] }
  0x40   :  { %1359 = vmatpush.bf16.msra.mxu2 %v4526_v61  ;;  %1309 = vmatpush.bf16.msrb.mxu0 %v4874_v15  ;;  %v4683_v61 = vld [vmem:[%s10292_s4 + $0x290] sm:$0xf0]  ;;  %v6368_v62 = vld [vmem:[%s10292_s4 + $0x384] sm:$0xf]  ;;  %v6287_v58 = vld [vmem:[%s10292_s4 + $0xf4] sm:$0xf0] }
  0x41   :  { %1322 = vmatpush.bf16.msrb.mxu1 %v5002_v19  ;;  %v6400_v0 = vld [vmem:[%s10292_s4 + $0x484] sm:$0xf]  ;;  %v4686_v3 = vor.u32 %v6336_v59, %v4683_v61  ;;  %v4814_v4 = vor.u32 %v6368_v62, %v4811_v63  ;;  %v5067_v6 = vld [vmem:[%s10292_s4 + $0x590] sm:$0xf0]  ;;  %v4609_v59 = vld [vmem:[%s10292_s4 + $0x1e8] sm:$0xf] }
  0x42   :  { %v6432_v5 = vld [vmem:[%s10292_s4 + $0x584] sm:$0xf]  ;;  %v4942_v9 = vor.u32 %v6400_v0, %v4939_v1  ;;  %v4667_v10 = vld [vmem:[%s10292_s4 + $0x270] sm:$0xf0]  ;;  %v6319_v61 = vld [vmem:[%s10292_s4 + $0x1f4] sm:$0xf0] }
  0x43   :  { %1348 = vmatpush.bf16.msrb.mxu3 %v4366_v20  ;;  %1310 = vmatmul.bf16.vlgmr.msrb.gmra.mxu0 %v7331_v30  ;;  %v6332_v8 = vld [vmem:[%s10292_s4 + $0x264] sm:$0xf]  ;;  %v4795_v12 = vld [vmem:[%s10292_s4 + $0x370] sm:$0xf0]  ;;  %v5070_v15 = vor.u32 %v6432_v5, %v5067_v6  ;;  %v4482_v6 = vor.u32 %v6287_v58, %v4481_v56 }
  0x44   :  { %1360 = vmatpush.bf16.msra.mxu2 %v4510_v14  ;;  %1367 = vmatpush.bf16.msra.mxu0 %v4734_v24  ;;  %v6364_v11 = vld [vmem:[%s10292_s4 + $0x364] sm:$0xf]  ;;  %v4923_v14 = vld [vmem:[%s10292_s4 + $0x470] sm:$0xf0]  ;;  %v4670_v16 = vor.u32 %v6332_v8, %v4667_v10  ;;  %v6351_v8 = vld [vmem:[%s10292_s4 + $0x2f4] sm:$0xf0] }
  0x45   :  { %1380 = vmatpush.bf16.msra.mxu1 %v4862_v25  ;;  %v6396_v13 = vld [vmem:[%s10292_s4 + $0x464] sm:$0xf]  ;;  %v4798_v17 = vor.u32 %v6364_v11, %v4795_v12  ;;  %v5051_v19 = vld [vmem:[%s10292_s4 + $0x570] sm:$0xf0]  ;;  %v6383_v10 = vld [vmem:[%s10292_s4 + $0x3f4] sm:$0xf0]  ;;  %v4610_v11 = vor.u32 %v6319_v61, %v4609_v59 }
  0x46   :  { %1323 = vmatmul.bf16.vlgmr.msrb.gmra.mxu1 %v7342_v35  ;;  %1349 = vmatmul.bf16.vlgmr.msrb.gmra.mxu3 %v7128_v55  ;;  %v6428_v18 = vld [vmem:[%s10292_s4 + $0x564] sm:$0xf]  ;;  %v4926_v21 = vor.u32 %v6396_v13, %v4923_v14  ;;  %v4651_v22 = vld [vmem:[%s10292_s4 + $0x250] sm:$0xf0]  ;;  %v4465_v13 = vld [vmem:[%s10292_s4 + $0xc8] sm:$0xf] }
  0x47   :  { %1393 = vmatpush.bf16.msra.mxu3 %v4990_v29  ;;  %v6328_v20 = vld [vmem:[%s10292_s4 + $0x244] sm:$0xf]  ;;  %v4779_v24 = vld [vmem:[%s10292_s4 + $0x350] sm:$0xf0]  ;;  %v5054_v27 = vor.u32 %v6428_v18, %v5051_v19  ;;  %v6283_v14 = vld [vmem:[%s10292_s4 + $0xd4] sm:$0xf0] }
  0x48   :  { %1361 = vmatpush.bf16.msra.mxu2 %v4494_v34  ;;  %1368 = vmatpush.bf16.msra.mxu0 %v4718_v39  ;;  %v6360_v23 = vld [vmem:[%s10292_s4 + $0x344] sm:$0xf]  ;;  %v4907_v26 = vld [vmem:[%s10292_s4 + $0x450] sm:$0xf0]  ;;  %v4654_v28 = vor.u32 %v6328_v20, %v4651_v22  ;;  %v4721_v20 = vld [vmem:[%s10292_s4 + $0x2c8] sm:$0xf] }
  0x49   :  { %1381 = vmatpush.bf16.msra.mxu1 %v4846_v40  ;;  %v6392_v25 = vld [vmem:[%s10292_s4 + $0x444] sm:$0xf]  ;;  %v4782_v29 = vor.u32 %v6360_v23, %v4779_v24  ;;  %v5035_v32 = vld [vmem:[%s10292_s4 + $0x550] sm:$0xf0]  ;;  %v6347_v22 = vld [vmem:[%s10292_s4 + $0x2d4] sm:$0xf0] }
  0x4a   :  { %v6424_v31 = vld [vmem:[%s10292_s4 + $0x544] sm:$0xf]  ;;  %v4910_v34 = vor.u32 %v6392_v25, %v4907_v26  ;;  %v4635_v36 = vld [vmem:[%s10292_s4 + $0x230] sm:$0xf0]  ;;  %v4849_v23 = vld [vmem:[%s10292_s4 + $0x3c8] sm:$0xf] }
  0x4b   :  { %1394 = vmatpush.bf16.msra.mxu3 %v4974_v44  ;;  %1362 = vmatmul.bf16.vlgmr.msra.gmra.mxu2 %v7161_v7  ;;  %v6324_v33 = vld [vmem:[%s10292_s4 + $0x224] sm:$0xf]  ;;  %v4891_v40 = vld [vmem:[%s10292_s4 + $0x430] sm:$0xf0]  ;;  %v5038_v41 = vor.u32 %v6424_v31, %v5035_v32  ;;  %v6379_v24 = vld [vmem:[%s10292_s4 + $0x3d4] sm:$0xf0] }
  0x4c   :  { %1406 = vmatpush.bf16.msrb.mxu2 %v5118_v38  ;;  %1369 = vmatpush.bf16.msra.mxu0 %v4702_v53  ;;  %v6356_v37 = vld [vmem:[%s10292_s4 + $0x324] sm:$0xf]  ;;  %v4763_v38 = vld [vmem:[%s10292_s4 + $0x330] sm:$0xf0]  ;;  %v4638_v44 = vor.u32 %v6324_v33, %v4635_v36  ;;  %v4449_v26 = vld [vmem:[%s10292_s4 + $0xa8] sm:$0xf] }
  0x4d   :  { %1382 = vmatpush.bf16.msra.mxu1 %v4830_v54  ;;  %v6388_v39 = vld [vmem:[%s10292_s4 + $0x424] sm:$0xf]  ;;  %v5019_v43 = vld [vmem:[%s10292_s4 + $0x530] sm:$0xf0]  ;;  %v4766_v46 = vor.u32 %v6356_v37, %v4763_v38 }
  0x4e   :  { %v6420_v42 = vld [vmem:[%s10292_s4 + $0x524] sm:$0xf]  ;;  %v4619_v48 = vld [vmem:[%s10292_s4 + $0x210] sm:$0xf0]  ;;  %v4894_v50 = vor.u32 %v6388_v39, %v4891_v40 }
  0x4f   :  { %1395 = vmatpush.bf16.msra.mxu3 %v4958_v60  ;;  %v6320_v47 = vld [vmem:[%s10292_s4 + $0x204] sm:$0xf]  ;;  %v4875_v54 = vld [vmem:[%s10292_s4 + $0x410] sm:$0xf0]  ;;  %v5022_v60 = vor.u32 %v6420_v42, %v5019_v43 }
  0x50   :  { %1407 = vmatpush.bf16.msrb.mxu2 %v5102_v52  ;;  %1370 = vmatpush.bf16.msra.mxu0 %v4686_v3  ;;  %v6352_v49 = vld [vmem:[%s10292_s4 + $0x304] sm:$0xf]  ;;  %v4747_v52 = vld [vmem:[%s10292_s4 + $0x310] sm:$0xf0]  ;;  %v4622_v0 = vor.u32 %v6320_v47, %v4619_v48 }
  0x51   :  { %1383 = vmatpush.bf16.msra.mxu1 %v4814_v4  ;;  %v6384_v53 = vld [vmem:[%s10292_s4 + $0x404] sm:$0xf]  ;;  %v5131_v63 = vld [vmem:[%s10292_s4 + $0x610] sm:$0xf0]  ;;  %v4750_v1 = vor.u32 %v6352_v49, %v4747_v52  ;;  %v4737_v4 = vld [vmem:[%s10292_s4 + $0x2e8] sm:$0xf] }
  0x52   :  { %v6448_v62 = vld [vmem:[%s10292_s4 + $0x604] sm:$0xf]  ;;  %v5003_v3 = vld [vmem:[%s10292_s4 + $0x510] sm:$0xf0]  ;;  %v4878_v5 = vor.u32 %v6384_v53, %v4875_v54  ;;  %v4738_v18 = vor.u32 %v6351_v8, %v4737_v4 }
  0x53   :  { %1396 = vmatpush.bf16.msra.mxu3 %v4942_v9  ;;  %v4865_v9 = vld [vmem:[%s10292_s4 + $0x3e8] sm:$0xf]  ;;  %v5134_v12 = vor.u32 %v6448_v62, %v5131_v63 }
  0x54   :  { %1408 = vmatpush.bf16.msrb.mxu2 %v5086_v2  ;;  %1371 = vmatpush.bf16.msra.mxu0 %v4670_v16  ;;  %v6416_v2 = vld [vmem:[%s10292_s4 + $0x504] sm:$0xf]  ;;  %v4593_v16 = vld [vmem:[%s10292_s4 + $0x1c8] sm:$0xf]  ;;  %v4866_v19 = vor.u32 %v6383_v10, %v4865_v9 }
  0x55   :  { %1384 = vmatpush.bf16.msra.mxu1 %v4798_v17  ;;  %v6315_v17 = vld [vmem:[%s10292_s4 + $0x1d4] sm:$0xf0] }
  0x56   :  { %v4594_v25 = vor.u32 %v6315_v17, %v4593_v16 }
  0x57   :  { %1397 = vmatpush.bf16.msra.mxu3 %v4926_v21  ;;  %v4466_v21 = vor.u32 %v6283_v14, %v4465_v13 }
  0x58   :  { %1409 = vmatpush.bf16.msrb.mxu2 %v5070_v15  ;;  %1372 = vmatpush.bf16.msra.mxu0 %v4654_v28  ;;  %v5006_v15 = vor.u32 %v6416_v2, %v5003_v3 }
  0x59   :  { %1385 = vmatpush.bf16.msra.mxu1 %v4782_v29 }
  0x5b   :  { %1398 = vmatpush.bf16.msra.mxu3 %v4910_v34 }
  0x5c   :  { %1410 = vmatpush.bf16.msrb.mxu2 %v5054_v27  ;;  %1373 = vmatpush.bf16.msra.mxu0 %v4638_v44  ;;  %v6279_v27 = vld [vmem:[%s10292_s4 + $0xb4] sm:$0xf0] }
  0x5d   :  { %1386 = vmatpush.bf16.msra.mxu1 %v4766_v46 }
  0x5f   :  { %1399 = vmatpush.bf16.msra.mxu3 %v4894_v50 }
  0x60   :  { %1411 = vmatpush.bf16.msrb.mxu2 %v5038_v41  ;;  %1374 = vmatpush.bf16.msra.mxu0 %v4622_v0 }
  0x61   :  { %1387 = vmatpush.bf16.msra.mxu1 %v4750_v1 }
  0x63   :  { %1400 = vmatpush.bf16.msra.mxu3 %v4878_v5 }
  0x64   :  { %1412 = vmatpush.bf16.msrb.mxu2 %v5022_v60  ;;  %1426 = vmatpush.bf16.msrb.mxu0 %v5134_v12 }
  0x65   :  { %1432 = vmatpush.bf16.msrb.mxu1 %v4482_v6 }
  0x67   :  { %1445 = vmatpush.bf16.msrb.mxu3 %v4610_v11 }
  0x68   :  { %20 = vsyncpa [#allocation4], 0  ;;  %1375 = vmatmul.bf16.vlgmr.msra.gmra.mxu0 %v7117_v51  ;;  %1413 = vmatpush.bf16.msrb.mxu2 %v5006_v15  ;;  %v4577_v28 = vld [vmem:[%s10292_s4 + $0x1a8] sm:$0xf]  ;;  %v6311_v29 = vld [vmem:[%s10292_s4 + $0x1b4] sm:$0xf0]  ;;  %v4722_v31 = vor.u32 %v6347_v22, %v4721_v20  ;;  %v4850_v32 = vor.u32 %v6379_v24, %v4849_v23  ;;  %v4450_v34 = vor.u32 %v6279_v27, %v4449_v26 }
  0x69   :  { %1458 = vmatpush.bf16.msra.mxu0 %v4738_v18  ;;  %v4705_v33 = vld [vmem:[%s10292_s4 + $0x2a8] sm:$0xf]  ;;  %1433 = vmatpush.bf16.msrb.mxu1 %v4466_v21  ;;  %v6343_v36 = vld [vmem:[%s10292_s4 + $0x2b4] sm:$0xf0]  ;;  %v4578_v39 = vor.u32 %v6311_v29, %v4577_v28  ;;  %vm2085_vm4 = vcmask 588800   ;;  %vm2661_vm6 = vcmask 1043456  }
  0x6a   :  { %1401 = vmatmul.bf16.vlgmr.msra.gmra.mxu3 %v7331_v30  ;;  %v4833_v37 = vld [vmem:[%s10292_s4 + $0x3a8] sm:$0xf]  ;;  %v6375_v38 = vld [vmem:[%s10292_s4 + $0x3b4] sm:$0xf0]  ;;  %1388 = vmatmul.bf16.vlgmr.msra.gmra.mxu1 %v7130_v57  ;;  %v4706_v44 = vor.u32 %v6343_v36, %v4705_v33 }
  0x6b   :  { %1446 = vmatpush.bf16.msrb.mxu3 %v4594_v25  ;;  %1414 = vmatmul.bf16.vlgmr.msrb.gmra.mxu2 %v7342_v35  ;;  %v4433_v40 = vld [vmem:[%s10292_s4 + $0x88] sm:$0xf]  ;;  %v6275_v41 = vld [vmem:[%s10292_s4 + $0x94] sm:$0xf0]  ;;  %v4834_v46 = vor.u32 %v6375_v38, %v4833_v37 }
  0x6c   :  { %1471 = vmatpush.bf16.msra.mxu2 %v4866_v19  ;;  %v4561_v42 = vld [vmem:[%s10292_s4 + $0x188] sm:$0xf]  ;;  %v6307_v43 = vld [vmem:[%s10292_s4 + $0x194] sm:$0xf0]  ;;  %v4434_v48 = vor.u32 %v6275_v41, %v4433_v40 }
  0x6d   :  { %1459 = vmatpush.bf16.msra.mxu0 %v4722_v31  ;;  %v4689_v47 = vld [vmem:[%s10292_s4 + $0x288] sm:$0xf]  ;;  %1434 = vmatpush.bf16.msrb.mxu1 %v4450_v34  ;;  %v6339_v49 = vld [vmem:[%s10292_s4 + $0x294] sm:$0xf0]  ;;  %v4562_v53 = vor.u32 %v6307_v43, %v4561_v42 }
  0x6e   :  { %v4817_v50 = vld [vmem:[%s10292_s4 + $0x388] sm:$0xf]  ;;  %v6371_v52 = vld [vmem:[%s10292_s4 + $0x394] sm:$0xf0]  ;;  %v4690_v60 = vor.u32 %v6339_v49, %v4689_v47  ;;  %v6285_v47 = vld [vmem:[%s10292_s4 + $0xec] sm:$0xf] }
  0x6f   :  { %1447 = vmatpush.bf16.msrb.mxu3 %v4578_v39  ;;  %v4417_v54 = vld [vmem:[%s10292_s4 + $0x68] sm:$0xf]  ;;  %v6271_v56 = vld [vmem:[%s10292_s4 + $0x74] sm:$0xf0]  ;;  %v4818_v61 = vor.u32 %v6371_v52, %v4817_v50  ;;  %v4483_v50 = vld [vmem:[%s10292_s4 + $0xf8] sm:$0xf0] }
  0x70   :  { %1472 = vmatpush.bf16.msra.mxu2 %v4850_v32  ;;  %v4545_v58 = vld [vmem:[%s10292_s4 + $0x168] sm:$0xf]  ;;  %v6303_v59 = vld [vmem:[%s10292_s4 + $0x174] sm:$0xf0]  ;;  %v4418_v63 = vor.u32 %v6271_v56, %v4417_v54 }
  0x71   :  { %1460 = vmatpush.bf16.msra.mxu0 %v4706_v44  ;;  %v4673_v62 = vld [vmem:[%s10292_s4 + $0x268] sm:$0xf]  ;;  %1435 = vmatpush.bf16.msrb.mxu1 %v4434_v48  ;;  %v6335_v0 = vld [vmem:[%s10292_s4 + $0x274] sm:$0xf0]  ;;  %v4546_v3 = vor.u32 %v6303_v59, %v4545_v58 }
  0x72   :  { %v4801_v1 = vld [vmem:[%s10292_s4 + $0x368] sm:$0xf]  ;;  %v6367_v2 = vld [vmem:[%s10292_s4 + $0x374] sm:$0xf0]  ;;  %v4674_v9 = vor.u32 %v6335_v0, %v4673_v62 }
  0x73   :  { %1448 = vmatpush.bf16.msrb.mxu3 %v4562_v53  ;;  %v4401_v4 = vld [vmem:[%s10292_s4 + $0x48] sm:$0xf]  ;;  %v6267_v5 = vld [vmem:[%s10292_s4 + $0x54] sm:$0xf0]  ;;  %v4802_v10 = vor.u32 %v6367_v2, %v4801_v1  ;;  %v6317_v1 = vld [vmem:[%s10292_s4 + $0x1ec] sm:$0xf] }
  0x74   :  { %1473 = vmatpush.bf16.msra.mxu2 %v4834_v46  ;;  %v4529_v6 = vld [vmem:[%s10292_s4 + $0x148] sm:$0xf]  ;;  %v6299_v8 = vld [vmem:[%s10292_s4 + $0x154] sm:$0xf0]  ;;  %v4402_v12 = vor.u32 %v6267_v5, %v4401_v4  ;;  %v4611_v2 = vld [vmem:[%s10292_s4 + $0x1f8] sm:$0xf0] }
  0x75   :  { %1461 = vmatpush.bf16.msra.mxu0 %v4690_v60  ;;  %v4657_v11 = vld [vmem:[%s10292_s4 + $0x248] sm:$0xf]  ;;  %1436 = vmatpush.bf16.msrb.mxu1 %v4418_v63  ;;  %v6331_v13 = vld [vmem:[%s10292_s4 + $0x254] sm:$0xf0]  ;;  %v4530_v16 = vor.u32 %v6299_v8, %v4529_v6  ;;  %v4486_v63 = vor.u32 %v6285_v47, %v4483_v50  ;;  %v6281_v4 = vld [vmem:[%s10292_s4 + $0xcc] sm:$0xf] }
  0x76   :  { %v4785_v14 = vld [vmem:[%s10292_s4 + $0x348] sm:$0xf]  ;;  %v6363_v15 = vld [vmem:[%s10292_s4 + $0x354] sm:$0xf0]  ;;  %v4658_v21 = vor.u32 %v6331_v13, %v4657_v11  ;;  %v4467_v5 = vld [vmem:[%s10292_s4 + $0xd8] sm:$0xf0] }
  0x77   :  { %1449 = vmatpush.bf16.msrb.mxu3 %v4546_v3  ;;  %v4385_v17 = vld [vmem:[%s10292_s4 + $0x28] sm:$0xf]  ;;  %v6263_v18 = vld [vmem:[%s10292_s4 + $0x34] sm:$0xf0]  ;;  %v4786_v22 = vor.u32 %v6363_v15, %v4785_v14  ;;  %v4470_v13 = vor.u32 %v6281_v4, %v4467_v5  ;;  %v6313_v14 = vld [vmem:[%s10292_s4 + $0x1cc] sm:$0xf] }
  0x78   :  { %1474 = vmatpush.bf16.msra.mxu2 %v4818_v61  ;;  %5144 = vmatmul.msk.bf16.vlgmr.msrb.gmra.mxu0 %vm1246_vm0, %v7240_v45  ;;  %v4513_v19 = vld [vmem:[%s10292_s4 + $0x128] sm:$0xf]  ;;  %v6295_v20 = vld [vmem:[%s10292_s4 + $0x134] sm:$0xf0]  ;;  %v4386_v25 = vor.u32 %v6263_v18, %v4385_v17  ;;  %v4595_v15 = vld [vmem:[%s10292_s4 + $0x1d8] sm:$0xf0] }
  0x79   :  { %1462 = vmatpush.bf16.msra.mxu0 %v4674_v9  ;;  %v4641_v23 = vld [vmem:[%s10292_s4 + $0x228] sm:$0xf]  ;;  %v6327_v24 = vld [vmem:[%s10292_s4 + $0x234] sm:$0xf0]  ;;  %1437 = vmatpush.bf16.msrb.mxu1 %v4402_v12  ;;  %v4514_v29 = vor.u32 %v6295_v20, %v4513_v19  ;;  %v6277_v17 = vld [vmem:[%s10292_s4 + $0xac] sm:$0xf] }
  0x7a   :  { %v4769_v26 = vld [vmem:[%s10292_s4 + $0x328] sm:$0xf]  ;;  %v6359_v27 = vld [vmem:[%s10292_s4 + $0x334] sm:$0xf0]  ;;  %v4642_v38 = vor.u32 %v6327_v24, %v4641_v23  ;;  %v4451_v18 = vld [vmem:[%s10292_s4 + $0xb8] sm:$0xf0] }
  0x7b   :  { %v4369_v28 = vld [vmem:[%s10292_s4 + $0x8] sm:$0xf]  ;;  %1450 = vmatpush.bf16.msrb.mxu3 %v4530_v16  ;;  %v6259_v31 = vld [vmem:[%s10292_s4 + $0x14] sm:$0xf0]  ;;  %v4770_v39 = vor.u32 %v6359_v27, %v4769_v26  ;;  %v6309_v26 = vld [vmem:[%s10292_s4 + $0x1ac] sm:$0xf] }
  0x7c   :  { %1475 = vmatpush.bf16.msra.mxu2 %v4802_v10  ;;  %v4497_v32 = vld [vmem:[%s10292_s4 + $0x108] sm:$0xf]  ;;  %v6291_v33 = vld [vmem:[%s10292_s4 + $0x114] sm:$0xf0]  ;;  %v4370_v43 = vor.u32 %v6259_v31, %v4369_v28  ;;  %v4614_v10 = vor.u32 %v6317_v1, %v4611_v2  ;;  %v4579_v27 = vld [vmem:[%s10292_s4 + $0x1b8] sm:$0xf0] }
  0x7d   :  { %v4993_v34 = vld [vmem:[%s10292_s4 + $0x4e8] sm:$0xf]  ;;  %v6415_v36 = vld [vmem:[%s10292_s4 + $0x4f4] sm:$0xf0]  ;;  %1463 = vmatpush.bf16.msra.mxu0 %v4658_v21  ;;  %1438 = vmatpush.bf16.msrb.mxu1 %v4386_v25  ;;  %v4498_v48 = vor.u32 %v6291_v33, %v4497_v32  ;;  %v4454_v25 = vor.u32 %v6277_v17, %v4451_v18  ;;  %v4435_v31 = vld [vmem:[%s10292_s4 + $0x98] sm:$0xf0] }
  0x7e   :  { %v5121_v37 = vld [vmem:[%s10292_s4 + $0x5e8] sm:$0xf]  ;;  %v6447_v40 = vld [vmem:[%s10292_s4 + $0x5f4] sm:$0xf0]  ;;  %v4994_v49 = vor.u32 %v6415_v36, %v4993_v34  ;;  %v4582_v36 = vor.u32 %v6309_v26, %v4579_v27  ;;  %v6297_v4 = vld [vmem:[%s10292_s4 + $0x14c] sm:$0xf] }
  0x7f   :  { %v4625_v41 = vld [vmem:[%s10292_s4 + $0x208] sm:$0xf]  ;;  %v6323_v42 = vld [vmem:[%s10292_s4 + $0x214] sm:$0xf0]  ;;  %1451 = vmatpush.bf16.msrb.mxu3 %v4514_v29  ;;  %v5122_v54 = vor.u32 %v6447_v40, %v5121_v37  ;;  %v6273_v29 = vld [vmem:[%s10292_s4 + $0x8c] sm:$0xf] }
  0x80   :  { %1476 = vmatpush.bf16.msra.mxu2 %v4786_v22  ;;  %v4753_v44 = vld [vmem:[%s10292_s4 + $0x308] sm:$0xf]  ;;  %v6355_v46 = vld [vmem:[%s10292_s4 + $0x314] sm:$0xf0]  ;;  %v4626_v59 = vor.u32 %v6323_v42, %v4625_v41  ;;  %v4598_v22 = vor.u32 %v6313_v14, %v4595_v15  ;;  %v6305_v40 = vld [vmem:[%s10292_s4 + $0x18c] sm:$0xf] }
  0x81   :  { %v5137_v52 = vld [vmem:[%s10292_s4 + $0x608] sm:$0xf]  ;;  %v6451_v53 = vld [vmem:[%s10292_s4 + $0x614] sm:$0xf0]  ;;  %1464 = vmatpush.bf16.msra.mxu0 %v4642_v38  ;;  %v4754_v60 = vor.u32 %v6355_v46, %v4753_v44  ;;  %1439 = vmatpush.bf16.msrb.mxu1 %v4370_v43  ;;  %v4563_v41 = vld [vmem:[%s10292_s4 + $0x198] sm:$0xf0] }
  0x82   :  { %v4977_v56 = vld [vmem:[%s10292_s4 + $0x4c8] sm:$0xf]  ;;  %v6411_v58 = vld [vmem:[%s10292_s4 + $0x4d4] sm:$0xf0]  ;;  %v5138_v0 = vor.u32 %v6451_v53, %v5137_v52  ;;  %v6269_v43 = vld [vmem:[%s10292_s4 + $0x6c] sm:$0xf] }
  0x83   :  { %v5105_v61 = vld [vmem:[%s10292_s4 + $0x5c8] sm:$0xf]  ;;  %v6443_v62 = vld [vmem:[%s10292_s4 + $0x5d4] sm:$0xf0]  ;;  %1452 = vmatpush.bf16.msrb.mxu3 %v4498_v48  ;;  %v4978_v3 = vor.u32 %v6411_v58, %v4977_v56  ;;  %v4419_v44 = vld [vmem:[%s10292_s4 + $0x78] sm:$0xf0] }
  0x84   :  { %1477 = vmatpush.bf16.msra.mxu2 %v4770_v39  ;;  %v5106_v6 = vor.u32 %v6443_v62, %v5105_v61  ;;  %v4961_v8 = vld [vmem:[%s10292_s4 + $0x4a8] sm:$0xf]  ;;  %v6407_v9 = vld [vmem:[%s10292_s4 + $0x4b4] sm:$0xf0]  ;;  %1440 = vmatmul.bf16.vlgmr.msrb.gmra.mxu1 %v7128_v55  ;;  %v4438_v39 = vor.u32 %v6273_v29, %v4435_v31  ;;  %v4422_v53 = vor.u32 %v6269_v43, %v4419_v44  ;;  %v4547_v56 = vld [vmem:[%s10292_s4 + $0x178] sm:$0xf0] }
  0x85   :  { %1484 = vmatpush.bf16.msra.mxu1 %v4994_v49  ;;  %1465 = vmatpush.bf16.msra.mxu0 %v4626_v59  ;;  %v5089_v11 = vld [vmem:[%s10292_s4 + $0x5a8] sm:$0xf]  ;;  %v6439_v12 = vld [vmem:[%s10292_s4 + $0x5b4] sm:$0xf0]  ;;  %v4962_v16 = vor.u32 %v6407_v9, %v4961_v8  ;;  %v4566_v49 = vor.u32 %v6305_v40, %v4563_v41  ;;  %v6265_v59 = vld [vmem:[%s10292_s4 + $0x4c] sm:$0xf] }
  0x86   :  { %1453 = vmatmul.bf16.vlgmr.msrb.gmra.mxu3 %v7161_v7  ;;  %v5090_v19 = vor.u32 %v6439_v12, %v5089_v11  ;;  %v4945_v20 = vld [vmem:[%s10292_s4 + $0x488] sm:$0xf]  ;;  %v6403_v21 = vld [vmem:[%s10292_s4 + $0x494] sm:$0xf0]  ;;  %v4531_v5 = vld [vmem:[%s10292_s4 + $0x158] sm:$0xf0] }
  0x87   :  { %1497 = vmatpush.bf16.msra.mxu3 %v5122_v54  ;;  %v5073_v23 = vld [vmem:[%s10292_s4 + $0x588] sm:$0xf]  ;;  %v6435_v24 = vld [vmem:[%s10292_s4 + $0x594] sm:$0xf0]  ;;  %v4946_v28 = vor.u32 %v6403_v21, %v4945_v20  ;;  %v6301_v54 = vld [vmem:[%s10292_s4 + $0x16c] sm:$0xf]  ;;  %v4534_v15 = vor.u32 %v6297_v4, %v4531_v5 }
  0x88   :  { %1478 = vmatpush.bf16.msra.mxu2 %v4754_v60  ;;  %1466 = vmatmul.bf16.vlgmr.msra.gmra.mxu0 %v7117_v51  ;;  %v5074_v32 = vor.u32 %v6435_v24, %v5073_v23  ;;  %v4929_v33 = vld [vmem:[%s10292_s4 + $0x468] sm:$0xf]  ;;  %v6399_v34 = vld [vmem:[%s10292_s4 + $0x474] sm:$0xf0]  ;;  %v4403_v60 = vld [vmem:[%s10292_s4 + $0x58] sm:$0xf0] }
  0x89   :  { %1517 = vmatpush.bf16.msrb.mxu0 %v5138_v0  ;;  %1485 = vmatpush.bf16.msra.mxu1 %v4978_v3  ;;  %v5057_v37 = vld [vmem:[%s10292_s4 + $0x568] sm:$0xf]  ;;  %v6431_v38 = vld [vmem:[%s10292_s4 + $0x574] sm:$0xf0]  ;;  %v4930_v42 = vor.u32 %v6399_v34, %v4929_v33  ;;  %v4550_v0 = vor.u32 %v6301_v54, %v4547_v56  ;;  %v4406_v3 = vor.u32 %v6265_v59, %v4403_v60  ;;  %v6261_v8 = vld [vmem:[%s10292_s4 + $0x2c] sm:$0xf] }
  0x8a   :  { %v5058_v46 = vor.u32 %v6431_v38, %v5057_v37  ;;  %v4913_v47 = vld [vmem:[%s10292_s4 + $0x448] sm:$0xf]  ;;  %v6395_v48 = vld [vmem:[%s10292_s4 + $0x454] sm:$0xf0]  ;;  %v4387_v9 = vld [vmem:[%s10292_s4 + $0x38] sm:$0xf0] }
  0x8b   :  { %1498 = vmatpush.bf16.msra.mxu3 %v5106_v6  ;;  %1479 = vmatmul.bf16.vlgmr.msra.gmra.mxu2 %v7130_v57  ;;  %v5041_v50 = vld [vmem:[%s10292_s4 + $0x548] sm:$0xf]  ;;  %v6427_v52 = vld [vmem:[%s10292_s4 + $0x554] sm:$0xf0]  ;;  %v4914_v58 = vor.u32 %v6395_v48, %v4913_v47  ;;  %v4739_v17 = vld [vmem:[%s10292_s4 + $0x2f8] sm:$0xf0] }
  0x8c   :  { %1523 = vmatpush.bf16.msrb.mxu2 %v4486_v63  ;;  %v5042_v61 = vor.u32 %v6427_v52, %v5041_v50  ;;  %v4897_v62 = vld [vmem:[%s10292_s4 + $0x428] sm:$0xf]  ;;  %v6391_v63 = vld [vmem:[%s10292_s4 + $0x434] sm:$0xf0]  ;;  %v6381_v18 = vld [vmem:[%s10292_s4 + $0x3ec] sm:$0xf] }
  0x8d   :  { %1536 = vmatpush.bf16.msra.mxu0 %v4614_v10  ;;  %1486 = vmatpush.bf16.msra.mxu1 %v4962_v16  ;;  %v5025_v1 = vld [vmem:[%s10292_s4 + $0x528] sm:$0xf]  ;;  %v6423_v2 = vld [vmem:[%s10292_s4 + $0x534] sm:$0xf0]  ;;  %v4898_v6 = vor.u32 %v6391_v63, %v4897_v62  ;;  %v6349_v16 = vld [vmem:[%s10292_s4 + $0x2ec] sm:$0xf] }
  0x8e   :  { %v4881_v10 = vld [vmem:[%s10292_s4 + $0x408] sm:$0xf]  ;;  %v5026_v11 = vor.u32 %v6423_v2, %v5025_v1  ;;  %v6387_v12 = vld [vmem:[%s10292_s4 + $0x414] sm:$0xf0]  ;;  %v4867_v20 = vld [vmem:[%s10292_s4 + $0x3f8] sm:$0xf0]  ;;  %v4742_v27 = vor.u32 %v6349_v16, %v4739_v17 }
  0x8f   :  { %1499 = vmatpush.bf16.msra.mxu3 %v5090_v19  ;;  %v6419_v14 = vld [vmem:[%s10292_s4 + $0x514] sm:$0xf0]  ;;  %v4390_v19 = vor.u32 %v6261_v8, %v4387_v9  ;;  %v6293_v21 = vld [vmem:[%s10292_s4 + $0x12c] sm:$0xf]  ;;  %v4882_v23 = vor.u32 %v6387_v12, %v4881_v10  ;;  %v4995_v29 = vld [vmem:[%s10292_s4 + $0x4f8] sm:$0xf0]  ;;  %v4870_v31 = vor.u32 %v6381_v18, %v4867_v20 }
  0x90   :  { %1524 = vmatpush.bf16.msrb.mxu2 %v4470_v13  ;;  %v5009_v13 = vld [vmem:[%s10292_s4 + $0x508] sm:$0xf]  ;;  %v6257_v24 = vld [vmem:[%s10292_s4 + $0xc] sm:$0xf]  ;;  %v4723_v34 = vld [vmem:[%s10292_s4 + $0x2d8] sm:$0xf0] }
  0x91   :  { %1537 = vmatpush.bf16.msra.mxu0 %v4598_v22  ;;  %1487 = vmatpush.bf16.msra.mxu1 %v4946_v28  ;;  %v4515_v22 = vld [vmem:[%s10292_s4 + $0x138] sm:$0xf0]  ;;  %v5010_v26 = vor.u32 %v6419_v14, %v5009_v13  ;;  %v6413_v28 = vld [vmem:[%s10292_s4 + $0x4ec] sm:$0xf] }
  0x92   :  { %v6345_v33 = vld [vmem:[%s10292_s4 + $0x2cc] sm:$0xf]  ;;  %v4851_v38 = vld [vmem:[%s10292_s4 + $0x3d8] sm:$0xf0]  ;;  %v4998_v41 = vor.u32 %v6413_v28, %v4995_v29 }
  0x93   :  { %1500 = vmatpush.bf16.msra.mxu3 %v5074_v32  ;;  %v4518_v32 = vor.u32 %v6293_v21, %v4515_v22  ;;  %v4499_v40 = vld [vmem:[%s10292_s4 + $0x118] sm:$0xf0]  ;;  %v4726_v44 = vor.u32 %v6345_v33, %v4723_v34  ;;  %v6341_v50 = vld [vmem:[%s10292_s4 + $0x2ac] sm:$0xf] }
  0x94   :  { %1525 = vmatpush.bf16.msrb.mxu2 %v4454_v25  ;;  %v4371_v25 = vld [vmem:[%s10292_s4 + $0x18] sm:$0xf0]  ;;  %v6373_v54 = vld [vmem:[%s10292_s4 + $0x3ac] sm:$0xf] }
  0x95   :  { %1538 = vmatpush.bf16.msra.mxu0 %v4582_v36  ;;  %1488 = vmatpush.bf16.msra.mxu1 %v4930_v42  ;;  %v6377_v36 = vld [vmem:[%s10292_s4 + $0x3cc] sm:$0xf]  ;;  %v4374_v37 = vor.u32 %v6257_v24, %v4371_v25  ;;  %v5123_v43 = vld [vmem:[%s10292_s4 + $0x5f8] sm:$0xf0] }
  0x96   :  { %v6445_v42 = vld [vmem:[%s10292_s4 + $0x5ec] sm:$0xf]  ;;  %v4979_v47 = vld [vmem:[%s10292_s4 + $0x4d8] sm:$0xf0]  ;;  %v4854_v48 = vor.u32 %v6377_v36, %v4851_v38 }
  0x97   :  { %1501 = vmatpush.bf16.msra.mxu3 %v5058_v46  ;;  %v6409_v46 = vld [vmem:[%s10292_s4 + $0x4cc] sm:$0xf]  ;;  %v4707_v52 = vld [vmem:[%s10292_s4 + $0x2b8] sm:$0xf0] }
  0x98   :  { %1526 = vmatpush.bf16.msrb.mxu2 %v4438_v39  ;;  %5145 = vmatmul.msk.bf16.vlgmr.msrb.gmra.mxu0 %vm1246_vm0, %v7240_v45  ;;  %v6289_v39 = vld [vmem:[%s10292_s4 + $0x10c] sm:$0xf]  ;;  %v4835_v56 = vld [vmem:[%s10292_s4 + $0x3b8] sm:$0xf0] }
  0x99   :  { %1539 = vmatpush.bf16.msra.mxu0 %v4566_v49  ;;  %1489 = vmatpush.bf16.msra.mxu1 %v4914_v58  ;;  %v4502_v49 = vor.u32 %v6289_v39, %v4499_v40  ;;  %v4982_v58 = vor.u32 %v6409_v46, %v4979_v47  ;;  %v6441_v59 = vld [vmem:[%s10292_s4 + $0x5cc] sm:$0xf]  ;;  %v5107_v60 = vld [vmem:[%s10292_s4 + $0x5d8] sm:$0xf0] }
  0x9a   :  { %v6405_v62 = vld [vmem:[%s10292_s4 + $0x4ac] sm:$0xf]  ;;  %v4963_v63 = vld [vmem:[%s10292_s4 + $0x4b8] sm:$0xf0] }
  0x9b   :  { %1502 = vmatpush.bf16.msra.mxu3 %v5042_v61  ;;  %v4710_v61 = vor.u32 %v6341_v50, %v4707_v52  ;;  %v6337_v1 = vld [vmem:[%s10292_s4 + $0x28c] sm:$0xf]  ;;  %v4691_v2 = vld [vmem:[%s10292_s4 + $0x298] sm:$0xf0] }
  0x9c   :  { %1527 = vmatpush.bf16.msrb.mxu2 %v4422_v53  ;;  %v5126_v53 = vor.u32 %v6445_v42, %v5123_v43  ;;  %v6369_v4 = vld [vmem:[%s10292_s4 + $0x38c] sm:$0xf]  ;;  %v4819_v5 = vld [vmem:[%s10292_s4 + $0x398] sm:$0xf0]  ;;  %v4694_v10 = vor.u32 %v6337_v1, %v4691_v2  ;;  %v5205_v1 = vld [vmem:[%s10294_s6 + $0x70] sm:$0xf] }
  0x9d   :  { %1540 = vmatpush.bf16.msra.mxu0 %v4550_v0  ;;  %1490 = vmatpush.bf16.msra.mxu1 %v4898_v6  ;;  %v4838_v0 = vor.u32 %v6373_v54, %v4835_v56  ;;  %v4966_v6 = vor.u32 %v6405_v62, %v4963_v63  ;;  %v6437_v8 = vld [vmem:[%s10292_s4 + $0x5ac] sm:$0xf]  ;;  %v5091_v9 = vld [vmem:[%s10292_s4 + $0x5b8] sm:$0xf0]  ;;  %v4822_v12 = vor.u32 %v6369_v4, %v4819_v5 }
  0x9e   :  { %v6333_v13 = vld [vmem:[%s10292_s4 + $0x26c] sm:$0xf]  ;;  %v4675_v14 = vld [vmem:[%s10292_s4 + $0x278] sm:$0xf0] }
  0x9f   :  { %1503 = vmatpush.bf16.msra.mxu3 %v5026_v11  ;;  %v6401_v11 = vld [vmem:[%s10292_s4 + $0x48c] sm:$0xf]  ;;  %v5075_v20 = vld [vmem:[%s10292_s4 + $0x598] sm:$0xf0]  ;;  %v4678_v21 = vor.u32 %v6333_v13, %v4675_v14 }
  0xa0   :  { %1528 = vmatpush.bf16.msrb.mxu2 %v4406_v3  ;;  %v5110_v3 = vor.u32 %v6441_v59, %v5107_v60  ;;  %v6365_v16 = vld [vmem:[%s10292_s4 + $0x36c] sm:$0xf]  ;;  %v5059_v34 = vld [vmem:[%s10292_s4 + $0x578] sm:$0xf0] }
  0xa1   :  { %1541 = vmatpush.bf16.msra.mxu0 %v4534_v15  ;;  %1491 = vmatpush.bf16.msra.mxu1 %v4882_v23  ;;  %v5094_v15 = vor.u32 %v6437_v8, %v5091_v9  ;;  %v6397_v22 = vld [vmem:[%s10292_s4 + $0x46c] sm:$0xf]  ;;  %v4931_v23 = vld [vmem:[%s10292_s4 + $0x478] sm:$0xf0]  ;;  %v8038_v28 = vpop.f32.mrf.mxu1 }
  0xa2   :  { %v6329_v25 = vld [vmem:[%s10292_s4 + $0x24c] sm:$0xf]  ;;  %v4915_v39 = vld [vmem:[%s10292_s4 + $0x458] sm:$0xf0] }
  0xa3   :  { %1504 = vmatpush.bf16.msra.mxu3 %v5010_v26  ;;  %v4659_v26 = vld [vmem:[%s10292_s4 + $0x258] sm:$0xf0]  ;;  %v6361_v29 = vld [vmem:[%s10292_s4 + $0x34c] sm:$0xf] }
  0xa4   :  { %1529 = vmatpush.bf16.msrb.mxu2 %v4390_v19  ;;  %1492 = vmatmul.bf16.vlgmr.msra.gmra.mxu1 %v7331_v30  ;;  %v8018_v17 = vpop.f32.mrf.mxu0  ;;  %v6433_v19 = vld [vmem:[%s10292_s4 + $0x58c] sm:$0xf]  ;;  %v4643_v43 = vld [vmem:[%s10292_s4 + $0x238] sm:$0xf0] }
  0xa5   :  { %1549 = vmatpush.bf16.msrb.mxu1 %v4742_v27  ;;  %1542 = vmatpush.bf16.msra.mxu0 %v4518_v32  ;;  %v5078_v27 = vor.u32 %v6433_v19, %v5075_v20  ;;  %v4934_v32 = vor.u32 %v6397_v22, %v4931_v23  ;;  %v6429_v33 = vld [vmem:[%s10292_s4 + $0x56c] sm:$0xf]  ;;  %v4771_v47 = vld [vmem:[%s10292_s4 + $0x338] sm:$0xf0]  ;;  %v5197_v19 = vld [vmem:[%s10294_s6 + $0x60] sm:$0xf] }
  0xa6   :  { %1505 = vmatmul.bf16.vlgmr.msra.gmra.mxu3 %v7342_v35  ;;  %v6393_v38 = vld [vmem:[%s10292_s4 + $0x44c] sm:$0xf]  ;;  %v5043_v52 = vld [vmem:[%s10292_s4 + $0x558] sm:$0xf0]  ;;  %v5269_v22 = vld [vmem:[%s10294_s6 + $0xf0] sm:$0xf] }
  0xa7   :  { %1562 = vmatpush.bf16.msrb.mxu3 %v4870_v31  ;;  %v4787_v31 = vld [vmem:[%s10292_s4 + $0x358] sm:$0xf0]  ;;  %v6325_v42 = vld [vmem:[%s10292_s4 + $0x22c] sm:$0xf]  ;;  %v6483_v23 = vld [vmem:[%s10294_s6 + $0xf4] sm:$0xf0] }
  0xa8   :  { %1530 = vmatpush.bf16.msrb.mxu2 %v4374_v37  ;;  %v4662_v37 = vor.u32 %v6329_v25, %v4659_v26  ;;  %v4790_v40 = vor.u32 %v6361_v29, %v4787_v31  ;;  %v6357_v46 = vld [vmem:[%s10292_s4 + $0x32c] sm:$0xf]  ;;  %v4646_v54 = vor.u32 %v6325_v42, %v4643_v43  ;;  %v4755_v63 = vld [vmem:[%s10292_s4 + $0x318] sm:$0xf0]  ;;  %v5270_v26 = vor.u32 %v6483_v23, %v5269_v22  ;;  %v5189_v31 = vld [vmem:[%s10294_s6 + $0x50] sm:$0xf] }
  0xa9   :  { %1550 = vmatpush.bf16.msrb.mxu1 %v4726_v44  ;;  %1543 = vmatpush.bf16.msra.mxu0 %v4502_v49  ;;  %v8052_v36 = vpop.f32.mrf.mxu2  ;;  %v5062_v44 = vor.u32 %v6429_v33, %v5059_v34  ;;  %v4918_v49 = vor.u32 %v6393_v38, %v4915_v39  ;;  %v6425_v50 = vld [vmem:[%s10292_s4 + $0x54c] sm:$0xf]  ;;  %v4774_v60 = vor.u32 %v6357_v46, %v4771_v47  ;;  %v1274_v2 = vpop.f32.mrf.mxu1  ;;  %v5139_v4 = vld [vmem:[%s10292_s4 + $0x618] sm:$0xf0]  ;;  %v6463_v33 = vld [vmem:[%s10294_s6 + $0x54] sm:$0xf0] }
  0xaa   :  { %v6389_v56 = vld [vmem:[%s10292_s4 + $0x42c] sm:$0xf]  ;;  %v5027_v9 = vld [vmem:[%s10292_s4 + $0x538] sm:$0xf0]  ;;  %v6481_v34 = vld [vmem:[%s10294_s6 + $0xe4] sm:$0xf0]  ;;  %v5190_v39 = vor.u32 %v6463_v33, %v5189_v31 }
  0xab   :  { %1563 = vmatpush.bf16.msrb.mxu3 %v4854_v48  ;;  %1531 = vmatmul.bf16.vlgmr.msrb.gmra.mxu2 %v7128_v55  ;;  %v4947_v55 = vld [vmem:[%s10292_s4 + $0x498] sm:$0xf0]  ;;  %v6321_v59 = vld [vmem:[%s10292_s4 + $0x20c] sm:$0xf]  ;;  %v6461_v42 = vld [vmem:[%s10294_s6 + $0x44] sm:$0xf0] }
  0xac   :  { %1575 = vmatpush.bf16.msra.mxu2 %v4998_v41  ;;  %1544 = vmatmul.bf16.vlgmr.msra.gmra.mxu0 %v7161_v7  ;;  %v4803_v7 = vld [vmem:[%s10292_s4 + $0x378] sm:$0xf0]  ;;  %v4950_v18 = vor.u32 %v6401_v11, %v4947_v55  ;;  %v8060_v41 = vpop.f32.mrf.mxu3  ;;  %v1261_v48 = vpop.f32.mrf.mxu0  ;;  %v6353_v62 = vld [vmem:[%s10292_s4 + $0x30c] sm:$0xf]  ;;  %v5173_v46 = vld [vmem:[%s10294_s6 + $0x30] sm:$0xf] }
  0xad   :  { %1588 = vmatpush.bf16.msrb.mxu0 %v5126_v53  ;;  %1551 = vmatpush.bf16.msrb.mxu1 %v4710_v61  ;;  %v4806_v24 = vor.u32 %v6365_v16, %v4803_v7  ;;  %v8083_v53 = vld [vmem:[%s10293_s5] sm:$0xf]  ;;  %v4627_v61 = vld [vmem:[%s10292_s4 + $0x218] sm:$0xf0]  ;;  %v6421_v8 = vld [vmem:[%s10292_s4 + $0x52c] sm:$0xf]  ;;  %v4758_v14 = vor.u32 %v6353_v62, %v4755_v63 }
  0xae   :  { %v4630_v11 = vor.u32 %v6321_v59, %v4627_v61  ;;  %v6385_v55 = vld [vmem:[%s10292_s4 + $0x40c] sm:$0xf]  ;;  %v258_v13 = vperm.slane %v8083_v53, 0  ;;  %v5011_v25 = vld [vmem:[%s10292_s4 + $0x518] sm:$0xf0] }
  0xaf   :  { %1564 = vmatpush.bf16.msrb.mxu3 %v4838_v0  ;;  %v5046_v0 = vor.u32 %v6425_v50, %v5043_v52  ;;  %v6459_v48 = vld [vmem:[%s10294_s6 + $0x34] sm:$0xf0]  ;;  %v5237_v61 = vld [vmem:[%s10294_s6 + $0xb0] sm:$0xf]  ;;  %v5213_v22 = vld [vmem:[%s10294_s6 + $0x80] sm:$0xf] }
  0xb0   :  { %1576 = vmatpush.bf16.msra.mxu2 %v4982_v58  ;;  %v4899_v58 = vld [vmem:[%s10292_s4 + $0x438] sm:$0xf0]  ;;  %v6475_v62 = vld [vmem:[%s10294_s6 + $0xb4] sm:$0xf0]  ;;  %v6469_v23 = vld [vmem:[%s10294_s6 + $0x84] sm:$0xf0] }
  0xb1   :  { %1589 = vmatpush.bf16.msrb.mxu0 %v5110_v3  ;;  %1552 = vmatpush.bf16.msrb.mxu1 %v4694_v10  ;;  %v6449_v3 = vld [vmem:[%s10292_s4 + $0x60c] sm:$0xf]  ;;  %v4902_v5 = vor.u32 %v6389_v56, %v4899_v58  ;;  %v1287_v10 = vpop.f32.mrf.mxu2  ;;  %v5174_v56 = vor.u32 %v6459_v48, %v5173_v46  ;;  %v5165_v58 = vld [vmem:[%s10294_s6 + $0x20] sm:$0xf]  ;;  %v6455_v2 = vld [vmem:[%s10294_s6 + $0x14] sm:$0xf0] }
  0xb2   :  { %v6462_v33 = vld [vmem:[%s10294_s6 + $0x54] sm:$0xf]  ;;  %v5167_v46 = vld [vmem:[%s10294_s6 + $0x28] sm:$0xf0] }
  0xb3   :  { %1565 = vmatpush.bf16.msrb.mxu3 %v4822_v12  ;;  %v4883_v12 = vld [vmem:[%s10292_s4 + $0x418] sm:$0xf0] }
  0xb4   :  { %1577 = vmatpush.bf16.msra.mxu2 %v4966_v6  ;;  %v6467_v6 = vld [vmem:[%s10294_s6 + $0x74] sm:$0xf0]  ;;  %v1300_v16 = vpop.f32.mrf.mxu3  ;;  %v4886_v20 = vor.u32 %v6385_v55, %v4883_v12  ;;  %v6453_v12 = vld [vmem:[%s10294_s6 + $0x4] sm:$0xf0] }
  0xb5   :  { %1590 = vmatpush.bf16.msrb.mxu0 %v5094_v15  ;;  %1553 = vmatpush.bf16.msrb.mxu1 %v4678_v21  ;;  %v5142_v15 = vor.u32 %v6449_v3, %v5139_v4  ;;  %v5206_v7 = vor.u32 %v6467_v6, %v5205_v1  ;;  %v6465_v21 = vld [vmem:[%s10294_s6 + $0x64] sm:$0xf0]  ;;  %v5207_v16 = vld [vmem:[%s10294_s6 + $0x78] sm:$0xf0] }
  0xb6   :  { %v5198_v29 = vor.u32 %v6465_v21, %v5197_v19  ;;  %v6473_v6 = vld [vmem:[%s10294_s6 + $0xa4] sm:$0xf0] }
  0xb7   :  { %1566 = vmatpush.bf16.msrb.mxu3 %v4806_v24  ;;  %v6417_v24 = vld [vmem:[%s10292_s4 + $0x50c] sm:$0xf] }
  0xb8   :  { %1578 = vmatpush.bf16.msra.mxu2 %v4950_v18  ;;  %v5030_v18 = vor.u32 %v6421_v8, %v5027_v9 }
  0xb9   :  { %1591 = vmatpush.bf16.msrb.mxu0 %v5078_v27  ;;  %1554 = vmatpush.bf16.msrb.mxu1 %v4662_v37  ;;  %v1260_v27 = vadd.f32 %v8018_v17, %v258_v13  ;;  %v5261_v17 = vld [vmem:[%s10294_s6 + $0xe0] sm:$0xf]  ;;  %v1337_v37 = vpop.f32.mrf.mxu2  ;;  %v5221_v13 = vld [vmem:[%s10294_s6 + $0x90] sm:$0xf] }
  0xba   :  { %v5262_v38 = vor.u32 %v6481_v34, %v5261_v17  ;;  %v5191_v17 = vld [vmem:[%s10294_s6 + $0x58] sm:$0xf0] }
  0xbb   :  { %1567 = vmatpush.bf16.msrb.mxu3 %v4790_v40  ;;  %v5181_v40 = vld [vmem:[%s10294_s6 + $0x40] sm:$0xf] }
  0xbc   :  { %1579 = vmatpush.bf16.msra.mxu2 %v4934_v32  ;;  %v5014_v32 = vor.u32 %v6417_v24, %v5011_v25  ;;  %v6464_v24 = vld [vmem:[%s10294_s6 + $0x64] sm:$0xf]  ;;  %v5199_v25 = vld [vmem:[%s10294_s6 + $0x68] sm:$0xf0] }
  0xbd   :  { %1592 = vmatpush.bf16.msrb.mxu0 %v5062_v44  ;;  %1555 = vmatpush.bf16.msrb.mxu1 %v4646_v54  ;;  %v5182_v44 = vor.u32 %v6461_v42, %v5181_v40  ;;  %v6458_v42 = vld [vmem:[%s10294_s6 + $0x34] sm:$0xf] }
  0xbf   :  { %1568 = vmatpush.bf16.msrb.mxu3 %v4774_v60  ;;  %v6457_v60 = vld [vmem:[%s10294_s6 + $0x24] sm:$0xf0] }
  0xc0   :  { %1580 = vmatpush.bf16.msra.mxu2 %v4918_v49  ;;  %v1311_v47 = vpop.f32.mrf.mxu0  ;;  %v5245_v49 = vld [vmem:[%s10294_s6 + $0xc0] sm:$0xf]  ;;  %v5166_v63 = vor.u32 %v6457_v60, %v5165_v58  ;;  %v6498_v58 = vld [vmem:[%s10294_s6 + $0x174] sm:$0xf] }
  0xc1   :  { %1593 = vmatpush.bf16.msrb.mxu0 %v5046_v0  ;;  %1556 = vmatpush.bf16.msrb.mxu1 %v4630_v11  ;;  %v1339_v50 = vpop.f32.mrf.mxu2  ;;  %v5157_v0 = vld [vmem:[%s10294_s6 + $0x10] sm:$0xf]  ;;  %v5149_v11 = vld [vmem:[%s10294_s6] sm:$0xf] }
  0xc3   :  { %1569 = vmatpush.bf16.msrb.mxu3 %v4758_v14  ;;  %v6471_v14 = vld [vmem:[%s10294_s6 + $0x94] sm:$0xf0] }
  0xc4   :  { %1581 = vmatpush.bf16.msra.mxu2 %v4902_v5  ;;  %1557 = vmatmul.bf16.vlgmr.msrb.gmra.mxu1 %v7117_v51  ;;  %v1273_v51 = vadd.f32 %v8038_v28, %v1260_v27  ;;  %v6479_v28 = vld [vmem:[%s10294_s6 + $0xd4] sm:$0xf0]  ;;  %v5229_v5 = vld [vmem:[%s10294_s6 + $0xa0] sm:$0xf] }
  0xc5   :  { %1608 = vmatpush.bf16.msra.mxu1 %v5142_v15  ;;  %1594 = vmatpush.bf16.msrb.mxu0 %v5030_v18  ;;  %v5230_v9 = vor.u32 %v6473_v6, %v5229_v5  ;;  %v6466_v15 = vld [vmem:[%s10294_s6 + $0x74] sm:$0xf]  ;;  %v5150_v18 = vor.u32 %v6453_v12, %v5149_v11  ;;  %v5327_v6 = vld [vmem:[%s10294_s6 + $0x168] sm:$0xf0]  ;;  %v5319_v12 = vld [vmem:[%s10294_s6 + $0x158] sm:$0xf0] }
  0xc6   :  { %1570 = vmatmul.bf16.vlgmr.msrb.gmra.mxu3 %v7130_v57  ;;  %v5253_v57 = vld [vmem:[%s10294_s6 + $0xd0] sm:$0xf]  ;;  %v1286_v43 = vadd.f32 %v8052_v36, %v1273_v51  ;;  %v6477_v36 = vld [vmem:[%s10294_s6 + $0xc4] sm:$0xf0]  ;;  %v5183_v51 = vld [vmem:[%s10294_s6 + $0x48] sm:$0xf0] }
  0xc7   :  { %1931 = vmatpush.bf16.msra.mxu3 %v5206_v7  ;;  %v5246_v52 = vor.u32 %v6477_v36, %v5245_v49  ;;  %v5222_v7 = vor.u32 %v6471_v14, %v5221_v13  ;;  %v6454_v36 = vld [vmem:[%s10294_s6 + $0x14] sm:$0xf] }
  0xc8   :  { %1582 = vmatpush.bf16.msra.mxu2 %v4886_v20  ;;  %v1299_v54 = vadd.f32 %v8060_v41, %v1286_v43  ;;  %v5238_v41 = vor.u32 %v6475_v62, %v5237_v61  ;;  %v1313_v3 = vpop.f32.mrf.mxu0  ;;  %v5210_v20 = vor.u32 %v6466_v15, %v5207_v16  ;;  %v5335_v62 = vld [vmem:[%s10294_s6 + $0x178] sm:$0xf0] }
  0xc9   :  { %1944 = vmatpush.bf16.msrb.mxu1 %v5270_v26  ;;  %1595 = vmatpush.bf16.msrb.mxu0 %v5014_v32  ;;  %v1350_v4 = vpop.f32.mrf.mxu3  ;;  %v5214_v26 = vor.u32 %v6469_v23, %v5213_v22  ;;  %v5202_v32 = vor.u32 %v6464_v24, %v5199_v25  ;;  %v6452_v3 = vld [vmem:[%s10294_s6 + $0x4] sm:$0xf]  ;;  %v5311_v23 = vld [vmem:[%s10294_s6 + $0x148] sm:$0xf0] }
  0xca   :  { %v1312_v59 = vadd.f32 %v1311_v47, %v1299_v54  ;;  %v5333_v54 = vld [vmem:[%s10294_s6 + $0x170] sm:$0xf]  ;;  %v6492_v22 = vld [vmem:[%s10294_s6 + $0x144] sm:$0xf] }
  0xcb   :  { %1932 = vmatpush.bf16.msra.mxu3 %v5198_v29  ;;  %1583 = vmatmul.bf16.vlgmr.msra.gmra.mxu2 %v7331_v30  ;;  %v5254_v30 = vor.u32 %v6479_v28, %v5253_v57  ;;  %v259_v29 = vperm.slane %v8083_v53, 1  ;;  %v5175_v57 = vld [vmem:[%s10294_s6 + $0x38] sm:$0xf0] }
  0xcc   :  { %1596 = vmatmul.bf16.vlgmr.msrb.gmra.mxu0 %v7342_v35  ;;  %v1324_v35 = vpop.f32.mrf.mxu1  ;;  %v5178_v43 = vor.u32 %v6458_v42, %v5175_v57  ;;  %v5295_v42 = vld [vmem:[%s10294_s6 + $0x128] sm:$0xf0] }
  0xcd   :  { %1945 = vmatpush.bf16.msrb.mxu1 %v5262_v38  ;;  %v1325_v1 = vadd.f32 %v1324_v35, %v1312_v59  ;;  %v1351_v34 = vadd.f32 %v1350_v4, %v259_v29  ;;  %v6460_v38 = vld [vmem:[%s10294_s6 + $0x44] sm:$0xf]  ;;  %v5159_v35 = vld [vmem:[%s10294_s6 + $0x18] sm:$0xf0]  ;;  %v5151_v4 = vld [vmem:[%s10294_s6 + $0x8] sm:$0xf0] }
  0xce   :  { %v1363_v10 = vpop.f32.mrf.mxu2  ;;  %v5186_v40 = vor.u32 %v6460_v38, %v5183_v51  ;;  %v5154_v13 = vor.u32 %v6452_v3, %v5151_v4  ;;  %v5293_v38 = vld [vmem:[%s10294_s6 + $0x120] sm:$0xf]  ;;  %v6489_v51 = vld [vmem:[%s10294_s6 + $0x124] sm:$0xf0] }
  0xcf   :  { %1933 = vmatpush.bf16.msra.mxu3 %v5190_v39  ;;  %v1338_v55 = vadd.f32 %v1337_v37, %v1325_v1  ;;  %v5194_v37 = vor.u32 %v6462_v33, %v5191_v17  ;;  %v1364_v39 = vadd.f32 %v1363_v10, %v1351_v34  ;;  %v6497_v1 = vld [vmem:[%s10294_s6 + $0x164] sm:$0xf0]  ;;  %v5317_v10 = vld [vmem:[%s10294_s6 + $0x150] sm:$0xf]  ;;  %v6491_v33 = vld [vmem:[%s10294_s6 + $0x134] sm:$0xf0] }
  0xd0   :  { %v6490_v17 = vld [vmem:[%s10294_s6 + $0x134] sm:$0xf] }
  0xd1   :  { %1946 = vmatpush.bf16.msrb.mxu1 %v5254_v30  ;;  %v1614_v19 = vmax.f32 %v1338_v55, 0.0  ;;  %v1352_v21 = vpop.f32.mrf.mxu3  ;;  %v6494_v55 = vld [vmem:[%s10294_s6 + $0x154] sm:$0xf] }
  0xd3   :  { %1934 = vmatpush.bf16.msra.mxu3 %v5182_v44  ;;  %v8247_v31 = vpack.c.bf16 %v1614_v19, %v1614_v19  ;;  %v6456_v44 = vld [vmem:[%s10294_s6 + $0x24] sm:$0xf]  ;;  %v6493_v19 = vld [vmem:[%s10294_s6 + $0x144] sm:$0xf0] }
  0xd4   :  { %5146 = vmatmul.msk.bf16.vlgmr.msra.gmra.mxu1 %vm1246_vm0, %v7240_v45  ;;  %v1326_v8 = vpop.f32.mrf.mxu1  ;;  %v5158_v45 = vor.u32 %v6455_v2, %v5157_v0  ;;  %v5170_v49 = vor.u32 %v6456_v44, %v5167_v46  ;;  %v5325_v0 = vld [vmem:[%s10294_s6 + $0x160] sm:$0xf]  ;;  %v6496_v2 = vld [vmem:[%s10294_s6 + $0x164] sm:$0xf]  ;;  %v6486_v44 = vld [vmem:[%s10294_s6 + $0x114] sm:$0xf] }
  0xd5   :  { %1947 = vmatpush.bf16.msrb.mxu1 %v5246_v52  ;;  %v5326_v5 = vor.u32 %v6497_v1, %v5325_v0 }
  0xd6   :  { %v1365_v27 = vpop.f32.mrf.mxu2 }
  0xd7   :  { %1935 = vmatpush.bf16.msra.mxu3 %v5174_v56  ;;  %v6499_v56 = vld [vmem:[%s10294_s6 + $0x174] sm:$0xf0] }
  0xd8   :  { %v5334_v61 = vor.u32 %v6499_v56, %v5333_v54  ;;  %v5279_v56 = vld [vmem:[%s10294_s6 + $0x108] sm:$0xf0] }
  0xd9   :  { %1948 = vmatpush.bf16.msrb.mxu1 %v5238_v41  ;;  %v5162_v41 = vor.u32 %v6454_v36, %v5159_v35  ;;  %v5277_v36 = vld [vmem:[%s10294_s6 + $0x100] sm:$0xf]  ;;  %v6485_v35 = vld [vmem:[%s10294_s6 + $0x104] sm:$0xf0] }
  0xda   :  { %1957 = vmatpush.bf16.msrb.mxu2 %v5334_v61  ;;  %v5278_v54 = vor.u32 %v6485_v35, %v5277_v36  ;;  %v6468_v35 = vld [vmem:[%s10294_s6 + $0x84] sm:$0xf] }
  0xdb   :  { %1936 = vmatpush.bf16.msra.mxu3 %v5166_v63  ;;  %v5338_v63 = vor.u32 %v6498_v58, %v5335_v62 }
  0xdd   :  { %1949 = vmatpush.bf16.msrb.mxu1 %v5230_v9  ;;  %v5330_v9 = vor.u32 %v6496_v2, %v5327_v6  ;;  %v5341_v6 = vld [vmem:[%s10294_s6 + $0x180] sm:$0xf] }
  0xde   :  { %1958 = vmatpush.bf16.msrb.mxu2 %v5326_v5 }
  0xdf   :  { %1937 = vmatpush.bf16.msra.mxu3 %v5158_v45  ;;  %v6495_v45 = vld [vmem:[%s10294_s6 + $0x154] sm:$0xf0] }
  0xe0   :  { %v5318_v14 = vor.u32 %v6495_v45, %v5317_v10  ;;  %v6482_v10 = vld [vmem:[%s10294_s6 + $0xf4] sm:$0xf]  ;;  %v5271_v45 = vld [vmem:[%s10294_s6 + $0xf8] sm:$0xf0] }
  0xe1   :  { %1950 = vmatpush.bf16.msrb.mxu1 %v5222_v7  ;;  %v5322_v7 = vor.u32 %v6494_v55, %v5319_v12  ;;  %v5274_v55 = vor.u32 %v6482_v10, %v5271_v45 }
  0xe2   :  { %1959 = vmatpush.bf16.msrb.mxu2 %v5318_v14 }
  0xe3   :  { %1938 = vmatpush.bf16.msra.mxu3 %v5150_v18  ;;  %v5309_v18 = vld [vmem:[%s10294_s6 + $0x140] sm:$0xf] }
  0xe4   :  { %v5310_v25 = vor.u32 %v6493_v19, %v5309_v18 }
  0xe5   :  { %1951 = vmatpush.bf16.msrb.mxu1 %v5214_v26  ;;  %v1376_v28 = vpop.f32.mrf.mxu0  ;;  %v5314_v26 = vor.u32 %v6492_v22, %v5311_v23  ;;  %v6478_v22 = vld [vmem:[%s10294_s6 + $0xd4] sm:$0xf]  ;;  %v5255_v23 = vld [vmem:[%s10294_s6 + $0xd8] sm:$0xf0] }
  0xe6   :  { %1939 = vmatmul.bf16.vlgmr.msra.gmra.mxu3 %v8247_v31  ;;  %v1377_v30 = vadd.f32 %v1376_v28, %v1364_v39  ;;  %1960 = vmatpush.bf16.msrb.mxu2 %v5310_v25  ;;  %v6488_v39 = vld [vmem:[%s10294_s6 + $0x124] sm:$0xf]  ;;  %v5258_v25 = vor.u32 %v6478_v22, %v5255_v23 }
  0xe7   :  { %1983 = vmatpush.bf16.msrb.mxu3 %v5210_v20  ;;  %v1389_v47 = vpop.f32.mrf.mxu1  ;;  %v5298_v57 = vor.u32 %v6488_v39, %v5295_v42  ;;  %v6474_v39 = vld [vmem:[%s10294_s6 + $0xb4] sm:$0xf] }
  0xe8   :  { %v1390_v48 = vadd.f32 %v1389_v47, %v1377_v30  ;;  %v5285_v30 = vld [vmem:[%s10294_s6 + $0x110] sm:$0xf] }
  0xe9   :  { %2009 = vmatpush.bf16.msra.mxu1 %v5338_v63 }
  0xeb   :  { %1984 = vmatpush.bf16.msrb.mxu3 %v5202_v32  ;;  %v5301_v32 = vld [vmem:[%s10294_s6 + $0x130] sm:$0xf] }
  0xec   :  { %v5302_v34 = vor.u32 %v6491_v33, %v5301_v32  ;;  %v6476_v33 = vld [vmem:[%s10294_s6 + $0xc4] sm:$0xf] }
  0xed   :  { %v1378_v50 = vpop.f32.mrf.mxu0  ;;  %v1402_v52 = vpop.f32.mrf.mxu3  ;;  %2010 = vmatpush.bf16.msra.mxu1 %v5330_v9 }
  0xee   :  { %v1403_v59 = vadd.f32 %v1402_v52, %v1390_v48  ;;  %v1415_v60 = vpop.f32.mrf.mxu2  ;;  %1961 = vmatpush.bf16.msrb.mxu2 %v5302_v34  ;;  %v5287_v48 = vld [vmem:[%s10294_s6 + $0x118] sm:$0xf0]  ;;  %v6484_v50 = vld [vmem:[%s10294_s6 + $0x104] sm:$0xf] }
  0xef   :  { %1985 = vmatpush.bf16.msrb.mxu3 %v5194_v37  ;;  %v1391_v8 = vpop.f32.mrf.mxu1  ;;  %v5282_v58 = vor.u32 %v6484_v50, %v5279_v56  ;;  %v6500_v34 = vld [vmem:[%s10294_s6 + $0x184] sm:$0xf] }
  0xf0   :  { %v1416_v11 = vadd.f32 %v1415_v60, %v1403_v59  ;;  %v6501_v8 = vld [vmem:[%s10294_s6 + $0x184] sm:$0xf0] }
  0xf1   :  { %2011 = vmatpush.bf16.msra.mxu1 %v5322_v7  ;;  %v5342_v9 = vor.u32 %v6501_v8, %v5341_v6 }
  0xf3   :  { %1986 = vmatpush.bf16.msrb.mxu3 %v5186_v40  ;;  %v5294_v40 = vor.u32 %v6489_v51, %v5293_v38  ;;  %1977 = vmatpush.bf16.msra.mxu0 %v5342_v9  ;;  %v8454_v9 = vld [vmem:[%s10295_s7] sm:$0x3] }
  0xf4   :  { %v1674_v10 = vperm.slane %v8454_v9, 0 }
  0xf5   :  { %v1428_v15 = vpop.f32.mrf.mxu0  ;;  %v1404_v16 = vpop.f32.mrf.mxu3  ;;  %2012 = vmatpush.bf16.msra.mxu1 %v5314_v26  ;;  %1962 = vmatpush.bf16.msrb.mxu2 %v5294_v40  ;;  %v5239_v40 = vld [vmem:[%s10294_s6 + $0xb8] sm:$0xf0] }
  0xf6   :  { %v1429_v20 = vadd.f32 %v1428_v15, %v1416_v11  ;;  %v1417_v21 = vpop.f32.mrf.mxu2  ;;  %v6480_v15 = vld [vmem:[%s10294_s6 + $0xe4] sm:$0xf]  ;;  %v5263_v16 = vld [vmem:[%s10294_s6 + $0xe8] sm:$0xf0]  ;;  %v5242_v42 = vor.u32 %v6474_v39, %v5239_v40  ;;  %v8511_v40 = vld [vmem:[%s10291_s3 + $0x170] sm:$0xff] }
  0xf7   :  { %1987 = vmatpush.bf16.msrb.mxu3 %v5178_v43  ;;  %v6487_v43 = vld [vmem:[%s10294_s6 + $0x114] sm:$0xf0]  ;;  %1996 = vmatpush.bf16.msrb.mxu0 %v5274_v55  ;;  %v5266_v19 = vor.u32 %v6480_v15, %v5263_v16  ;;  %v8506_v39 = vld [vmem:[%s10291_s3 + $0xe0] sm:$0xff] }
  0xf8   :  { %v1615_v24 = vmax.f32 %v1429_v20, 0.0  ;;  %v5286_v47 = vor.u32 %v6487_v43, %v5285_v30  ;;  %v261_v43 = vperm.slane %v8083_v53, 3 }
  0xfa   :  { %v8334_v27 = vpack.c.bf16 %v1615_v24, %v1615_v24  ;;  %1963 = vmatpush.bf16.msrb.mxu2 %v5286_v47 }
  0xfb   :  { %1988 = vmatpush.bf16.msrb.mxu3 %v5170_v49  ;;  %v5290_v49 = vor.u32 %v6486_v44, %v5287_v48  ;;  %1997 = vmatpush.bf16.msrb.mxu0 %v5266_v19  ;;  %v6470_v44 = vld [vmem:[%s10294_s6 + $0x94] sm:$0xf]  ;;  %v2211_v19 = vld [vmem:[%s10290_s2] sm:$0xff] }
  0xfc   :  { %1952 = vmatmul.bf16.vlgmr.msrb.gmra.mxu1 %v8334_v27 }
  0xfd   :  { %v1430_v29 = vpop.f32.mrf.mxu0 }
  0xfe   :  { %1964 = vmatpush.bf16.msrb.mxu2 %v5278_v54 }
  0xff   :  { %1989 = vmatpush.bf16.msrb.mxu3 %v5162_v41  ;;  %v260_v41 = vperm.slane %v8083_v53, 2  ;;  %1998 = vmatpush.bf16.msrb.mxu0 %v5258_v25  ;;  %v5215_v53 = vld [vmem:[%s10294_s6 + $0x88] sm:$0xf0] }
 0x100   :  { %v5218_v50 = vor.u32 %v6468_v35, %v5215_v53  ;;  %v8568_v35 = vld [vmem:[%s10291_s3 + $0xc8] sm:$0xff]  ;;  %v8573_v53 = vld [vmem:[%s10291_s3 + $0x158] sm:$0xff] }
 0x101   :  { %v1441_v46 = vpop.f32.mrf.mxu1 }
 0x102   :  { %v1442_v1 = vadd.f32 %v1441_v46, %v260_v41  ;;  %v5223_v46 = vld [vmem:[%s10294_s6 + $0x98] sm:$0xf0] }
 0x103   :  { %1990 = vmatpush.bf16.msrb.mxu3 %v5154_v13  ;;  %v5226_v47 = vor.u32 %v6470_v44, %v5223_v46  ;;  %v8537_v44 = vld [vmem:[%s10291_s3 + $0x160] sm:$0xff]  ;;  %v8542_v46 = vld [vmem:[%s10291_s3 + $0xd8] sm:$0xff] }
 0x105   :  { %v1467_v28 = vpop.f32.mrf.mxu0 }
 0x106   :  { %1991 = vmatmul.bf16.vlgmr.msrb.gmra.mxu3 %v8247_v31  ;;  %v5303_v31 = vld [vmem:[%s10294_s6 + $0x138] sm:$0xf0] }
 0x107   :  { %v5306_v37 = vor.u32 %v6490_v17, %v5303_v31  ;;  %v5247_v17 = vld [vmem:[%s10294_s6 + $0xc8] sm:$0xf0] }
 0x108   :  { %v5250_v31 = vor.u32 %v6476_v33, %v5247_v17 }
 0x109   :  { %2013 = vmatpush.bf16.msra.mxu1 %v5306_v37  ;;  %v1454_v52 = vpop.f32.mrf.mxu3  ;;  %v1443_v61 = vpop.f32.mrf.mxu1  ;;  %v5343_v37 = vld [vmem:[%s10294_s6 + $0x188] sm:$0xf0] }
 0x10a   :  { %v1455_v2 = vadd.f32 %v1454_v52, %v1442_v1  ;;  %v5346_v38 = vor.u32 %v6500_v34, %v5343_v37  ;;  %1999 = vmatpush.bf16.msrb.mxu0 %v5250_v31  ;;  %v8484_v31 = vld [vmem:[%s10291_s3 + $0xf0] sm:$0xff]  ;;  %v8489_v37 = vld [vmem:[%s10291_s3 + $0x180] sm:$0xff] }
 0x10b   :  { %2126 = vmatpush.msra.mxu3 %v8489_v37 }
 0x10c   :  { %v1468_v4 = vadd.f32 %v1467_v28, %v1455_v2  ;;  %2029 = vmatpush.bf16.msra.mxu2 %v5346_v38  ;;  %v5231_v28 = vld [vmem:[%s10294_s6 + $0xa8] sm:$0xf0]  ;;  %v8494_v38 = vld [vmem:[%s10291_s3 + $0xf8] sm:$0xff] }
 0x10d   :  { %2014 = vmatpush.bf16.msra.mxu1 %v5298_v57  ;;  %v1469_v59 = vpop.f32.mrf.mxu0  ;;  %v6472_v57 = vld [vmem:[%s10294_s6 + $0xa4] sm:$0xf]  ;;  %2127 = vmatpush.msra.mxu3 %v8511_v40 }
 0x10e   :  { %v1480_v60 = vpop.f32.mrf.mxu2  ;;  %2000 = vmatpush.bf16.msrb.mxu0 %v5242_v42  ;;  %v5234_v30 = vor.u32 %v6472_v57, %v5231_v28  ;;  %v8518_v42 = vld [vmem:[%s10291_s3 + $0xe8] sm:$0xff]  ;;  %v8523_v57 = vld [vmem:[%s10291_s3 + $0x178] sm:$0xff]  ;;  %v8528_v28 = vld [vmem:[%s10291_s3 + $0xd0] sm:$0xff] }
 0x10f   :  { %v1481_v11 = vadd.f32 %v1480_v60, %v1468_v4  ;;  %2128 = vmatpush.msra.mxu3 %v8537_v44 }
 0x111   :  { %2015 = vmatpush.bf16.msra.mxu1 %v5290_v49  ;;  %v1456_v62 = vpop.f32.mrf.mxu3 }
 0x112   :  { %2001 = vmatpush.bf16.msrb.mxu0 %v5234_v30 }
 0x115   :  { %2016 = vmatpush.bf16.msra.mxu1 %v5282_v58  ;;  %v1519_v63 = vpop.f32.mrf.mxu0 }
 0x116   :  { %v1482_v0 = vpop.f32.mrf.mxu2  ;;  %2002 = vmatpush.bf16.msrb.mxu0 %v5226_v47  ;;  %v8547_v47 = vld [vmem:[%s10291_s3 + $0x168] sm:$0xff] }
 0x11a   :  { %2003 = vmatpush.bf16.msrb.mxu0 %v5218_v50 }
 0x11d   :  { %v1521_v3 = vpop.f32.mrf.mxu0 }
 0x121   :  { %v1493_v5 = vpop.f32.mrf.mxu1 }
 0x122   :  { %v1494_v12 = vadd.f32 %v1493_v5, %v1481_v11 }
 0x129   :  { %v1545_v13 = vpop.f32.mrf.mxu0  ;;  %v1506_v14 = vpop.f32.mrf.mxu3 }
 0x12a   :  { %v1507_v7 = vadd.f32 %v1506_v14, %v1494_v12  ;;  %v1495_v18 = vpop.f32.mrf.mxu1 }
 0x12b   :  { %v2212_v18 = vld [vmem:[%s10290_s2 + $0x8] sm:$0xff] }
 0x12c   :  { %v1520_v20 = vadd.f32 %v1519_v63, %v1507_v7 }
 0x12e   :  { %v1532_v21 = vpop.f32.mrf.mxu2  ;;  %v1616_v24 = vmax.f32 %v1520_v20, 0.0  ;;  %v2214_v20 = vmax.f32 %v2212_v18, 1.1920929e-07  ;;  %v8687_v18 = vld [vmem:[%s10291_s3 + $0x100] sm:$0xff] }
 0x12f   :  { %v1533_v48 = vadd.f32 %v1532_v21, %v261_v43  ;;  %v2213_v21 = vmax.f32 %v2211_v19, 1.1920929e-07 }
 0x130   :  { %v1620_v26 = vpack.c.bf16 %v1616_v24, %v1616_v24  ;;  %v2216_v22 = vmin.f32 %v2214_v20, 0.9999999  ;;  %v8474_v24 = vstv %s10288_s0 }
 0x131   :  { %v1547_v29 = vpop.f32.mrf.mxu0  ;;  %v1508_v32 = vpop.f32.mrf.mxu3  ;;  %v1546_v36 = vadd.f32 %v1545_v13, %v1533_v48  ;;  %v2215_v23 = vmin.f32 %v2213_v21, 0.9999999  ;;  %vm2238_vm1 = vweird.f32 %v8474_v24  ;;  %v2242_v21 = vand.u32 2147483647, %v8474_v24 }
 0x132   :  { %1965 = vmatmul.bf16.vlgmr.msrb.gmra.mxu2 %v1620_v26  ;;  %2017 = vmatmul.bf16.vlgmr.msra.gmra.mxu1 %v1620_v26  ;;  %6726 = vlog2.f32 %v2216_v22  ;;  %v8696_v22 = vld [vmem:[%s10291_s3 + $0x78] sm:$0xff] }
 0x133   :  { %6728 = vlog2.f32 %v2215_v23  ;;  %2099 = vmatpush.msrb.mxu2 %v8484_v31  ;;  %v8701_v23 = vld [vmem:[%s10291_s3 + $0x108] sm:$0xff]  ;;  %vm8736_vm5 = vcmp.eq.f32.partialorder %v2242_v21, 8.507059e+37 }
 0x134   :  { %6730 = vrcp.f32 %v8474_v24 }
 0x135   :  { %2100 = vmatpush.msrb.mxu2 %v8506_v39 }
 0x136   :  { %v1534_v51 = vpop.f32.mrf.mxu2 }
 0x137   :  { %v8501_v51 = vld [vmem:[%s10291_s3 + $0x188] sm:$0xff]  ;;  %2101 = vmatpush.msrb.mxu2 %v8528_v28 }
 0x138   :  { %v6727_v25 = vpop.eup %6726  ;;  %2166 = vmatpush.msrb.mxu1 %v8501_v51 }
 0x139   :  { %v6729_v26 = vpop.eup %6728  ;;  %v2220_v29 = vmul.f32 0.6931472, %v6727_v25 }
 0x13a   :  { %v2218_v33 = vmul.f32 0.6931472, %v6729_v26  ;;  %v8479_v17 = vpop.eup %6730  ;;  %2167 = vmatpush.msrb.mxu1 %v8523_v57 }
 0x13b   :  { %v2222_v34 = vsub.f32 0.0, %v2220_v29  ;;  %v2234_v43 = vmul.f32 %v8479_v17, %v8474_v24  ;;  %vm2239_vm2 = vweird.f32 %v8479_v17 }
 0x13c   :  { %v2221_v30 = vsub.f32 0.0, %v2218_v33  ;;  %2168 = vmatpush.msrb.mxu1 %v8547_v47  ;;  %vm8707_vm3 = vmor %vm2238_vm1, %vm2239_vm2 }
 0x13d   :  { %6732 = vlog2.f32 %v2222_v34  ;;  %v8719_v34 = vld [vmem:[%s10291_s3 + $0x60] sm:$0xff] }
 0x13e   :  { %6734 = vlog2.f32 %v2221_v30  ;;  %2169 = vmatpush.msrb.mxu1 %v8573_v53 }
 0x141   :  { %v1558_v49 = vpop.f32.mrf.mxu1 }
 0x142   :  { %v1559_v52 = vadd.f32 %v1558_v49, %v1546_v36  ;;  %v8556_v49 = vld [vmem:[%s10291_s3 + $0xc0] sm:$0xff]  ;;  %v8561_v36 = vld [vmem:[%s10291_s3 + $0x150] sm:$0xff] }
 0x143   :  { %2102 = vmatpush.msrb.mxu2 %v8556_v49  ;;  %2129 = vmatpush.msra.mxu3 %v8561_v36 }
 0x149   :  { %v1571_v54 = vpop.f32.mrf.mxu3  ;;  %v1597_v56 = vpop.f32.mrf.mxu0 }
 0x14a   :  { %v1572_v58 = vadd.f32 %v1571_v54, %v1559_v52  ;;  %v1560_v59 = vpop.f32.mrf.mxu1  ;;  %v8580_v52 = vld [vmem:[%s10291_s3 + $0xb0] sm:$0xff]  ;;  %v8585_v54 = vld [vmem:[%s10291_s3 + $0x140] sm:$0xff] }
 0x14b   :  { %v8597_v59 = vld [vmem:[%s10291_s3 + $0x148] sm:$0xff]  ;;  %2103 = vmatpush.msrb.mxu2 %v8580_v52  ;;  %2130 = vmatpush.msra.mxu3 %v8585_v54 }
 0x14c   :  { %2170 = vmatpush.msrb.mxu1 %v8597_v59 }
 0x14e   :  { %v1584_v60 = vpop.f32.mrf.mxu2 }
 0x14f   :  { %v1585_v61 = vadd.f32 %v1584_v60, %v1572_v58  ;;  %v8592_v58 = vld [vmem:[%s10291_s3 + $0xb8] sm:$0xff]  ;;  %v8604_v60 = vld [vmem:[%s10291_s3 + $0xa0] sm:$0xff] }
 0x150   :  { %2104 = vmatpush.msrb.mxu2 %v8604_v60 }
 0x151   :  { %v1573_v62 = vpop.f32.mrf.mxu3  ;;  %v1599_v41 = vpop.f32.mrf.mxu0  ;;  %v1598_v63 = vadd.f32 %v1597_v56, %v1585_v61  ;;  %v2235_v56 = vsub.f32 1.0, %v2234_v43  ;;  %v8609_v61 = vld [vmem:[%s10291_s3 + $0x130] sm:$0xff] }
 0x152   :  { %v1610_v0 = vpop.f32.mrf.mxu1  ;;  %v1675_v62 = vperm.slane %v8454_v9, 1  ;;  %v8617_v41 = vld [vmem:[%s10291_s3 + $0xa8] sm:$0xff]  ;;  %2131 = vmatpush.msra.mxu3 %v8609_v61  ;;  %v8659_v9 = vld [vmem:[%s10291_s3 + $0x110] sm:$0xff] }
 0x153   :  { %v1611_v1 = vadd.f32 %v1610_v0, %v1598_v63  ;;  %v8622_v63 = vld [vmem:[%s10291_s3 + $0x138] sm:$0xff]  ;;  %v6733_v0 = vpop.eup %6732 }
 0x154   :  { %2171 = vmatpush.msrb.mxu1 %v8622_v63 }
 0x155   :  { %v1617_v3 = vmax.f32 %v1611_v1, 0.0  ;;  %v8629_v1 = vld [vmem:[%s10291_s3 + $0x90] sm:$0xff] }
 0x156   :  { %v1586_v2 = vpop.f32.mrf.mxu2  ;;  %2105 = vmatpush.msrb.mxu2 %v8629_v1 }
 0x157   :  { %v1621_v4 = vpack.c.bf16 %v1617_v3, %v1617_v3  ;;  %v8634_v2 = vld [vmem:[%s10291_s3 + $0x120] sm:$0xff]  ;;  %v2236_v3 = vmul.f32 %v8479_v17, %v2235_v56 }
 0x158   :  { %2132 = vmatpush.msra.mxu3 %v8634_v2  ;;  %v5451_v56 = vld [vmem:[%s10296_s8 + $0xc0] sm:$0xf] }
 0x159   :  { %5347 = vmatmul.msk.bf16.vlgmr.msra.gmra.mxu0 %vm1246_vm0, %v1621_v4  ;;  %5348 = vmatmul.msk.bf16.vlgmr.msra.gmra.mxu2 %vm1246_vm0, %v1621_v4  ;;  %v8642_v4 = vld [vmem:[%s10291_s3 + $0x98] sm:$0xff]  ;;  %v2237_v20 = vadd.f32 %v8479_v17, %v2236_v3 }
 0x15a   :  { %v1612_v5 = vpop.f32.mrf.mxu1  ;;  %2139 = vmatpush.msra.mxu0 %v8494_v38  ;;  %2133 = vmatpush.msra.mxu3 %v8659_v9 }
 0x15b   :  { %v8647_v5 = vld [vmem:[%s10291_s3 + $0x128] sm:$0xff] }
 0x15c   :  { %2140 = vmatpush.msra.mxu0 %v8518_v42  ;;  %2172 = vmatpush.msrb.mxu1 %v8647_v5 }
 0x15d   :  { %2134 = vmatpush.msra.mxu3 %v8687_v18 }
 0x15e   :  { %2141 = vmatpush.msra.mxu0 %v8542_v46 }
 0x15f   :  { %2262 = vmatpush.msrb.mxu3 %v8484_v31 }
 0x160   :  { %2142 = vmatpush.msra.mxu0 %v8568_v35 }
 0x161   :  { %2263 = vmatpush.msrb.mxu3 %v8506_v39  ;;  %v2041_v39 = vld [vmem:[%s10291_s3 + $0x30] sm:$0xff] }
 0x162   :  { %2143 = vmatpush.msra.mxu0 %v8592_v58 }
 0x163   :  { %2264 = vmatpush.msrb.mxu3 %v8528_v28  ;;  %v2039_v28 = vld [vmem:[%s10291_s3 + $0x20] sm:$0xff] }
 0x164   :  { %2144 = vmatpush.msra.mxu0 %v8617_v41 }
 0x165   :  { %2265 = vmatpush.msrb.mxu3 %v8556_v49  ;;  %v2037_v49 = vld [vmem:[%s10291_s3 + $0x10] sm:$0xff] }
 0x166   :  { %2145 = vmatpush.msra.mxu0 %v8642_v4 }
 0x167   :  { %2266 = vmatpush.msrb.mxu3 %v8580_v52  ;;  %v2035_v52 = vld [vmem:[%s10291_s3] sm:$0xff] }
 0x169   :  { %v1940_v6 = vpop.f32.mrf.mxu3  ;;  %2004 = vmatmul.bf16.vlgmr.msrb.gmra.mxu0 %v8334_v27  ;;  %2267 = vmatpush.msrb.mxu3 %v8604_v60 }
 0x16a   :  { %v1941_v45 = vadd.f32 %v1940_v6, %v1674_v10  ;;  %v6735_v10 = vpop.eup %6734 }
 0x16b   :  { %v2224_v25 = vmul.f32 0.6931472, %v6735_v10  ;;  %2268 = vmatpush.msrb.mxu3 %v8629_v1 }
 0x171   :  { %v1942_v8 = vpop.f32.mrf.mxu3 }
 0x172   :  { %v8654_v8 = vld [vmem:[%s10291_s3 + $0x80] sm:$0xff] }
 0x173   :  { %2106 = vmatpush.msrb.mxu2 %v8654_v8  ;;  %2269 = vmatpush.msrb.mxu3 %v8654_v8  ;;  %v6548_v8 = vld [vmem:[%s10296_s8 + $0x16c] sm:$0xf0] }
 0x179   :  { %v1953_v11 = vpop.f32.mrf.mxu1 }
 0x17a   :  { %v8457_v55 = vadd.f32 %v1953_v11, %v1941_v45  ;;  %v2226_v11 = vmul.f32 0.6931472, %v6733_v0 }
 0x17c   :  { %v2228_v33 = vsub.f32 0.0, %v2226_v11 }
 0x181   :  { %v1955_v13 = vpop.f32.mrf.mxu1 }
 0x182   :  { %v8669_v13 = vld [vmem:[%s10291_s3 + $0x88] sm:$0xff] }
 0x183   :  { %2146 = vmatpush.msra.mxu0 %v8669_v13 }
 0x185   :  { %2147 = vmatpush.msra.mxu0 %v8696_v22 }
 0x189   :  { %v8459_v12 = vpop.f32.mrf.mxu3 }
 0x18a   :  { %v1993_v45 = vadd.f32 %v8459_v12, %v1675_v62  ;;  %v2043_v62 = vld [vmem:[%s10291_s3 + $0x40] sm:$0xff] }
 0x191   :  { %v1994_v14 = vpop.f32.mrf.mxu3 }
 0x192   :  { %v8674_v14 = vld [vmem:[%s10291_s3 + $0x118] sm:$0xff] }
 0x193   :  { %2173 = vmatpush.msrb.mxu1 %v8674_v14 }
 0x195   :  { %2174 = vmatpush.msrb.mxu1 %v8701_v23 }
 0x197   :  { %2302 = vmatpush.msra.mxu1 %v8494_v38 }
 0x199   :  { %2303 = vmatpush.msra.mxu1 %v8518_v42 }
 0x19b   :  { %2304 = vmatpush.msra.mxu1 %v8542_v46  ;;  %v2040_v46 = vld [vmem:[%s10291_s3 + $0x28] sm:$0xff] }
 0x19d   :  { %2305 = vmatpush.msra.mxu1 %v8568_v35  ;;  %v2038_v35 = vld [vmem:[%s10291_s3 + $0x18] sm:$0xff] }
 0x19f   :  { %2306 = vmatpush.msra.mxu1 %v8592_v58  ;;  %v2036_v58 = vld [vmem:[%s10291_s3 + $0x8] sm:$0xff] }
 0x1a1   :  { %2307 = vmatpush.msra.mxu1 %v8617_v41  ;;  %v6530_v41 = vld [vmem:[%s10296_s8 + $0xe4] sm:$0xf] }
 0x1a3   :  { %2308 = vmatpush.msra.mxu1 %v8642_v4 }
 0x1a5   :  { %2309 = vmatpush.msra.mxu1 %v8669_v13  ;;  %v5533_v13 = vld [vmem:[%s10296_s8 + $0x170] sm:$0xf0] }
 0x1a7   :  { %2310 = vmatpush.msra.mxu1 %v8696_v22 }
 0x1af   :  { %v8461_v15 = vpop.f32.mrf.mxu1 }
 0x1b5   :  { %v8463_v16 = vpop.f32.mrf.mxu2 }
 0x1b6   :  { %v1967_v30 = vadd.f32 %v8463_v16, %v8457_v55  ;;  %v2045_v55 = vld [vmem:[%s10291_s3 + $0x50] sm:$0xff]  ;;  %v2046_v16 = vld [vmem:[%s10291_s3 + $0x58] sm:$0xff] }
 0x1b7   :  { %v2020_v27 = vpop.f32.mrf.mxu1 }
 0x1b8   :  { %v2244_v27 = vand.u32 2147483648, %v8474_v24  ;;  %v8724_v24 = vld [vmem:[%s10291_s3 + $0x68] sm:$0xff] }
 0x1b9   :  { %2148 = vmatpush.msra.mxu0 %v8724_v24  ;;  %2311 = vmatpush.msra.mxu1 %v8724_v24  ;;  %v5517_v24 = vld [vmem:[%s10296_s8 + $0x150] sm:$0xf0] }
 0x1bb   :  { %2149 = vmatpush.msra.mxu0 %v2046_v16  ;;  %2312 = vmatpush.msra.mxu1 %v2046_v16  ;;  %v6526_v16 = vld [vmem:[%s10296_s8 + $0xc4] sm:$0xf] }
 0x1bd   :  { %v1968_v7 = vpop.f32.mrf.mxu2 }
 0x1be   :  { %v8682_v7 = vld [vmem:[%s10291_s3 + $0x70] sm:$0xff] }
 0x1bf   :  { %2107 = vmatpush.msrb.mxu2 %v8682_v7  ;;  %2270 = vmatpush.msrb.mxu3 %v8682_v7 }
 0x1c1   :  { %2108 = vmatpush.msrb.mxu2 %v8719_v34  ;;  %2271 = vmatpush.msrb.mxu3 %v8719_v34  ;;  %v6542_v34 = vld [vmem:[%s10296_s8 + $0x144] sm:$0xf] }
 0x1c3   :  { %2109 = vmatpush.msrb.mxu2 %v2045_v55  ;;  %2272 = vmatpush.msrb.mxu3 %v2045_v55  ;;  %v6528_v55 = vld [vmem:[%s10296_s8 + $0xcc] sm:$0xf0] }
 0x1c5   :  { %2110 = vmatpush.msrb.mxu2 %v2043_v62  ;;  %2273 = vmatpush.msrb.mxu3 %v2043_v62  ;;  %v6540_v62 = vld [vmem:[%s10296_s8 + $0x12c] sm:$0xf0] }
 0x1c7   :  { %2111 = vmatpush.msrb.mxu2 %v2041_v39  ;;  %2274 = vmatpush.msrb.mxu3 %v2041_v39  ;;  %v6524_v39 = vld [vmem:[%s10296_s8 + $0xac] sm:$0xf0] }
 0x1c9   :  { %2112 = vmatpush.msrb.mxu2 %v2039_v28  ;;  %2275 = vmatpush.msrb.mxu3 %v2039_v28  ;;  %v5437_v28 = vld [vmem:[%s10296_s8 + $0xb0] sm:$0xf0] }
 0x1cb   :  { %2113 = vmatpush.msrb.mxu2 %v2037_v49  ;;  %2276 = vmatpush.msrb.mxu3 %v2037_v49  ;;  %v6536_v49 = vld [vmem:[%s10296_s8 + $0x10c] sm:$0xf0] }
 0x1cd   :  { %2114 = vmatpush.msrb.mxu2 %v2035_v52  ;;  %2277 = vmatpush.msrb.mxu3 %v2035_v52  ;;  %v5475_v52 = vld [vmem:[%s10296_s8 + $0xe8] sm:$0xf] }
 0x1cf   :  { %2289 = vmatpush.msra.mxu2 %v8489_v37 }
 0x1d1   :  { %2290 = vmatpush.msra.mxu2 %v8511_v40 }
 0x1d3   :  { %2291 = vmatpush.msra.mxu2 %v8537_v44 }
 0x1d5   :  { %2292 = vmatpush.msra.mxu2 %v8561_v36 }
 0x1d6   :  { %v8477_v32 = vpop.f32.mrf.mxu0 }
 0x1d7   :  { %2293 = vmatpush.msra.mxu2 %v8585_v54  ;;  %v5467_v54 = vld [vmem:[%s10296_s8 + $0xe0] sm:$0xf] }
 0x1d9   :  { %2294 = vmatpush.msra.mxu2 %v8609_v61  ;;  %v6532_v61 = vld [vmem:[%s10296_s8 + $0xec] sm:$0xf0] }
 0x1db   :  { %2295 = vmatpush.msra.mxu2 %v8634_v2 }
 0x1dc   :  { %v8549_v48 = vpop.f32.mrf.mxu2 }
 0x1dd   :  { %2296 = vmatpush.msra.mxu2 %v8659_v9  ;;  %v6546_v9 = vld [vmem:[%s10296_s8 + $0x164] sm:$0xf] }
 0x1de   :  { %v1981_v50 = vpop.f32.mrf.mxu0  ;;  %v5536_v26 = vor.u32 %v6546_v9, %v5533_v13  ;;  %v6514_v13 = vld [vmem:[%s10296_s8 + $0x64] sm:$0xf] }
 0x1df   :  { %v2241_v50 = vsel %vm8707_vm3, %v8479_v17, %v2237_v20  ;;  %v2227_v17 = vsub.f32 0.0, %v2224_v25  ;;  %2297 = vmatpush.msra.mxu2 %v8687_v18 }
 0x1e4   :  { %v2033_v6 = vpop.f32.mrf.mxu2 }
 0x1e5   :  { %v2044_v6 = vld [vmem:[%s10291_s3 + $0x48] sm:$0xff] }
 0x1e6   :  { %v2005_v12 = vpop.f32.mrf.mxu0  ;;  %2150 = vmatpush.msra.mxu0 %v2044_v6  ;;  %2313 = vmatpush.msra.mxu1 %v2044_v6 }
 0x1e7   :  { %v2006_v19 = vadd.f32 %v2005_v12, %v1993_v45  ;;  %v2042_v45 = vld [vmem:[%s10291_s3 + $0x38] sm:$0xff] }
 0x1e8   :  { %2151 = vmatpush.msra.mxu0 %v2042_v45  ;;  %2314 = vmatpush.msra.mxu1 %v2042_v45 }
 0x1e9   :  { %v2019_v29 = vadd.f32 %v8461_v15, %v2006_v19  ;;  %v2245_v15 = vor.u32 1.1754944e-38, %v2244_v27 }
 0x1ea   :  { %2152 = vmatpush.msra.mxu0 %v2040_v46  ;;  %2315 = vmatpush.msra.mxu1 %v2040_v46 }
 0x1eb   :  { %v8731_v43 = vadd.f32 %v8549_v48, %v2019_v29  ;;  %v8749_v48 = vadd.f32 %v8477_v32, %v1967_v30  ;;  %v2246_v3 = vsel %vm8736_vm5, %v2245_v15, %v2241_v50  ;;  %v5515_v29 = vld [vmem:[%s10296_s8 + $0x140] sm:$0xf] }
 0x1ec   :  { %2153 = vmatpush.msra.mxu0 %v2038_v35  ;;  %2316 = vmatpush.msra.mxu1 %v2038_v35 }
 0x1ed   :  { %v2086_v31 = vsel %vm2085_vm4, %v8731_v43, -inf  ;;  %v2230_v38 = vadd.f32 %v2228_v33, %v8731_v43  ;;  %v2229_v42 = vadd.f32 %v2227_v17, %v8749_v48  ;;  %v6544_v33 = vld [vmem:[%s10296_s8 + $0x14c] sm:$0xf0]  ;;  %v5453_v17 = vld [vmem:[%s10296_s8 + $0xd0] sm:$0xf0] }
 0x1ee   :  { %v2007_v32 = vpop.f32.mrf.mxu0  ;;  %v2087_v0 = vmax.f32 %v8749_v48, %v2086_v31  ;;  %2154 = vmatpush.msra.mxu0 %v2036_v58  ;;  %2317 = vmatpush.msra.mxu1 %v2036_v58  ;;  %v5516_v15 = vor.u32 %v6544_v33, %v5515_v29  ;;  %v5456_v31 = vor.u32 %v6526_v16, %v5453_v17  ;;  %v6533_v58 = vld [vmem:[%s10296_s8 + $0xf4] sm:$0xf0]  ;;  %v6512_v29 = vld [vmem:[%s10296_s8 + $0x4c] sm:$0xf0]  ;;  %v6519_v16 = vld [vmem:[%s10296_s8 + $0x8c] sm:$0xf] }
 0x1ef   :  { %v8767_v10 = vmul.f32 %v2246_v3, %v2230_v38  ;;  %v8792_v12 = vmul.f32 %v2246_v3, %v2229_v42  ;;  %v5499_v38 = vld [vmem:[%s10296_s8 + $0x120] sm:$0xf]  ;;  %v6538_v32 = vld [vmem:[%s10296_s8 + $0x124] sm:$0xf]  ;;  %v5501_v3 = vld [vmem:[%s10296_s8 + $0x130] sm:$0xf0] }
 0x1f0   :  { %2088 = vmax.xlane.f32.xlu0 %v2087_v0  ;;  %2329 = vmatpush.msrb.mxu0 %v8501_v51  ;;  %v2396_v51 = vld [vmem:[%s10296_s8 + $0x180] sm:$0xff]  ;;  %v5500_v0 = vor.u32 %v6540_v62, %v5499_v38  ;;  %v5504_v6 = vor.u32 %v6538_v32, %v5501_v3  ;;  %v5429_v17 = vld [vmem:[%s10296_s8 + $0x98] sm:$0xf0]  ;;  %v6508_v38 = vld [vmem:[%s10296_s8 + $0x2c] sm:$0xf0] }
 0x1f1   :  { %v2249_v11 = vsel %vm2085_vm4, %v8767_v10, -inf  ;;  %v2554_v36 = vunpack.c.l.b16 %v2396_v51  ;;  %v6522_v42 = vld [vmem:[%s10296_s8 + $0xa4] sm:$0xf]  ;;  %v5432_v62 = vor.u32 %v6519_v16, %v5429_v17  ;;  %v5373_v3 = vld [vmem:[%s10296_s8 + $0x30] sm:$0xf0] }
 0x1f2   :  { %v2250_v27 = vmax.f32 %v8792_v12, %v2249_v11  ;;  %2330 = vmatpush.msrb.mxu0 %v8523_v57  ;;  %v5440_v46 = vor.u32 %v6522_v42, %v5437_v28  ;;  %v5483_v11 = vld [vmem:[%s10296_s8 + $0x100] sm:$0xf]  ;;  %v6517_v42 = vld [vmem:[%s10296_s8 + $0x74] sm:$0xf0]  ;;  %v5507_v16 = vld [vmem:[%s10296_s8 + $0x128] sm:$0xf] }
 0x1f3   :  { %v5484_v35 = vor.u32 %v6536_v49, %v5483_v11  ;;  %v5413_v49 = vld [vmem:[%s10296_s8 + $0x78] sm:$0xf0] }
 0x1f4   :  { %2331 = vmatpush.msrb.mxu0 %v8547_v47 }
 0x1f6   :  { %2332 = vmatpush.msrb.mxu0 %v8573_v53  ;;  %v2555_v53 = vunpack.c.h.b16 %v2396_v51  ;;  %v5476_v51 = vor.u32 %v6533_v58, %v5475_v52  ;;  %v6502_v58 = vld [vmem:[%s10296_s8 + $0x4] sm:$0xf] }
 0x1f8   :  { %2251 = vmax.xlane.f32.xlu0 %v2250_v27  ;;  %2333 = vmatpush.msrb.mxu0 %v8597_v59  ;;  %v2606_v59 = vpack.c.b16 %v2554_v36, %v2554_v36  ;;  %v2607_v60 = vpack.c.b16 %v2555_v53, %v2555_v53  ;;  %v5485_v27 = vld [vmem:[%s10296_s8 + $0x110] sm:$0xf0]  ;;  %v6520_v36 = vld [vmem:[%s10296_s8 + $0x8c] sm:$0xf0]  ;;  %v6518_v53 = vld [vmem:[%s10296_s8 + $0x84] sm:$0xf] }
 0x1fa   :  { %2334 = vmatpush.msrb.mxu0 %v8622_v63  ;;  %v5469_v63 = vld [vmem:[%s10296_s8 + $0xf0] sm:$0xf0]  ;;  %v2663_v21 = vsel %vm2661_vm6, %v2606_v59, 0  ;;  %v2666_v22 = vsel %vm2661_vm6, %v2607_v60, 0 }
 0x1fb   :  { %v5472_v7 = vor.u32 %v6530_v41, %v5469_v63  ;;  %v6529_v41 = vld [vmem:[%s10296_s8 + $0xd4] sm:$0xf0]  ;;  %v6527_v63 = vld [vmem:[%s10296_s8 + $0xcc] sm:$0xf] }
 0x1fc   :  { %2335 = vmatpush.msrb.mxu0 %v8647_v5  ;;  %v5531_v5 = vld [vmem:[%s10296_s8 + $0x160] sm:$0xf] }
 0x1fd   :  { %v5532_v25 = vor.u32 %v6548_v8, %v5531_v5  ;;  %v6516_v5 = vld [vmem:[%s10296_s8 + $0x6c] sm:$0xf0] }
 0x1fe   :  { %2336 = vmatpush.msrb.mxu0 %v8674_v14  ;;  %v5468_v14 = vor.u32 %v6532_v61, %v5467_v54  ;;  %v5421_v54 = vld [vmem:[%s10296_s8 + $0x90] sm:$0xf0]  ;;  %v5459_v61 = vld [vmem:[%s10296_s8 + $0xc8] sm:$0xf] }
 0x1ff   :  { %v5424_v60 = vor.u32 %v6518_v53, %v5421_v54  ;;  %v6513_v53 = vld [vmem:[%s10296_s8 + $0x54] sm:$0xf0] }
 0x200   :  { %2337 = vmatpush.msrb.mxu0 %v8701_v23 }
 0x263   :  { %v2089_v37 = vpop.xlane.xlu0 %2088 }
 0x264   :  { %v2090_v40 = vsub.f32 %v8749_v48, %v2089_v37  ;;  %v2091_v57 = vsub.f32 %v8731_v43, %v2089_v37  ;;  %v5520_v43 = vor.u32 %v6542_v34, %v5517_v24  ;;  %v5452_v48 = vor.u32 %v6528_v55, %v5451_v56  ;;  %v6510_v24 = vld [vmem:[%s10296_s8 + $0x44] sm:$0xf]  ;;  %v5427_v56 = vld [vmem:[%s10296_s8 + $0x88] sm:$0xf]  ;;  %v6521_v55 = vld [vmem:[%s10296_s8 + $0x94] sm:$0xf0] }
 0x266   :  { %v2092_v44 = vmul.f32 1.442695, %v2090_v40  ;;  %v2094_v47 = vmul.f32 1.442695, %v2091_v57  ;;  %v6531_v40 = vld [vmem:[%s10296_s8 + $0xec] sm:$0xf] }
 0x267   :  { %v5477_v57 = vld [vmem:[%s10296_s8 + $0xf8] sm:$0xf0] }
 0x268   :  { %6736 = vpow2.f32 %v2092_v44  ;;  %v5419_v44 = vld [vmem:[%s10296_s8 + $0x80] sm:$0xf] }
 0x269   :  { %6738 = vpow2.f32 %v2094_v47  ;;  %v5480_v47 = vor.u32 %v6531_v40, %v5477_v57  ;;  %v5420_v59 = vor.u32 %v6520_v36, %v5419_v44  ;;  %v5395_v36 = vld [vmem:[%s10296_s8 + $0x48] sm:$0xf] }
 0x26a   :  { %v5396_v54 = vor.u32 %v6513_v53, %v5395_v36 }
 0x26b   :  { %v2252_v1 = vpop.xlane.xlu0 %2251 }
 0x26c   :  { %v2253_v2 = vsub.f32 %v8792_v12, %v2252_v1  ;;  %v2254_v4 = vsub.f32 %v8767_v10, %v2252_v1  ;;  %v5435_v10 = vld [vmem:[%s10296_s8 + $0xa0] sm:$0xf]  ;;  %v6534_v12 = vld [vmem:[%s10296_s8 + $0x104] sm:$0xf]  ;;  %v5460_v1 = vor.u32 %v6529_v41, %v5459_v61  ;;  %v5539_v41 = vld [vmem:[%s10296_s8 + $0x168] sm:$0xf] }
 0x26d   :  { %v5436_v45 = vor.u32 %v6524_v39, %v5435_v10  ;;  %v5488_v37 = vor.u32 %v6534_v12, %v5485_v27  ;;  %v2397_v10 = vld [vmem:[%s10296_s8 + $0x188] sm:$0xff]  ;;  %v5355_v12 = vld [vmem:[%s10296_s8] sm:$0xf] }
 0x26e   :  { %v8864_v18 = vpop.eup %6736  ;;  %v2255_v19 = vmul.f32 1.442695, %v2253_v2  ;;  %v2257_v20 = vmul.f32 1.442695, %v2254_v4  ;;  %v5461_v2 = vld [vmem:[%s10296_s8 + $0xd8] sm:$0xf0]  ;;  %v2556_v28 = vunpack.c.l.b16 %v2397_v10 }
 0x26f   :  { %v8868_v23 = vpop.eup %6738  ;;  %2115 = vmatmul.f32.vlgmr.msrb.gmra.mxu2 %v8864_v18  ;;  %2155 = vmatmul.f32.vlgmr.msra.gmra.mxu0 %v8864_v18  ;;  %v5403_v4 = vld [vmem:[%s10296_s8 + $0x60] sm:$0xf]  ;;  %v5464_v8 = vor.u32 %v6527_v63, %v5461_v2  ;;  %v5411_v39 = vld [vmem:[%s10296_s8 + $0x68] sm:$0xf]  ;;  %v6549_v63 = vld [vmem:[%s10296_s8 + $0x174] sm:$0xf0] }
 0x270   :  { %6740 = vpow2.f32 %v2255_v19  ;;  %5349 = vmatmul.msk.f32.vlgmr.msra.gmra.mxu3 %vm2085_vm4, %v8868_v23  ;;  %5350 = vmatmul.msk.f32.vlgmr.msrb.gmra.mxu1 %vm2085_vm4, %v8868_v23  ;;  %v5404_v9 = vor.u32 %v6516_v5, %v5403_v4  ;;  %v5443_v19 = vld [vmem:[%s10296_s8 + $0xa8] sm:$0xf]  ;;  %v5412_v11 = vor.u32 %v6517_v42, %v5411_v39  ;;  %v5540_v2 = vor.u32 %v6549_v63, %v5539_v41  ;;  %v5541_v4 = vld [vmem:[%s10296_s8 + $0x178] sm:$0xf0]  ;;  %v6537_v42 = vld [vmem:[%s10296_s8 + $0x114] sm:$0xf0] }
 0x271   :  { %6742 = vpow2.f32 %v2257_v20  ;;  %2690 = vmatpush.bf16.msra.mxu3 %v2663_v21  ;;  %2716 = vmatpush.bf16.msrb.mxu1 %v2666_v22  ;;  %v6525_v20 = vld [vmem:[%s10296_s8 + $0xb4] sm:$0xf0]  ;;  %v6523_v21 = vld [vmem:[%s10296_s8 + $0xac] sm:$0xf]  ;;  %v5379_v5 = vld [vmem:[%s10296_s8 + $0x28] sm:$0xf] }
 0x272   :  { %2674 = vmatpush.bf16.msrb.mxu2 %v5468_v14  ;;  %2700 = vmatpush.bf16.msra.mxu0 %v5472_v7  ;;  %v5405_v14 = vld [vmem:[%s10296_s8 + $0x70] sm:$0xf0]  ;;  %v5444_v22 = vor.u32 %v6525_v20, %v5443_v19  ;;  %v5523_v19 = vld [vmem:[%s10296_s8 + $0x148] sm:$0xf] }
 0x273   :  { %v5408_v7 = vor.u32 %v6514_v13, %v5405_v14  ;;  %v6507_v14 = vld [vmem:[%s10296_s8 + $0x2c] sm:$0xf]  ;;  %v5491_v39 = vld [vmem:[%s10296_s8 + $0x108] sm:$0xf] }
 0x275   :  { %2691 = vmatpush.bf16.msra.mxu3 %v5532_v25  ;;  %2717 = vmatpush.bf16.msrb.mxu1 %v5536_v26  ;;  %v5445_v25 = vld [vmem:[%s10296_s8 + $0xb8] sm:$0xf0]  ;;  %v5387_v26 = vld [vmem:[%s10296_s8 + $0x40] sm:$0xf] }
 0x276   :  { %v8888_v30 = vpop.eup %6740  ;;  %2675 = vmatpush.bf16.msrb.mxu2 %v5452_v48  ;;  %2701 = vmatpush.bf16.msra.mxu0 %v5456_v31  ;;  %v5448_v33 = vor.u32 %v6523_v21, %v5445_v25  ;;  %v5388_v34 = vor.u32 %v6512_v29, %v5387_v26  ;;  %v5428_v48 = vor.u32 %v6521_v55, %v5427_v56  ;;  %v5371_v31 = vld [vmem:[%s10296_s8 + $0x20] sm:$0xf]  ;;  %v6545_v21 = vld [vmem:[%s10296_s8 + $0x154] sm:$0xf0]  ;;  %v5525_v25 = vld [vmem:[%s10296_s8 + $0x158] sm:$0xf0] }
 0x277   :  { %v8890_v50 = vpop.eup %6742  ;;  %v5372_v32 = vor.u32 %v6508_v38, %v5371_v31  ;;  %v5524_v29 = vor.u32 %v6545_v21, %v5523_v19  ;;  %v5365_v55 = vld [vmem:[%s10296_s8 + $0x18] sm:$0xf0]  ;;  %v6539_v38 = vld [vmem:[%s10296_s8 + $0x12c] sm:$0xf]  ;;  %v5747_v19 = vld [vmem:[%s10298_s10 + $0x188] sm:$0xf] }
 0x278   :  { %2278 = vmatmul.f32.vlgmr.msrb.gmra.mxu3 %v8888_v30  ;;  %5351 = vmatmul.msk.f32.vlgmr.msra.gmra.mxu2 %vm2085_vm4, %v8890_v50  ;;  %v6651_v21 = vld [vmem:[%s10298_s10 + $0x328] sm:$0xf0] }
 0x279   :  { %2318 = vmatmul.f32.vlgmr.msra.gmra.mxu1 %v8888_v30  ;;  %5352 = vmatmul.msk.f32.vlgmr.msrb.gmra.mxu0 %vm2085_vm4, %v8890_v50 }
 0x27a   :  { %2692 = vmatpush.bf16.msra.mxu3 %v5516_v15  ;;  %2718 = vmatpush.bf16.msrb.mxu1 %v5520_v43  ;;  %v5389_v15 = vld [vmem:[%s10296_s8 + $0x50] sm:$0xf0] }
 0x27b   :  { %2676 = vmatpush.bf16.msrb.mxu2 %v5436_v45  ;;  %2702 = vmatpush.bf16.msra.mxu0 %v5440_v46  ;;  %v5392_v43 = vor.u32 %v6510_v24, %v5389_v15  ;;  %v6515_v45 = vld [vmem:[%s10296_s8 + $0x6c] sm:$0xf]  ;;  %v2557_v46 = vunpack.c.h.b16 %v2397_v10  ;;  %v6505_v24 = vld [vmem:[%s10296_s8 + $0x14] sm:$0xf0] }
 0x27c   :  { %v5416_v27 = vor.u32 %v6515_v45, %v5413_v49  ;;  %v6503_v15 = vld [vmem:[%s10296_s8 + $0xc] sm:$0xf] }
 0x27d   :  { %v2609_v40 = vpack.c.b16 %v2557_v46, %v2557_v46  ;;  %v5368_v31 = vor.u32 %v6503_v15, %v5365_v55  ;;  %v6535_v45 = vld [vmem:[%s10296_s8 + $0x10c] sm:$0xf]  ;;  %v5493_v46 = vld [vmem:[%s10296_s8 + $0x118] sm:$0xf0] }
 0x27e   :  { %2693 = vmatpush.bf16.msra.mxu3 %v5500_v0  ;;  %2719 = vmatpush.bf16.msrb.mxu1 %v5504_v6  ;;  %v6506_v0 = vld [vmem:[%s10296_s8 + $0x24] sm:$0xf]  ;;  %v6595_v55 = vld [vmem:[%s10298_s10 + $0x168] sm:$0xf0] }
 0x27f   :  { %2677 = vmatpush.bf16.msrb.mxu2 %v5420_v59  ;;  %2703 = vmatpush.bf16.msra.mxu0 %v5424_v60  ;;  %v5376_v6 = vor.u32 %v6506_v0, %v5373_v3  ;;  %v6511_v59 = vld [vmem:[%s10296_s8 + $0x4c] sm:$0xf]  ;;  %v5397_v60 = vld [vmem:[%s10296_s8 + $0x58] sm:$0xf0] }
 0x280   :  { %v5400_v61 = vor.u32 %v6511_v59, %v5397_v60  ;;  %v5971_v60 = vld [vmem:[%s10298_s10 + $0x348] sm:$0xf] }
 0x282   :  { %2694 = vmatpush.bf16.msra.mxu3 %v5484_v35  ;;  %2720 = vmatpush.bf16.msrb.mxu1 %v5488_v37  ;;  %v6504_v35 = vld [vmem:[%s10296_s8 + $0xc] sm:$0xf0]  ;;  %v5357_v37 = vld [vmem:[%s10296_s8 + $0x10] sm:$0xf0] }
 0x283   :  { %2678 = vmatpush.bf16.msrb.mxu2 %v5404_v9  ;;  %2704 = vmatpush.bf16.msra.mxu0 %v5408_v7  ;;  %v5356_v52 = vor.u32 %v6504_v35, %v5355_v12  ;;  %v5360_v57 = vor.u32 %v6502_v58, %v5357_v37  ;;  %v5381_v7 = vld [vmem:[%s10296_s8 + $0x38] sm:$0xf0] }
 0x284   :  { %v5384_v20 = vor.u32 %v6507_v14, %v5381_v7 }
 0x286   :  { %2726 = vmatpush.bf16.msrb.mxu3 %v5476_v51  ;;  %2752 = vmatpush.bf16.msra.mxu1 %v5480_v47  ;;  %v2608_v51 = vpack.c.b16 %v2556_v28, %v2556_v28  ;;  %v2672_v47 = vsel %vm2661_vm6, %v2609_v40, 0  ;;  %v5492_v28 = vor.u32 %v6537_v42, %v5491_v39  ;;  %v6581_v42 = vld [vmem:[%s10298_s10 + $0xf8] sm:$0xf0] }
 0x287   :  { %2679 = vmatpush.bf16.msrb.mxu2 %v5388_v34  ;;  %2705 = vmatpush.bf16.msra.mxu0 %v5392_v43  ;;  %v5363_v34 = vld [vmem:[%s10296_s8 + $0x8] sm:$0xf] }
 0x288   :  { %v2669_v44 = vsel %vm2661_vm6, %v2608_v51, 0  ;;  %v5364_v56 = vor.u32 %v6505_v24, %v5363_v34  ;;  %v5719_v24 = vld [vmem:[%s10298_s10 + $0x150] sm:$0xf] }
 0x28a   :  { %2727 = vmatpush.bf16.msrb.mxu3 %v5460_v1  ;;  %2753 = vmatpush.bf16.msra.mxu1 %v5464_v8  ;;  %v6547_v1 = vld [vmem:[%s10296_s8 + $0x16c] sm:$0xf]  ;;  %v6509_v8 = vld [vmem:[%s10296_s8 + $0x34] sm:$0xf0] }
 0x28b   :  { %2680 = vmatpush.bf16.msrb.mxu2 %v5372_v32  ;;  %2706 = vmatpush.bf16.msra.mxu0 %v5376_v6  ;;  %v5544_v9 = vor.u32 %v6547_v1, %v5541_v4  ;;  %v5380_v13 = vor.u32 %v6509_v8, %v5379_v5 }
 0x28e   :  { %2728 = vmatpush.bf16.msrb.mxu3 %v5444_v22  ;;  %2754 = vmatpush.bf16.msra.mxu1 %v5448_v33  ;;  %v6543_v22 = vld [vmem:[%s10296_s8 + $0x14c] sm:$0xf] }
 0x28f   :  { %2681 = vmatpush.bf16.msrb.mxu2 %v5356_v52  ;;  %2707 = vmatpush.bf16.msra.mxu0 %v5360_v57  ;;  %v5528_v33 = vor.u32 %v6543_v22, %v5525_v25  ;;  %v5496_v52 = vor.u32 %v6535_v45, %v5493_v46  ;;  %v5859_v45 = vld [vmem:[%s10298_s10 + $0x268] sm:$0xf] }
 0x292   :  { %2729 = vmatpush.bf16.msrb.mxu3 %v5428_v48  ;;  %2755 = vmatpush.bf16.msra.mxu1 %v5432_v62  ;;  %v6541_v48 = vld [vmem:[%s10296_s8 + $0x134] sm:$0xf0]  ;;  %v5509_v62 = vld [vmem:[%s10296_s8 + $0x138] sm:$0xf0] }
 0x293   :  { %2742 = vmatpush.bf16.msra.mxu2 %v2669_v44  ;;  %2768 = vmatpush.bf16.msrb.mxu0 %v2672_v47  ;;  %v5508_v32 = vor.u32 %v6541_v48, %v5507_v16  ;;  %v5512_v0 = vor.u32 %v6539_v38, %v5509_v62  ;;  %v5915_v16 = vld [vmem:[%s10298_s10 + $0x2d8] sm:$0xf]  ;;  %v5887_v38 = vld [vmem:[%s10298_s10 + $0x2a0] sm:$0xf]  ;;  %v6637_v62 = vld [vmem:[%s10298_s10 + $0x2b8] sm:$0xf0] }
 0x294   :  { %v5691_v48 = vld [vmem:[%s10298_s10 + $0x118] sm:$0xf]  ;;  %v5888_v39 = vor.u32 %v6637_v62, %v5887_v38  ;;  %v6585_v38 = vld [vmem:[%s10298_s10 + $0x11c] sm:$0xf] }
 0x295   :  { %v5693_v62 = vld [vmem:[%s10298_s10 + $0x134] sm:$0xf0] }
 0x296   :  { %2730 = vmatpush.bf16.msrb.mxu3 %v5412_v11  ;;  %2756 = vmatpush.bf16.msra.mxu1 %v5416_v27 }
 0x297   :  { %2743 = vmatpush.bf16.msra.mxu2 %v5540_v2  ;;  %2769 = vmatpush.bf16.msrb.mxu0 %v5544_v9 }
 0x29a   :  { %2731 = vmatpush.bf16.msrb.mxu3 %v5396_v54  ;;  %2757 = vmatpush.bf16.msra.mxu1 %v5400_v61  ;;  %v6658_v61 = vld [vmem:[%s10298_s10 + $0x360] sm:$0xf0] }
 0x29b   :  { %2744 = vmatpush.bf16.msra.mxu2 %v5524_v29  ;;  %2770 = vmatpush.bf16.msrb.mxu0 %v5528_v33  ;;  %v5972_v14 = vor.u32 %v6658_v61, %v5971_v60  ;;  %v6553_v60 = vld [vmem:[%s10298_s10 + $0x18] sm:$0xf0]  ;;  %v6655_v61 = vld [vmem:[%s10298_s10 + $0x34c] sm:$0xf] }
 0x29e   :  { %2732 = vmatpush.bf16.msrb.mxu3 %v5380_v13  ;;  %2758 = vmatpush.bf16.msra.mxu1 %v5384_v20  ;;  %v6602_v20 = vld [vmem:[%s10298_s10 + $0x1a0] sm:$0xf0] }
 0x29f   :  { %2745 = vmatpush.bf16.msra.mxu2 %v5508_v32  ;;  %2771 = vmatpush.bf16.msrb.mxu0 %v5512_v0  ;;  %v5748_v34 = vor.u32 %v6602_v20, %v5747_v19  ;;  %v6223_v32 = vld [vmem:[%s10298_s10 + $0x540] sm:$0xf]  ;;  %v6721_v0 = vld [vmem:[%s10298_s10 + $0x558] sm:$0xf0] }
 0x2a0   :  { %v5775_v20 = vld [vmem:[%s10298_s10 + $0x1c0] sm:$0xf] }
 0x2a2   :  { %2733 = vmatpush.bf16.msrb.mxu3 %v5364_v56  ;;  %2759 = vmatpush.bf16.msra.mxu1 %v5368_v31 }
 0x2a3   :  { %2746 = vmatpush.bf16.msra.mxu2 %v5492_v28  ;;  %2772 = vmatpush.bf16.msrb.mxu0 %v5496_v52  ;;  %v6630_v28 = vld [vmem:[%s10298_s10 + $0x280] sm:$0xf0] }
 0x2ec   :  { %v2156_v26 = vpop.f32.mrf.mxu0 }
 0x2ed   :  { %v2176_v43 = vpop.f32.mrf.mxu1 }
 0x2ee   :  { %v2177_v17 = vadd.f32 %v2176_v43, %v2156_v26 }
 0x2f0   :  { %6744 = vrcp.f32 %v2177_v17  ;;  %v2205_v37 = vand.u32 2147483648, %v2177_v17  ;;  %v2203_v40 = vand.u32 2147483647, %v2177_v17  ;;  %vm2199_vm8 = vweird.f32 %v2177_v17 }
 0x2f2   :  { %v2116_v3 = vpop.f32.mrf.mxu2  ;;  %v2206_v59 = vor.u32 1.1754944e-38, %v2205_v37  ;;  %vm2204_vm10 = vcmp.eq.f32.partialorder %v2203_v40, 8.507059e+37  ;;  %v5803_v40 = vld [vmem:[%s10298_s10 + $0x1f8] sm:$0xf] }
 0x2f3   :  { %v2136_v6 = vpop.f32.mrf.mxu3 }
 0x2f4   :  { %v2137_v10 = vadd.f32 %v2136_v6, %v2116_v3  ;;  %v6224_v3 = vor.u32 %v6721_v0, %v6223_v32  ;;  %v6627_v32 = vld [vmem:[%s10298_s10 + $0x26c] sm:$0xf]  ;;  %v5696_v0 = vor.u32 %v6585_v38, %v5693_v62  ;;  %v6001_v38 = vld [vmem:[%s10298_s10 + $0x39c] sm:$0xf0] }
 0x2f6   :  { %v6745_v11 = vpop.eup %6744  ;;  %6746 = vrcp.f32 %v2137_v10  ;;  %v2319_v49 = vpop.f32.mrf.mxu1  ;;  %v2188_v4 = vand.u32 2147483647, %v2137_v10  ;;  %v2190_v5 = vand.u32 2147483648, %v2137_v10  ;;  %vm2184_vm12 = vweird.f32 %v2137_v10 }
 0x2f7   :  { %v2339_v12 = vpop.f32.mrf.mxu0  ;;  %v2195_v35 = vmul.f32 %v6745_v11, %v2177_v17  ;;  %vm2200_vm7 = vweird.f32 %v6745_v11  ;;  %v6588_v17 = vld [vmem:[%s10298_s10 + $0x130] sm:$0xf0] }
 0x2f8   :  { %v2340_v27 = vadd.f32 %v2339_v12, %v2319_v49  ;;  %vm2201_vm9 = vmor %vm2199_vm8, %vm2200_vm7  ;;  %v2191_v25 = vor.u32 1.1754944e-38, %v2190_v5  ;;  %vm2189_vm14 = vcmp.eq.f32.partialorder %v2188_v4, 8.507059e+37  ;;  %v5692_v6 = vor.u32 %v6588_v17, %v5691_v48  ;;  %v6574_v12 = vld [vmem:[%s10298_s10 + $0xc0] sm:$0xf0]  ;;  %v5945_v4 = vld [vmem:[%s10298_s10 + $0x32c] sm:$0xf0] }
 0x2f9   :  { %v2196_v58 = vsub.f32 1.0, %v2195_v35  ;;  %v5860_v49 = vor.u32 %v6630_v28, %v5859_v45  ;;  %v5831_v35 = vld [vmem:[%s10298_s10 + $0x230] sm:$0xf]  ;;  %v6704_v48 = vld [vmem:[%s10298_s10 + $0x4d4] sm:$0xf] }
 0x2fa   :  { %6748 = vrcp.f32 %v2340_v27  ;;  %v6623_v27 = vld [vmem:[%s10298_s10 + $0x248] sm:$0xf0]  ;;  %v6169_v17 = vld [vmem:[%s10298_s10 + $0x4ec] sm:$0xf0]  ;;  %v6141_v28 = vld [vmem:[%s10298_s10 + $0x4b4] sm:$0xf0] }
 0x2fb   :  { %v2197_v51 = vmul.f32 %v6745_v11, %v2196_v58  ;;  %v2279_v57 = vpop.f32.mrf.mxu3  ;;  %v2299_v44 = vpop.f32.mrf.mxu2  ;;  %v5607_v58 = vld [vmem:[%s10298_s10 + $0x70] sm:$0xf]  ;;  %v5832_v37 = vor.u32 %v6623_v27, %v5831_v35  ;;  %v6620_v35 = vld [vmem:[%s10298_s10 + $0x234] sm:$0xf] }
 0x2fc   :  { %v6747_v47 = vpop.eup %6746  ;;  %v2300_v36 = vadd.f32 %v2299_v44, %v2279_v57  ;;  %v6616_v57 = vld [vmem:[%s10298_s10 + $0x210] sm:$0xf0]  ;;  %v5833_v27 = vld [vmem:[%s10298_s10 + $0x24c] sm:$0xf0] }
 0x2fd   :  { %v2198_v53 = vadd.f32 %v6745_v11, %v2197_v51  ;;  %v2180_v54 = vmul.f32 %v6747_v47, %v2137_v10  ;;  %vm2185_vm11 = vweird.f32 %v6747_v47  ;;  %v5663_v10 = vld [vmem:[%s10298_s10 + $0xe0] sm:$0xf]  ;;  %v6567_v51 = vld [vmem:[%s10298_s10 + $0x88] sm:$0xf0] }
 0x2fe   :  { %6750 = vrcp.f32 %v2300_v36  ;;  %vm2186_vm13 = vmor %vm2184_vm12, %vm2185_vm11  ;;  %v5664_v46 = vor.u32 %v6581_v42, %v5663_v10  ;;  %v5608_v44 = vor.u32 %v6567_v51, %v5607_v58  ;;  %v5579_v36 = vld [vmem:[%s10298_s10 + $0x38] sm:$0xf]  ;;  %v6697_v42 = vld [vmem:[%s10298_s10 + $0x49c] sm:$0xf] }
 0x2ff   :  { %v2202_v63 = vsel %vm2201_vm9, %v6745_v11, %v2198_v53  ;;  %v2181_v1 = vsub.f32 1.0, %v2180_v54  ;;  %v5635_v11 = vld [vmem:[%s10298_s10 + $0xa8] sm:$0xf]  ;;  %v6560_v53 = vld [vmem:[%s10298_s10 + $0x50] sm:$0xf0] }
 0x300   :  { %v6749_v41 = vpop.eup %6748  ;;  %v2207_v2 = vsel %vm2204_vm10, %v2206_v59, %v2202_v63  ;;  %v5636_v52 = vor.u32 %v6574_v12, %v5635_v11  ;;  %v5580_v54 = vor.u32 %v6560_v53, %v5579_v36  ;;  %v5551_v59 = vld [vmem:[%s10298_s10] sm:$0xf]  ;;  %v6139_v10 = vld [vmem:[%s10298_s10 + $0x498] sm:$0xf]  ;;  %v6690_v51 = vld [vmem:[%s10298_s10 + $0x464] sm:$0xf] }
 0x301   :  { %v2345_v8 = vmul.f32 %v6749_v41, %v8890_v50  ;;  %v2208_v9 = vmul.f32 %v8868_v23, %v2207_v2  ;;  %v2182_v13 = vmul.f32 %v6747_v47, %v2181_v1  ;;  %v5943_v23 = vld [vmem:[%s10298_s10 + $0x310] sm:$0xf]  ;;  %v5973_v41 = vld [vmem:[%s10298_s10 + $0x364] sm:$0xf0]  ;;  %v5552_v63 = vor.u32 %v6553_v60, %v5551_v59  ;;  %v6648_v2 = vld [vmem:[%s10298_s10 + $0x314] sm:$0xf] }
 0x302   :  { %v5944_v15 = vor.u32 %v6651_v21, %v5943_v23  ;;  %v5976_v1 = vor.u32 %v6655_v61, %v5973_v41  ;;  %v5948_v5 = vor.u32 %v6648_v2, %v5945_v4  ;;  %v6195_v21 = vld [vmem:[%s10298_s10 + $0x508] sm:$0xf]  ;;  %v5665_v11 = vld [vmem:[%s10298_s10 + $0xfc] sm:$0xf0]  ;;  %v5805_v59 = vld [vmem:[%s10298_s10 + $0x214] sm:$0xf0] }
 0x303   :  { %v9163_v7 = vpack.c.bf16 %v2345_v8, %v2345_v8  ;;  %2210 = vst.msk [vmem:[%s10301_s13 + $0x8] sm:$0xff] %vm2085_vm4, %v2208_v9  ;;  %v2183_v50 = vadd.f32 %v6747_v47, %v2182_v13  ;;  %v6599_v8 = vld [vmem:[%s10298_s10 + $0x18c] sm:$0xf]  ;;  %v5749_v9 = vld [vmem:[%s10298_s10 + $0x1a4] sm:$0xf0] }
 0x304   :  { %v6751_v22 = vpop.eup %6750  ;;  %v6641_v13 = vld [vmem:[%s10298_s10 + $0x2dc] sm:$0xf]  ;;  %v6111_v58 = vld [vmem:[%s10298_s10 + $0x460] sm:$0xf]  ;;  %v6083_v61 = vld [vmem:[%s10298_s10 + $0x428] sm:$0xf] }
 0x305   :  { %5545 = vmatmul.msk.bf16.vlgmr.msra.gmra.mxu3 %vm2085_vm4, %v9163_v7  ;;  %5546 = vmatmul.msk.bf16.vlgmr.msrb.gmra.mxu1 %vm2085_vm4, %v9163_v7  ;;  %v2187_v26 = vsel %vm2186_vm13, %v6747_v47, %v2183_v50  ;;  %v2344_v29 = vmul.f32 %v6751_v22, %v8888_v30  ;;  %v6644_v30 = vld [vmem:[%s10298_s10 + $0x2f0] sm:$0xf0]  ;;  %v5804_v47 = vor.u32 %v6616_v57, %v5803_v40  ;;  %v6609_v50 = vld [vmem:[%s10298_s10 + $0x1d8] sm:$0xf0]  ;;  %v6714_v22 = vld [vmem:[%s10298_s10 + $0x520] sm:$0xf0] }
 0x306   :  { %3918 = vmatpush.bf16.msra.mxu3 %v5972_v14  ;;  %v2192_v33 = vsel %vm2189_vm14, %v2191_v25, %v2187_v26  ;;  %v5916_v31 = vor.u32 %v6644_v30, %v5915_v16  ;;  %3951 = vmatpush.bf16.msrb.mxu1 %v6224_v3  ;;  %v5752_v14 = vor.u32 %v6599_v8, %v5749_v9  ;;  %v6711_v25 = vld [vmem:[%s10298_s10 + $0x50c] sm:$0xf]  ;;  %v6167_v16 = vld [vmem:[%s10298_s10 + $0x4d0] sm:$0xf]  ;;  %v5861_v3 = vld [vmem:[%s10298_s10 + $0x284] sm:$0xf0] }
 0x307   :  { %v2193_v43 = vmul.f32 %v8864_v18, %v2192_v33  ;;  %v2346_v56 = vpack.c.bf16 %v2344_v29, %v2344_v29  ;;  %v5720_v18 = vor.u32 %v6595_v55, %v5719_v24  ;;  %v5776_v23 = vor.u32 %v6609_v50, %v5775_v20  ;;  %v6197_v29 = vld [vmem:[%s10298_s10 + $0x524] sm:$0xf0]  ;;  %v6592_v33 = vld [vmem:[%s10298_s10 + $0x154] sm:$0xf]  ;;  %v6707_v30 = vld [vmem:[%s10298_s10 + $0x4e8] sm:$0xf0] }
 0x308   :  { %v6196_v26 = vor.u32 %v6714_v22, %v6195_v21  ;;  %v6200_v24 = vor.u32 %v6711_v25, %v6197_v29  ;;  %v6113_v57 = vld [vmem:[%s10298_s10 + $0x47c] sm:$0xf0]  ;;  %v6686_v41 = vld [vmem:[%s10298_s10 + $0x440] sm:$0xf0]  ;;  %v6085_v2 = vld [vmem:[%s10298_s10 + $0x444] sm:$0xf0] }
 0x309   :  { %2209 = vst [vmem:[%s10301_s13] sm:$0xff] %v2193_v43  ;;  %2682 = vmatmul.bf16.vlgmr.msrb.gmra.mxu2 %v2346_v56  ;;  %2708 = vmatmul.bf16.vlgmr.msra.gmra.mxu0 %v2346_v56  ;;  %v6634_v43 = vld [vmem:[%s10298_s10 + $0x2a4] sm:$0xf]  ;;  %v6116_v36 = vor.u32 %v6690_v51, %v6113_v57  ;;  %v6564_v4 = vld [vmem:[%s10298_s10 + $0x74] sm:$0xf]  ;;  %v6679_v20 = vld [vmem:[%s10298_s10 + $0x408] sm:$0xf0] }
 0x30a   :  { %3905 = vmatpush.bf16.msrb.mxu2 %v5748_v34  ;;  %3919 = vmatpush.bf16.msra.mxu3 %v5944_v15  ;;  %v5721_v34 = vld [vmem:[%s10298_s10 + $0x16c] sm:$0xf0]  ;;  %v6676_v50 = vld [vmem:[%s10298_s10 + $0x3f4] sm:$0xf]  ;;  %v6557_v22 = vld [vmem:[%s10298_s10 + $0x3c] sm:$0xf] }
 0x30b   :  { %v5724_v15 = vor.u32 %v6592_v33, %v5721_v34  ;;  %3931 = vmatpush.bf16.msra.mxu0 %v6196_v26  ;;  %v6057_v21 = vld [vmem:[%s10298_s10 + $0x40c] sm:$0xf0]  ;;  %v5581_v26 = vld [vmem:[%s10298_s10 + $0x54] sm:$0xf0]  ;;  %v6672_v34 = vld [vmem:[%s10298_s10 + $0x3d0] sm:$0xf0] }
 0x30c   :  { %v6060_v25 = vor.u32 %v6676_v50, %v6057_v21  ;;  %v5584_v29 = vor.u32 %v6557_v22, %v5581_v26  ;;  %v6027_v33 = vld [vmem:[%s10298_s10 + $0x3b8] sm:$0xf] }
 0x30e   :  { %3906 = vmatpush.bf16.msrb.mxu2 %v5720_v18  ;;  %3920 = vmatpush.bf16.msra.mxu3 %v5916_v31  ;;  %v6168_v18 = vor.u32 %v6707_v30, %v6167_v16  ;;  %v6172_v31 = vor.u32 %v6704_v48, %v6169_v17  ;;  %v6665_v48 = vld [vmem:[%s10298_s10 + $0x398] sm:$0xf0]  ;;  %v6662_v17 = vld [vmem:[%s10298_s10 + $0x384] sm:$0xf] }
 0x30f   :  { %v6004_v62 = vor.u32 %v6662_v17, %v6001_v38  ;;  %v6645_v38 = vld [vmem:[%s10298_s10 + $0x2f8] sm:$0xf0] }
 0x310   :  { %3932 = vmatpush.bf16.msra.mxu0 %v6168_v18  ;;  %v5999_v18 = vld [vmem:[%s10298_s10 + $0x380] sm:$0xf] }
 0x312   :  { %3907 = vmatpush.bf16.msrb.mxu2 %v5692_v6  ;;  %3921 = vmatpush.bf16.msra.mxu3 %v5888_v39  ;;  %v5864_v6 = vor.u32 %v6627_v32, %v5861_v3  ;;  %v6700_v39 = vld [vmem:[%s10298_s10 + $0x4b0] sm:$0xf0]  ;;  %v2398_v32 = vld [vmem:[%s10297_s9] sm:$0xf]  ;;  %s4346_s9 = sshll.u32 %s10300_s12, 4  ;;  %s4347_s9 = int_to_ptr.hbm [resolvable:$true] %s4346_s9 }
 0x313   :  { %v6140_v45 = vor.u32 %v6700_v39, %v6139_v10  ;;  %v6225_v3 = vld [vmem:[%s10298_s10 + $0x55c] sm:$0xf0]  ;;  %v2401_v39 = vperm.slane %v2398_v32, 1 }
 0x315   :  { %2734 = vmatmul.bf16.vlgmr.msrb.gmra.mxu3 %v2346_v56  ;;  %2760 = vmatmul.bf16.vlgmr.msra.gmra.mxu1 %v2346_v56  ;;  %v5889_v56 = vld [vmem:[%s10298_s10 + $0x2bc] sm:$0xf0] }
 0x316   :  { %3908 = vmatpush.bf16.msrb.mxu2 %v5664_v46  ;;  %3922 = vmatpush.bf16.msra.mxu3 %v5860_v49  ;;  %v5892_v55 = vor.u32 %v6634_v43, %v5889_v56  ;;  %v6578_v46 = vld [vmem:[%s10298_s10 + $0xe4] sm:$0xf]  ;;  %v6144_v49 = vor.u32 %v6697_v42, %v6141_v28  ;;  %v6029_v43 = vld [vmem:[%s10298_s10 + $0x3d4] sm:$0xf0] }
 0x317   :  { %3957 = vmatpush.bf16.msra.mxu1 %v5752_v14  ;;  %v5668_v12 = vor.u32 %v6578_v46, %v5665_v11  ;;  %3933 = vmatpush.bf16.msra.mxu0 %v6140_v45  ;;  %v5777_v14 = vld [vmem:[%s10298_s10 + $0x1dc] sm:$0xf0]  ;;  %v6550_v56 = vld [vmem:[%s10298_s10 + $0x4] sm:$0xf] }
 0x319   :  { %5547 = vmatmul.msk.bf16.vlgmr.msra.gmra.mxu2 %vm2085_vm4, %v9163_v7  ;;  %5548 = vmatmul.msk.bf16.vlgmr.msrb.gmra.mxu0 %vm2085_vm4, %v9163_v7  ;;  %v5917_v7 = vld [vmem:[%s10298_s10 + $0x2f4] sm:$0xf0] }
 0x31a   :  { %3909 = vmatpush.bf16.msrb.mxu2 %v5636_v52  ;;  %3923 = vmatpush.bf16.msra.mxu3 %v5832_v37  ;;  %v5920_v19 = vor.u32 %v6641_v13, %v5917_v7  ;;  %v5836_v52 = vor.u32 %v6620_v35, %v5833_v27  ;;  %v6693_v37 = vld [vmem:[%s10298_s10 + $0x478] sm:$0xf0]  ;;  %v6606_v13 = vld [vmem:[%s10298_s10 + $0x1c4] sm:$0xf] }
 0x31b   :  { %3958 = vmatpush.bf16.msra.mxu1 %v5724_v15  ;;  %v6112_v40 = vor.u32 %v6693_v37, %v6111_v58  ;;  %v5780_v7 = vor.u32 %v6606_v13, %v5777_v14  ;;  %v6028_v15 = vor.u32 %v6672_v34, %v6027_v33  ;;  %v6722_v35 = vld [vmem:[%s10298_s10 + $0x560] sm:$0xf0]  ;;  %v6652_v33 = vld [vmem:[%s10298_s10 + $0x330] sm:$0xf0]  ;;  %v6119_v34 = vld [vmem:[%s10298_s10 + $0x468] sm:$0xf] }
 0x31d   :  { %3934 = vmatpush.bf16.msra.mxu0 %v6112_v40 }
 0x31e   :  { %3910 = vmatpush.bf16.msrb.mxu2 %v5608_v44  ;;  %3924 = vmatpush.bf16.msra.mxu3 %v5804_v47  ;;  %v6571_v44 = vld [vmem:[%s10298_s10 + $0xac] sm:$0xf]  ;;  %v5637_v47 = vld [vmem:[%s10298_s10 + $0xc4] sm:$0xf0] }
 0x31f   :  { %3959 = vmatpush.bf16.msra.mxu1 %v5696_v0  ;;  %v5640_v53 = vor.u32 %v6571_v44, %v5637_v47  ;;  %v6718_v0 = vld [vmem:[%s10298_s10 + $0x544] sm:$0xf]  ;;  %v6203_v47 = vld [vmem:[%s10298_s10 + $0x510] sm:$0xf] }
 0x320   :  { %v6228_v10 = vor.u32 %v6718_v0, %v6225_v3  ;;  %v6091_v0 = vld [vmem:[%s10298_s10 + $0x430] sm:$0xf]  ;;  %v6687_v3 = vld [vmem:[%s10298_s10 + $0x448] sm:$0xf0] }
 0x322   :  { %3911 = vmatpush.bf16.msrb.mxu2 %v5580_v54  ;;  %3925 = vmatpush.bf16.msra.mxu3 %v5776_v23  ;;  %v6613_v54 = vld [vmem:[%s10298_s10 + $0x1fc] sm:$0xf] }
 0x323   :  { %3960 = vmatpush.bf16.msra.mxu1 %v5668_v12  ;;  %v5808_v60 = vor.u32 %v6613_v54, %v5805_v59  ;;  %v6231_v12 = vld [vmem:[%s10298_s10 + $0x548] sm:$0xf]  ;;  %v2403_v54 = vperm.slane %v2398_v32, 3 }
 0x324   :  { %v6232_v58 = vor.u32 %v6722_v35, %v6231_v12  ;;  %v5895_v12 = vld [vmem:[%s10298_s10 + $0x2a8] sm:$0xf]  ;;  %v6638_v35 = vld [vmem:[%s10298_s10 + $0x2c0] sm:$0xf0] }
 0x326   :  { %3912 = vmatpush.bf16.msrb.mxu2 %v5552_v63  ;;  %3983 = vmatpush.bf16.msrb.mxu3 %v6200_v24  ;;  %v6683_v63 = vld [vmem:[%s10298_s10 + $0x42c] sm:$0xf]  ;;  %v6669_v24 = vld [vmem:[%s10298_s10 + $0x3bc] sm:$0xf] }
 0x327   :  { %3961 = vmatpush.bf16.msra.mxu1 %v5640_v53  ;;  %v6088_v8 = vor.u32 %v6683_v63, %v6085_v2  ;;  %v6032_v16 = vor.u32 %v6669_v24, %v6029_v43  ;;  %v6708_v63 = vld [vmem:[%s10298_s10 + $0x4f0] sm:$0xf0]  ;;  %v6694_v24 = vld [vmem:[%s10298_s10 + $0x480] sm:$0xf0]  ;;  %v5755_v43 = vld [vmem:[%s10298_s10 + $0x190] sm:$0xf] }
 0x328   :  { %v6120_v17 = vor.u32 %v6694_v24, %v6119_v34 }
 0x32a   :  { %3970 = vmatpush.bf16.msra.mxu2 %v5976_v1  ;;  %3984 = vmatpush.bf16.msrb.mxu3 %v6172_v31  ;;  %v6084_v1 = vor.u32 %v6686_v41, %v6083_v61  ;;  %v6000_v31 = vor.u32 %v6665_v48, %v5999_v18  ;;  %v6175_v41 = vld [vmem:[%s10298_s10 + $0x4d8] sm:$0xf] }
 0x32c   :  { %3935 = vmatpush.bf16.msra.mxu0 %v6084_v1 }
 0x32e   :  { %3971 = vmatpush.bf16.msra.mxu2 %v5948_v5  ;;  %3985 = vmatpush.bf16.msrb.mxu3 %v6144_v49  ;;  %v5609_v5 = vld [vmem:[%s10298_s10 + $0x8c] sm:$0xf0]  ;;  %v2400_v49 = vperm.slane %v2398_v32, 0 }
 0x32f   :  { %v5612_v9 = vor.u32 %v6564_v4, %v5609_v5  ;;  %v2402_v4 = vperm.slane %v2398_v32, 2 }
 0x331   :  { %3962 = vmatpush.bf16.msra.mxu1 %v5612_v9  ;;  %v5979_v9 = vld [vmem:[%s10298_s10 + $0x350] sm:$0xf] }
 0x332   :  { %3972 = vmatpush.bf16.msra.mxu2 %v5920_v19  ;;  %3986 = vmatpush.bf16.msrb.mxu3 %v6116_v36  ;;  %v6055_v19 = vld [vmem:[%s10298_s10 + $0x3f0] sm:$0xf]  ;;  %v6715_v36 = vld [vmem:[%s10298_s10 + $0x528] sm:$0xf0] }
 0x333   :  { %v6056_v23 = vor.u32 %v6679_v20, %v6055_v19  ;;  %v6147_v19 = vld [vmem:[%s10298_s10 + $0x4a0] sm:$0xf]  ;;  %v6701_v20 = vld [vmem:[%s10298_s10 + $0x4b8] sm:$0xf0] }
 0x334   :  { %v6148_v22 = vor.u32 %v6701_v20, %v6147_v19  ;;  %v6624_v19 = vld [vmem:[%s10298_s10 + $0x250] sm:$0xf0]  ;;  %v6007_v20 = vld [vmem:[%s10298_s10 + $0x388] sm:$0xf] }
 0x335   :  { %3936 = vmatpush.bf16.msra.mxu0 %v6056_v23  ;;  %3963 = vmatpush.bf16.msra.mxu1 %v5584_v29 }
 0x336   :  { %3973 = vmatpush.bf16.msra.mxu2 %v5892_v55  ;;  %3987 = vmatpush.bf16.msrb.mxu3 %v6088_v8  ;;  %v5553_v55 = vld [vmem:[%s10298_s10 + $0x1c] sm:$0xf0]  ;;  %v6176_v8 = vor.u32 %v6708_v63, %v6175_v41  ;;  %v6673_v63 = vld [vmem:[%s10298_s10 + $0x3d8] sm:$0xf0] }
 0x337   :  { %v5556_v30 = vor.u32 %v6550_v56, %v5553_v55  ;;  %v6603_v55 = vld [vmem:[%s10298_s10 + $0x1a8] sm:$0xf0]  ;;  %v6035_v41 = vld [vmem:[%s10298_s10 + $0x3c0] sm:$0xf] }
 0x339   :  { %3937 = vmatpush.bf16.msra.mxu0 %v6028_v15  ;;  %3964 = vmatpush.bf16.msra.mxu1 %v5556_v30  ;;  %v5757_v30 = vld [vmem:[%s10298_s10 + $0x1ac] sm:$0xf0] }
 0x33a   :  { %3974 = vmatpush.bf16.msra.mxu2 %v5864_v6  ;;  %3988 = vmatpush.bf16.msrb.mxu3 %v6060_v25  ;;  %v5951_v25 = vld [vmem:[%s10298_s10 + $0x318] sm:$0xf] }
 0x33b   :  { %v5952_v48 = vor.u32 %v6652_v33, %v5951_v25  ;;  %v6575_v25 = vld [vmem:[%s10298_s10 + $0xc8] sm:$0xf0]  ;;  %v5645_v33 = vld [vmem:[%s10298_s10 + $0xcc] sm:$0xf0] }
 0x33d   :  { %3938 = vmatpush.bf16.msra.mxu0 %v6000_v31  ;;  %v5923_v31 = vld [vmem:[%s10298_s10 + $0x2e0] sm:$0xf] }
 0x33e   :  { %3975 = vmatpush.bf16.msra.mxu2 %v5836_v52  ;;  %3989 = vmatpush.bf16.msrb.mxu3 %v6032_v16  ;;  %v6600_v16 = vld [vmem:[%s10298_s10 + $0x194] sm:$0xf] }
 0x341   :  { %4003 = vmatpush.bf16.msrb.mxu0 %v6228_v10  ;;  %v5760_v10 = vor.u32 %v6600_v16, %v5757_v30 }
 0x342   :  { %3976 = vmatpush.bf16.msra.mxu2 %v5808_v60  ;;  %3990 = vmatpush.bf16.msrb.mxu3 %v6004_v62  ;;  %v6204_v60 = vor.u32 %v6715_v36, %v6203_v47  ;;  %v6586_v47 = vld [vmem:[%s10298_s10 + $0x124] sm:$0xf]  ;;  %v5701_v36 = vld [vmem:[%s10298_s10 + $0x13c] sm:$0xf0] }
 0x346   :  { %3977 = vmatpush.bf16.msra.mxu2 %v5780_v7  ;;  %v6659_v7 = vld [vmem:[%s10298_s10 + $0x368] sm:$0xf0] }
 0x347   :  { %v5980_v21 = vor.u32 %v6659_v7, %v5979_v9  ;;  %v5673_v9 = vld [vmem:[%s10298_s10 + $0x104] sm:$0xf0]  ;;  %v5839_v7 = vld [vmem:[%s10298_s10 + $0x238] sm:$0xf] }
 0x348   :  { %v5840_v34 = vor.u32 %v6624_v19, %v5839_v7  ;;  %v6583_v19 = vld [vmem:[%s10298_s10 + $0x108] sm:$0xf0] }
 0x382   :  { %v2722_v6 = vpop.f32.mrf.mxu1 }
 0x386   :  { %v2709_v42 = vpop.f32.mrf.mxu0 }
 0x387   :  { %v2710_v28 = vadd.f32 %v2709_v42, %v2401_v39  ;;  %v5727_v39 = vld [vmem:[%s10298_s10 + $0x158] sm:$0xf] }
 0x388   :  { %v2696_v45 = vpop.f32.mrf.mxu3 }
 0x389   :  { %v2723_v46 = vadd.f32 %v2722_v6, %v2710_v28  ;;  %v5756_v6 = vor.u32 %v6603_v55, %v5755_v43  ;;  %v6593_v28 = vld [vmem:[%s10298_s10 + $0x15c] sm:$0xf]  ;;  %v6233_v43 = vld [vmem:[%s10298_s10 + $0x564] sm:$0xf0] }
 0x38a   :  { %v2724_v11 = vpop.f32.mrf.mxu1  ;;  %v6617_v55 = vld [vmem:[%s10298_s10 + $0x218] sm:$0xf0] }
 0x38b   :  { %v2779_v27 = vmax.f32 %v2723_v46, 0.0  ;;  %v5729_v46 = vld [vmem:[%s10298_s10 + $0x174] sm:$0xf0]  ;;  %v5924_v11 = vor.u32 %v6645_v38, %v5923_v31  ;;  %v6568_v38 = vld [vmem:[%s10298_s10 + $0x90] sm:$0xf0] }
 0x38c   :  { %v2683_v52 = vpop.f32.mrf.mxu2 }
 0x38d   :  { %v9485_v37 = vpack.c.bf16 %v2779_v27, %v2779_v27  ;;  %v2684_v51 = vadd.f32 %v2683_v52, %v2400_v49  ;;  %v6092_v49 = vor.u32 %v6687_v3, %v6091_v0  ;;  %v6063_v27 = vld [vmem:[%s10298_s10 + $0x3f8] sm:$0xf]  ;;  %v6680_v52 = vld [vmem:[%s10298_s10 + $0x410] sm:$0xf0]  ;;  %v5783_v3 = vld [vmem:[%s10298_s10 + $0x1c8] sm:$0xf] }
 0x38e   :  { %v2711_v40 = vpop.f32.mrf.mxu0 }
 0x38f   :  { %v2697_v57 = vadd.f32 %v2696_v45, %v2684_v51  ;;  %3926 = vmatmul.bf16.vlgmr.msra.gmra.mxu3 %v9485_v37  ;;  %v6596_v45 = vld [vmem:[%s10298_s10 + $0x170] sm:$0xf0]  ;;  %v5732_v40 = vor.u32 %v6593_v28, %v5729_v46 }
 0x390   :  { %v2698_v44 = vpop.f32.mrf.mxu3  ;;  %4055 = vmatpush.bf16.msra.mxu3 %v6232_v58  ;;  %v5728_v51 = vor.u32 %v6596_v45, %v5727_v39  ;;  %v5735_v39 = vld [vmem:[%s10298_s10 + $0x160] sm:$0xf]  ;;  %v6597_v45 = vld [vmem:[%s10298_s10 + $0x178] sm:$0xf0] }
 0x391   :  { %v2778_v53 = vmax.f32 %v2697_v57, 0.0  ;;  %v5699_v57 = vld [vmem:[%s10298_s10 + $0x120] sm:$0xf]  ;;  %v6589_v44 = vld [vmem:[%s10298_s10 + $0x138] sm:$0xf0] }
 0x392   :  { %v2761_v59 = vpop.f32.mrf.mxu1 }
 0x393   :  { %v9494_v61 = vpack.c.bf16 %v2778_v53, %v2778_v53  ;;  %v2762_v2 = vadd.f32 %v2761_v59, %v2403_v54  ;;  %v5896_v53 = vor.u32 %v6638_v35, %v5895_v12  ;;  %v6064_v54 = vor.u32 %v6680_v52, %v6063_v27  ;;  %v5867_v59 = vld [vmem:[%s10298_s10 + $0x270] sm:$0xf]  ;;  %v5587_v12 = vld [vmem:[%s10298_s10 + $0x40] sm:$0xf]  ;;  %v6561_v35 = vld [vmem:[%s10298_s10 + $0x58] sm:$0xf0] }
 0x394   :  { %v2685_v1 = vpop.f32.mrf.mxu2  ;;  %v6558_v27 = vld [vmem:[%s10298_s10 + $0x44] sm:$0xf]  ;;  %v5589_v52 = vld [vmem:[%s10298_s10 + $0x5c] sm:$0xf0] }
 0x395   :  { %3913 = vmatmul.bf16.vlgmr.msrb.gmra.mxu2 %v9494_v61  ;;  %v5700_v1 = vor.u32 %v6589_v44, %v5699_v57  ;;  %v5707_v57 = vld [vmem:[%s10298_s10 + $0x128] sm:$0xf]  ;;  %v6590_v44 = vld [vmem:[%s10298_s10 + $0x140] sm:$0xf0] }
 0x396   :  { %4035 = vmatpush.bf16.msrb.mxu2 %v6204_v60  ;;  %v2774_v5 = vpop.f32.mrf.mxu0  ;;  %v6631_v60 = vld [vmem:[%s10298_s10 + $0x288] sm:$0xf0] }
 0x397   :  { %v2775_v14 = vadd.f32 %v2774_v5, %v2762_v2  ;;  %v5704_v2 = vor.u32 %v6586_v47, %v5701_v36  ;;  %v6582_v5 = vld [vmem:[%s10298_s10 + $0x100] sm:$0xf0]  ;;  %v6705_v47 = vld [vmem:[%s10298_s10 + $0x4dc] sm:$0xf]  ;;  %v5588_v36 = vor.u32 %v6561_v35, %v5587_v12  ;;  %v5595_v35 = vld [vmem:[%s10298_s10 + $0x48] sm:$0xf] }
 0x398   :  { %v2735_v13 = vpop.f32.mrf.mxu3 }
 0x399   :  { %v2781_v50 = vmax.f32 %v2775_v14, 0.0  ;;  %v2736_v26 = vadd.f32 %v2735_v13, %v2402_v4  ;;  %v5671_v4 = vld [vmem:[%s10298_s10 + $0xe8] sm:$0xf]  ;;  %v5868_v13 = vor.u32 %v6631_v60, %v5867_v59  ;;  %v6036_v14 = vor.u32 %v6673_v63, %v6035_v41  ;;  %v6554_v60 = vld [vmem:[%s10298_s10 + $0x20] sm:$0xf0] }
 0x39a   :  { %v2763_v23 = vpop.f32.mrf.mxu1  ;;  %4036 = vmatpush.bf16.msrb.mxu2 %v6176_v8  ;;  %v6579_v8 = vld [vmem:[%s10298_s10 + $0xec] sm:$0xf]  ;;  %v5559_v59 = vld [vmem:[%s10298_s10 + $0x8] sm:$0xf] }
 0x39b   :  { %v9518_v29 = vpack.c.bf16 %v2781_v50, %v2781_v50  ;;  %v6666_v50 = vld [vmem:[%s10298_s10 + $0x3a0] sm:$0xf0]  ;;  %v5672_v23 = vor.u32 %v6582_v5, %v5671_v4  ;;  %v6551_v41 = vld [vmem:[%s10298_s10 + $0xc] sm:$0xf]  ;;  %v5561_v63 = vld [vmem:[%s10298_s10 + $0x24] sm:$0xf0] }
 0x39c   :  { %v2748_v15 = vpop.f32.mrf.mxu2  ;;  %v6008_v24 = vor.u32 %v6666_v50, %v6007_v20  ;;  %v5987_v4 = vld [vmem:[%s10298_s10 + $0x358] sm:$0xf]  ;;  %v6660_v5 = vld [vmem:[%s10298_s10 + $0x370] sm:$0xf0]  ;;  %v5564_v7 = vor.u32 %v6551_v41, %v5561_v63  ;;  %v6698_v20 = vld [vmem:[%s10298_s10 + $0x4a4] sm:$0xf] }
 0x39d   :  { %v2749_v56 = vadd.f32 %v2748_v15, %v2736_v26  ;;  %6249 = vmatmul.msk.bf16.vlgmr.msrb.gmra.mxu1 %vm1246_vm0, %v9518_v29  ;;  %v6572_v26 = vld [vmem:[%s10298_s10 + $0xb4] sm:$0xf]  ;;  %v6719_v15 = vld [vmem:[%s10298_s10 + $0x54c] sm:$0xf]  ;;  %v6149_v50 = vld [vmem:[%s10298_s10 + $0x4bc] sm:$0xf0] }
 0x39e   :  { %4022 = vmatpush.bf16.msrb.mxu1 %v5980_v21  ;;  %4037 = vmatpush.bf16.msrb.mxu2 %v6148_v22  ;;  %v2776_v18 = vpop.f32.mrf.mxu0  ;;  %v5676_v21 = vor.u32 %v6579_v8, %v5673_v9  ;;  %v5643_v22 = vld [vmem:[%s10298_s10 + $0xb0] sm:$0xf]  ;;  %v5648_v30 = vor.u32 %v6572_v26, %v5645_v33  ;;  %v6236_v31 = vor.u32 %v6719_v15, %v6233_v43  ;;  %v5959_v26 = vld [vmem:[%s10298_s10 + $0x320] sm:$0xf]  ;;  %v6653_v33 = vld [vmem:[%s10298_s10 + $0x338] sm:$0xf0] }
 0x39f   :  { %v2780_v62 = vmax.f32 %v2749_v56, 0.0  ;;  %v5811_v56 = vld [vmem:[%s10298_s10 + $0x200] sm:$0xf]  ;;  %v5644_v16 = vor.u32 %v6575_v25, %v5643_v22  ;;  %v5763_v18 = vld [vmem:[%s10298_s10 + $0x198] sm:$0xf]  ;;  %v5708_v8 = vor.u32 %v6590_v44, %v5707_v57 }
 0x3a0   :  { %v2737_v32 = vpop.f32.mrf.mxu3  ;;  %v5812_v0 = vor.u32 %v6617_v55, %v5811_v56  ;;  %v6649_v22 = vld [vmem:[%s10298_s10 + $0x31c] sm:$0xf]  ;;  %v5953_v25 = vld [vmem:[%s10298_s10 + $0x334] sm:$0xf0]  ;;  %v6576_v43 = vld [vmem:[%s10298_s10 + $0xd0] sm:$0xf0] }
 0x3a1   :  { %v9558_v42 = vpack.c.bf16 %v2780_v62, %v2780_v62  ;;  %v6565_v62 = vld [vmem:[%s10298_s10 + $0x7c] sm:$0xf]  ;;  %v5617_v32 = vld [vmem:[%s10298_s10 + $0x94] sm:$0xf0]  ;;  %v6691_v56 = vld [vmem:[%s10298_s10 + $0x46c] sm:$0xf] }
 0x3a2   :  { %4023 = vmatpush.bf16.msrb.mxu1 %v5952_v48  ;;  %4038 = vmatpush.bf16.msrb.mxu2 %v6120_v17  ;;  %v6604_v48 = vld [vmem:[%s10298_s10 + $0x1b0] sm:$0xf0]  ;;  %v5615_v17 = vld [vmem:[%s10298_s10 + $0x78] sm:$0xf]  ;;  %v5620_v46 = vor.u32 %v6565_v62, %v5617_v32  ;;  %v6121_v55 = vld [vmem:[%s10298_s10 + $0x484] sm:$0xf0] }
 0x3a3   :  { %3939 = vmatmul.bf16.vlgmr.msra.gmra.mxu0 %v9558_v42  ;;  %3991 = vmatmul.bf16.vlgmr.msrb.gmra.mxu3 %v9558_v42  ;;  %v5616_v28 = vor.u32 %v6568_v38, %v5615_v17  ;;  %v5651_v15 = vld [vmem:[%s10298_s10 + $0xb8] sm:$0xf]  ;;  %v5931_v17 = vld [vmem:[%s10298_s10 + $0x2e8] sm:$0xf]  ;;  %v6124_v62 = vor.u32 %v6691_v56, %v6121_v55  ;;  %v5623_v32 = vld [vmem:[%s10298_s10 + $0x80] sm:$0xf] }
 0x3a4   :  { %4009 = vmatpush.bf16.msra.mxu0 %v5756_v6  ;;  %4061 = vmatpush.bf16.msrb.mxu3 %v5760_v10  ;;  %v2750_v58 = vpop.f32.mrf.mxu2  ;;  %v5764_v6 = vor.u32 %v6604_v48, %v5763_v18  ;;  %v6610_v10 = vld [vmem:[%s10298_s10 + $0x1e0] sm:$0xf0]  ;;  %v5925_v48 = vld [vmem:[%s10298_s10 + $0x2fc] sm:$0xf0]  ;;  %v5652_v38 = vor.u32 %v6576_v43, %v5651_v15  ;;  %v6628_v57 = vld [vmem:[%s10298_s10 + $0x274] sm:$0xf] }
 0x3a5   :  { %3978 = vmatmul.bf16.vlgmr.msra.gmra.mxu2 %v9485_v37  ;;  %v5784_v58 = vor.u32 %v6610_v10, %v5783_v3  ;;  %v6642_v18 = vld [vmem:[%s10298_s10 + $0x2e4] sm:$0xf]  ;;  %v6684_v3 = vld [vmem:[%s10298_s10 + $0x434] sm:$0xf]  ;;  %v5869_v44 = vld [vmem:[%s10298_s10 + $0x28c] sm:$0xf0] }
 0x3a6   :  { %4024 = vmatpush.bf16.msrb.mxu1 %v5924_v11  ;;  %4039 = vmatpush.bf16.msrb.mxu2 %v6092_v49  ;;  %v6712_v11 = vld [vmem:[%s10298_s10 + $0x514] sm:$0xf]  ;;  %v6205_v49 = vld [vmem:[%s10298_s10 + $0x52c] sm:$0xf0]  ;;  %v5928_v10 = vor.u32 %v6642_v18, %v5925_v48  ;;  %v6670_v41 = vld [vmem:[%s10298_s10 + $0x3c4] sm:$0xf] }
 0x3a7   :  { %v6037_v63 = vld [vmem:[%s10298_s10 + $0x3dc] sm:$0xf0]  ;;  %v5819_v43 = vld [vmem:[%s10298_s10 + $0x208] sm:$0xf]  ;;  %v6618_v56 = vld [vmem:[%s10298_s10 + $0x220] sm:$0xf0] }
 0x3a8   :  { %4010 = vmatpush.bf16.msra.mxu0 %v5728_v51  ;;  %4062 = vmatpush.bf16.msrb.mxu3 %v5732_v40  ;;  %v5736_v51 = vor.u32 %v6597_v45, %v5735_v39  ;;  %v6208_v40 = vor.u32 %v6712_v11, %v6205_v49  ;;  %v6635_v45 = vld [vmem:[%s10298_s10 + $0x2ac] sm:$0xf]  ;;  %v5813_v15 = vld [vmem:[%s10298_s10 + $0x21c] sm:$0xf0]  ;;  %v6601_v18 = vld [vmem:[%s10298_s10 + $0x19c] sm:$0xf] }
 0x3a9   :  { %v6639_v11 = vld [vmem:[%s10298_s10 + $0x2c8] sm:$0xf0]  ;;  %v5765_v48 = vld [vmem:[%s10298_s10 + $0x1b4] sm:$0xf0] }
 0x3aa   :  { %4025 = vmatpush.bf16.msrb.mxu1 %v5896_v53  ;;  %4040 = vmatpush.bf16.msrb.mxu2 %v6064_v54  ;;  %v5592_v53 = vor.u32 %v6558_v27, %v5589_v52  ;;  %v6177_v54 = vld [vmem:[%s10298_s10 + $0x4f4] sm:$0xf0]  ;;  %v6562_v27 = vld [vmem:[%s10298_s10 + $0x60] sm:$0xf0]  ;;  %v6677_v52 = vld [vmem:[%s10298_s10 + $0x3fc] sm:$0xf] }
 0x3ab   :  { %v6180_v9 = vor.u32 %v6705_v47, %v6177_v54  ;;  %v5875_v47 = vld [vmem:[%s10298_s10 + $0x278] sm:$0xf] }
 0x3ac   :  { %4011 = vmatpush.bf16.msra.mxu0 %v5700_v1  ;;  %4063 = vmatpush.bf16.msrb.mxu3 %v5704_v2  ;;  %v6656_v1 = vld [vmem:[%s10298_s10 + $0x354] sm:$0xf]  ;;  %v5981_v2 = vld [vmem:[%s10298_s10 + $0x36c] sm:$0xf0] }
 0x3ad   :  { %3965 = vmatmul.bf16.vlgmr.msra.gmra.mxu1 %v9494_v61 }
 0x3ae   :  { %4026 = vmatpush.bf16.msrb.mxu1 %v5868_v13  ;;  %4041 = vmatpush.bf16.msrb.mxu2 %v6036_v14  ;;  %v5679_v13 = vld [vmem:[%s10298_s10 + $0xf0] sm:$0xf]  ;;  %v5560_v14 = vor.u32 %v6554_v60, %v5559_v59  ;;  %v6555_v60 = vld [vmem:[%s10298_s10 + $0x28] sm:$0xf0] }
 0x3af   :  { %v5567_v59 = vld [vmem:[%s10298_s10 + $0x10] sm:$0xf] }
 0x3b0   :  { %4012 = vmatpush.bf16.msra.mxu0 %v5672_v23  ;;  %4064 = vmatpush.bf16.msrb.mxu3 %v5676_v21  ;;  %v5984_v23 = vor.u32 %v6656_v1, %v5981_v2  ;;  %v5988_v21 = vor.u32 %v6660_v5, %v5987_v4  ;;  %v5872_v1 = vor.u32 %v6628_v57, %v5869_v44  ;;  %v6657_v4 = vld [vmem:[%s10298_s10 + $0x35c] sm:$0xf]  ;;  %v5989_v5 = vld [vmem:[%s10298_s10 + $0x374] sm:$0xf0]  ;;  %v6183_v57 = vld [vmem:[%s10298_s10 + $0x4e0] sm:$0xf] }
 0x3b2   :  { %4027 = vmatpush.bf16.msrb.mxu1 %v5840_v34  ;;  %4042 = vmatpush.bf16.msrb.mxu2 %v6008_v24  ;;  %v5680_v34 = vor.u32 %v6583_v19, %v5679_v13  ;;  %v6152_v24 = vor.u32 %v6698_v20, %v6149_v50  ;;  %v5847_v13 = vld [vmem:[%s10298_s10 + $0x240] sm:$0xf]  ;;  %v6040_v19 = vor.u32 %v6670_v41, %v6037_v63  ;;  %v6663_v20 = vld [vmem:[%s10298_s10 + $0x38c] sm:$0xf]  ;;  %v6629_v41 = vld [vmem:[%s10298_s10 + $0x27c] sm:$0xf] }
 0x3b3   :  { %6250 = vmatmul.msk.bf16.vlgmr.msrb.gmra.mxu0 %vm1246_vm0, %v9518_v29  ;;  %6251 = vmatmul.msk.bf16.vlgmr.msra.gmra.mxu3 %vm1246_vm0, %v9518_v29  ;;  %v5992_v50 = vor.u32 %v6657_v4, %v5989_v5  ;;  %v5877_v63 = vld [vmem:[%s10298_s10 + $0x294] sm:$0xf0]  ;;  %v6155_v4 = vld [vmem:[%s10298_s10 + $0x4a8] sm:$0xf] }
 0x3b4   :  { %4013 = vmatpush.bf16.msra.mxu0 %v5644_v16  ;;  %4065 = vmatpush.bf16.msrb.mxu3 %v5648_v30  ;;  %v5956_v16 = vor.u32 %v6649_v22, %v5953_v25  ;;  %v5960_v30 = vor.u32 %v6653_v33, %v5959_v26  ;;  %v5961_v22 = vld [vmem:[%s10298_s10 + $0x33c] sm:$0xf0]  ;;  %v6614_v33 = vld [vmem:[%s10298_s10 + $0x204] sm:$0xf] }
 0x3b5   :  { %4043 = vmatmul.bf16.vlgmr.msrb.gmra.mxu2 %v9558_v42 }
 0x3b6   :  { %4107 = vmatpush.bf16.msra.mxu2 %v6236_v31  ;;  %4028 = vmatpush.bf16.msrb.mxu1 %v5812_v0  ;;  %v6646_v31 = vld [vmem:[%s10298_s10 + $0x300] sm:$0xf0]  ;;  %v6569_v0 = vld [vmem:[%s10298_s10 + $0x98] sm:$0xf0] }
 0x3b7   :  { %v5932_v39 = vor.u32 %v6646_v31, %v5931_v17  ;;  %v5624_v49 = vor.u32 %v6569_v0, %v5623_v32  ;;  %v6643_v17 = vld [vmem:[%s10298_s10 + $0x2ec] sm:$0xf]  ;;  %v5816_v31 = vor.u32 %v6614_v33, %v5813_v15  ;;  %v5785_v0 = vld [vmem:[%s10298_s10 + $0x1e4] sm:$0xf0]  ;;  %v6692_v33 = vld [vmem:[%s10298_s10 + $0x474] sm:$0xf] }
 0x3b8   :  { %4014 = vmatpush.bf16.msra.mxu0 %v5616_v28  ;;  %4066 = vmatpush.bf16.msrb.mxu3 %v5620_v46  ;;  %v5897_v28 = vld [vmem:[%s10298_s10 + $0x2c4] sm:$0xf0]  ;;  %v5903_v46 = vld [vmem:[%s10298_s10 + $0x2b0] sm:$0xf]  ;;  %v6607_v32 = vld [vmem:[%s10298_s10 + $0x1cc] sm:$0xf] }
 0x3b9   :  { %v6573_v15 = vld [vmem:[%s10298_s10 + $0xbc] sm:$0xf] }
 0x3ba   :  { %4113 = vmatpush.bf16.msrb.mxu2 %v5764_v6  ;;  %4029 = vmatpush.bf16.msrb.mxu1 %v5784_v58  ;;  %v6093_v6 = vld [vmem:[%s10298_s10 + $0x44c] sm:$0xf0]  ;;  %v6065_v58 = vld [vmem:[%s10298_s10 + $0x414] sm:$0xf0] }
 0x3bb   :  { %v6096_v12 = vor.u32 %v6684_v3, %v6093_v6  ;;  %v6068_v54 = vor.u32 %v6677_v52, %v6065_v58  ;;  %v5791_v3 = vld [vmem:[%s10298_s10 + $0x1d0] sm:$0xf]  ;;  %v6611_v6 = vld [vmem:[%s10298_s10 + $0x1e8] sm:$0xf0]  ;;  %v6636_v52 = vld [vmem:[%s10298_s10 + $0x2b4] sm:$0xf] }
 0x3bc   :  { %4015 = vmatpush.bf16.msra.mxu0 %v5588_v36  ;;  %4067 = vmatpush.bf16.msrb.mxu3 %v5592_v53  ;;  %v6632_v36 = vld [vmem:[%s10298_s10 + $0x290] sm:$0xf0]  ;;  %v5596_v53 = vor.u32 %v6562_v27, %v5595_v35  ;;  %v5788_v35 = vor.u32 %v6607_v32, %v5785_v0  ;;  %v5792_v27 = vor.u32 %v6611_v6, %v5791_v3  ;;  %v5905_v58 = vld [vmem:[%s10298_s10 + $0x2cc] sm:$0xf0]  ;;  %v6566_v32 = vld [vmem:[%s10298_s10 + $0x84] sm:$0xf] }
 0x3bd   :  { %4030 = vmatmul.bf16.vlgmr.msrb.gmra.mxu1 %v9485_v37  ;;  %v5876_v2 = vor.u32 %v6632_v36, %v5875_v47  ;;  %v6709_v47 = vld [vmem:[%s10298_s10 + $0x4f8] sm:$0xf0]  ;;  %v6706_v36 = vld [vmem:[%s10298_s10 + $0x4e4] sm:$0xf]  ;;  %v5625_v0 = vld [vmem:[%s10298_s10 + $0x9c] sm:$0xf0] }
 0x3be   :  { %4114 = vmatpush.bf16.msrb.mxu2 %v5736_v51  ;;  %4087 = vmatpush.bf16.msra.mxu1 %v6208_v40  ;;  %v5900_v51 = vor.u32 %v6635_v45, %v5897_v28  ;;  %v5904_v40 = vor.u32 %v6639_v11, %v5903_v46  ;;  %v6716_v45 = vld [vmem:[%s10298_s10 + $0x530] sm:$0xf0]  ;;  %v6713_v28 = vld [vmem:[%s10298_s10 + $0x51c] sm:$0xf]  ;;  %v6213_v46 = vld [vmem:[%s10298_s10 + $0x534] sm:$0xf0] }
 0x3bf   :  { %v6608_v3 = vld [vmem:[%s10298_s10 + $0x1d4] sm:$0xf]  ;;  %v5793_v6 = vld [vmem:[%s10298_s10 + $0x1ec] sm:$0xf0] }
 0x3c0   :  { %4016 = vmatpush.bf16.msra.mxu0 %v5560_v14  ;;  %4068 = vmatpush.bf16.msrb.mxu3 %v5564_v7  ;;  %v6625_v14 = vld [vmem:[%s10298_s10 + $0x258] sm:$0xf0]  ;;  %v5568_v7 = vor.u32 %v6555_v60, %v5567_v59  ;;  %v6587_v59 = vld [vmem:[%s10298_s10 + $0x12c] sm:$0xf]  ;;  %v5709_v60 = vld [vmem:[%s10298_s10 + $0x144] sm:$0xf0] }
 0x3c1   :  { %v5848_v26 = vor.u32 %v6625_v14, %v5847_v13  ;;  %v5712_v5 = vor.u32 %v6587_v59, %v5709_v60  ;;  %v6157_v13 = vld [vmem:[%s10298_s10 + $0x4c4] sm:$0xf0]  ;;  %v5880_v14 = vor.u32 %v6629_v41, %v5877_v63  ;;  %v6671_v59 = vld [vmem:[%s10298_s10 + $0x3cc] sm:$0xf]  ;;  %v6552_v63 = vld [vmem:[%s10298_s10 + $0x14] sm:$0xf] }
 0x3c2   :  { %4115 = vmatpush.bf16.msrb.mxu2 %v5708_v8  ;;  %4088 = vmatpush.bf16.msra.mxu1 %v6180_v9  ;;  %v6621_v8 = vld [vmem:[%s10298_s10 + $0x23c] sm:$0xf]  ;;  %v5841_v9 = vld [vmem:[%s10298_s10 + $0x254] sm:$0xf0]  ;;  %v6045_v60 = vld [vmem:[%s10298_s10 + $0x3e4] sm:$0xf0] }
 0x3c3   :  { %4017 = vmatmul.bf16.vlgmr.msra.gmra.mxu0 %v9494_v61  ;;  %4069 = vmatmul.bf16.vlgmr.msrb.gmra.mxu3 %v9494_v61  ;;  %v5844_v25 = vor.u32 %v6621_v8, %v5841_v9  ;;  %v6702_v8 = vld [vmem:[%s10298_s10 + $0x4c0] sm:$0xf0]  ;;  %v6699_v9 = vld [vmem:[%s10298_s10 + $0x4ac] sm:$0xf] }
 0x3c4   :  { %4074 = vmatpush.bf16.msrb.mxu0 %v5984_v23  ;;  %4126 = vmatpush.bf16.msra.mxu3 %v5988_v21  ;;  %v6009_v23 = vld [vmem:[%s10298_s10 + $0x3a4] sm:$0xf0]  ;;  %v6650_v21 = vld [vmem:[%s10298_s10 + $0x324] sm:$0xf] }
 0x3c5   :  { %6252 = vmatmul.msk.bf16.vlgmr.msra.gmra.mxu2 %vm1246_vm0, %v9518_v29  ;;  %v6012_v55 = vor.u32 %v6663_v20, %v6009_v23  ;;  %v6622_v20 = vld [vmem:[%s10298_s10 + $0x244] sm:$0xf]  ;;  %v6156_v23 = vor.u32 %v6702_v8, %v6155_v4  ;;  %v6163_v8 = vld [vmem:[%s10298_s10 + $0x4b0] sm:$0xf] }
 0x3c6   :  { %4116 = vmatpush.bf16.msrb.mxu2 %v5680_v34  ;;  %4089 = vmatpush.bf16.msra.mxu1 %v6152_v24  ;;  %v6239_v34 = vld [vmem:[%s10298_s10 + $0x550] sm:$0xf]  ;;  %v6723_v24 = vld [vmem:[%s10298_s10 + $0x568] sm:$0xf0] }
 0x3c8   :  { %4075 = vmatpush.bf16.msrb.mxu0 %v5956_v16  ;;  %4127 = vmatpush.bf16.msra.mxu3 %v5960_v30  ;;  %v5964_v16 = vor.u32 %v6650_v21, %v5961_v22  ;;  %v6240_v30 = vor.u32 %v6723_v24, %v6239_v34  ;;  %v6160_v21 = vor.u32 %v6699_v9, %v6157_v13  ;;  %v6129_v24 = vld [vmem:[%s10298_s10 + $0x48c] sm:$0xf0]  ;;  %v6703_v9 = vld [vmem:[%s10298_s10 + $0x4c8] sm:$0xf0] }
 0x3c9   :  { %v6048_v13 = vor.u32 %v6671_v59, %v6045_v60  ;;  %v5855_v60 = vld [vmem:[%s10298_s10 + $0x248] sm:$0xf] }
 0x3ca   :  { %4117 = vmatpush.bf16.msrb.mxu2 %v5652_v38  ;;  %4090 = vmatpush.bf16.msra.mxu1 %v6124_v62  ;;  %v5820_v38 = vor.u32 %v6618_v56, %v5819_v43  ;;  %v5933_v62 = vld [vmem:[%s10298_s10 + $0x304] sm:$0xf0]  ;;  %v5653_v43 = vld [vmem:[%s10298_s10 + $0xd4] sm:$0xf0]  ;;  %v6615_v56 = vld [vmem:[%s10298_s10 + $0x20c] sm:$0xf] }
 0x3cb   :  { %v5936_v11 = vor.u32 %v6643_v17, %v5933_v62  ;;  %v6688_v17 = vld [vmem:[%s10298_s10 + $0x450] sm:$0xf0]  ;;  %v6101_v62 = vld [vmem:[%s10298_s10 + $0x454] sm:$0xf0] }
 0x3cc   :  { %4076 = vmatpush.bf16.msrb.mxu0 %v5928_v10  ;;  %4128 = vmatpush.bf16.msra.mxu3 %v5932_v39  ;;  %v6211_v10 = vld [vmem:[%s10298_s10 + $0x518] sm:$0xf]  ;;  %v5768_v39 = vor.u32 %v6601_v18, %v5765_v48  ;;  %v5656_v18 = vor.u32 %v6573_v15, %v5653_v43  ;;  %v6654_v15 = vld [vmem:[%s10298_s10 + $0x340] sm:$0xf0] }
 0x3cd   :  { %v6099_v48 = vld [vmem:[%s10298_s10 + $0x438] sm:$0xf] }
 0x3ce   :  { %4118 = vmatpush.bf16.msrb.mxu2 %v5624_v49  ;;  %4091 = vmatpush.bf16.msra.mxu1 %v6096_v12  ;;  %v6594_v49 = vld [vmem:[%s10298_s10 + $0x164] sm:$0xf]  ;;  %v5737_v12 = vld [vmem:[%s10298_s10 + $0x17c] sm:$0xf0]  ;;  %v6135_v43 = vld [vmem:[%s10298_s10 + $0x478] sm:$0xf] }
 0x3cf   :  { %v5740_v44 = vor.u32 %v6594_v49, %v5737_v12  ;;  %v6681_v49 = vld [vmem:[%s10298_s10 + $0x418] sm:$0xf0]  ;;  %v5796_v12 = vor.u32 %v6608_v3, %v5793_v6  ;;  %v5743_v6 = vld [vmem:[%s10298_s10 + $0x168] sm:$0xf] }
 0x3d0   :  { %4077 = vmatpush.bf16.msrb.mxu0 %v5900_v51  ;;  %4129 = vmatpush.bf16.msra.mxu3 %v5904_v40  ;;  %v6212_v51 = vor.u32 %v6716_v45, %v6211_v10  ;;  %v6216_v40 = vor.u32 %v6713_v28, %v6213_v46  ;;  %v6100_v10 = vor.u32 %v6688_v17, %v6099_v48  ;;  %v6717_v45 = vld [vmem:[%s10298_s10 + $0x538] sm:$0xf0] }
 0x3d1   :  { %v5628_v46 = vor.u32 %v6566_v32, %v5625_v0  ;;  %v6107_v32 = vld [vmem:[%s10298_s10 + $0x440] sm:$0xf]  ;;  %v6689_v0 = vld [vmem:[%s10298_s10 + $0x458] sm:$0xf0] }
 0x3d2   :  { %4119 = vmatpush.bf16.msrb.mxu2 %v5596_v53  ;;  %4092 = vmatpush.bf16.msra.mxu1 %v6068_v54  ;;  %v6185_v53 = vld [vmem:[%s10298_s10 + $0x4fc] sm:$0xf0]  ;;  %v5908_v54 = vor.u32 %v6636_v52, %v5905_v58  ;;  %v6559_v58 = vld [vmem:[%s10298_s10 + $0x4c] sm:$0xf] }
 0x3d4   :  { %4078 = vmatpush.bf16.msrb.mxu0 %v5872_v1  ;;  %4130 = vmatpush.bf16.msra.mxu3 %v5876_v2  ;;  %v6184_v1 = vor.u32 %v6709_v47, %v6183_v57  ;;  %v6188_v2 = vor.u32 %v6706_v36, %v6185_v53  ;;  %v6191_v57 = vld [vmem:[%s10298_s10 + $0x4e8] sm:$0xf]  ;;  %v6674_v53 = vld [vmem:[%s10298_s10 + $0x3e0] sm:$0xf0] }
 0x3d5   :  { %v6043_v36 = vld [vmem:[%s10298_s10 + $0x3c8] sm:$0xf] }
 0x3d6   :  { %4120 = vmatpush.bf16.msrb.mxu2 %v5568_v7  ;;  %4093 = vmatpush.bf16.msra.mxu1 %v6040_v19  ;;  %v6580_v7 = vld [vmem:[%s10298_s10 + $0xf4] sm:$0xf]  ;;  %v5681_v19 = vld [vmem:[%s10298_s10 + $0x10c] sm:$0xf0]  ;;  %v6044_v4 = vor.u32 %v6674_v53, %v6043_v36  ;;  %v5687_v36 = vld [vmem:[%s10298_s10 + $0xf8] sm:$0xf] }
 0x3d7   :  { %v5684_v22 = vor.u32 %v6580_v7, %v5681_v19  ;;  %v6667_v7 = vld [vmem:[%s10298_s10 + $0x3a8] sm:$0xf0]  ;;  %v6664_v19 = vld [vmem:[%s10298_s10 + $0x394] sm:$0xf] }
 0x3d8   :  { %4079 = vmatpush.bf16.msrb.mxu0 %v5844_v25  ;;  %4131 = vmatpush.bf16.msra.mxu3 %v5848_v26  ;;  %v6127_v25 = vld [vmem:[%s10298_s10 + $0x470] sm:$0xf]  ;;  %v6695_v26 = vld [vmem:[%s10298_s10 + $0x488] sm:$0xf0]  ;;  %v6584_v53 = vld [vmem:[%s10298_s10 + $0x110] sm:$0xf0] }
 0x3d9   :  { %4121 = vmatmul.bf16.vlgmr.msrb.gmra.mxu2 %v9494_v61 }
 0x3da   :  { %4178 = vmatpush.bf16.msra.mxu2 %v5992_v50  ;;  %4094 = vmatpush.bf16.msra.mxu1 %v6012_v55  ;;  %v5849_v50 = vld [vmem:[%s10298_s10 + $0x25c] sm:$0xf0]  ;;  %v5821_v55 = vld [vmem:[%s10298_s10 + $0x224] sm:$0xf0] }
 0x3db   :  { %v5852_v34 = vor.u32 %v6622_v20, %v5849_v50  ;;  %v6017_v50 = vld [vmem:[%s10298_s10 + $0x3ac] sm:$0xf0] }
 0x3dc   :  { %4080 = vmatpush.bf16.msrb.mxu0 %v5816_v31  ;;  %4132 = vmatpush.bf16.msra.mxu3 %v5820_v38  ;;  %v6685_v31 = vld [vmem:[%s10298_s10 + $0x43c] sm:$0xf]  ;;  %v5824_v38 = vor.u32 %v6615_v56, %v5821_v55  ;;  %v6696_v56 = vld [vmem:[%s10298_s10 + $0x490] sm:$0xf0]  ;;  %v6020_v55 = vor.u32 %v6664_v19, %v6017_v50  ;;  %v5631_v19 = vld [vmem:[%s10298_s10 + $0x88] sm:$0xf] }
 0x3dd   :  { %4095 = vmatmul.bf16.vlgmr.msra.gmra.mxu1 %v9558_v42  ;;  %v6104_v28 = vor.u32 %v6685_v31, %v6101_v62  ;;  %v6136_v31 = vor.u32 %v6696_v56, %v6135_v43  ;;  %v6647_v62 = vld [vmem:[%s10298_s10 + $0x308] sm:$0xf0] }
 0x3de   :  { %4179 = vmatpush.bf16.msra.mxu2 %v5964_v16  ;;  %4159 = vmatpush.bf16.msrb.mxu1 %v6240_v30  ;;  %v6128_v16 = vor.u32 %v6695_v26, %v6127_v25  ;;  %v6132_v30 = vor.u32 %v6692_v33, %v6129_v24  ;;  %v6164_v25 = vor.u32 %v6703_v9, %v6163_v8  ;;  %v6241_v26 = vld [vmem:[%s10298_s10 + $0x56c] sm:$0xf0]  ;;  %v6247_v33 = vld [vmem:[%s10298_s10 + $0x558] sm:$0xf] }
 0x3e0   :  { %4081 = vmatpush.bf16.msrb.mxu0 %v5788_v35  ;;  %4133 = vmatpush.bf16.msra.mxu3 %v5792_v27  ;;  %v6678_v35 = vld [vmem:[%s10298_s10 + $0x404] sm:$0xf]  ;;  %v6073_v27 = vld [vmem:[%s10298_s10 + $0x41c] sm:$0xf0] }
 0x3e1   :  { %v6076_v47 = vor.u32 %v6678_v35, %v6073_v27  ;;  %v5715_v35 = vld [vmem:[%s10298_s10 + $0x130] sm:$0xf]  ;;  %v6591_v27 = vld [vmem:[%s10298_s10 + $0x148] sm:$0xf0] }
 0x3e2   :  { %4165 = vmatpush.bf16.msra.mxu1 %v5768_v39  ;;  %4180 = vmatpush.bf16.msra.mxu2 %v5936_v11  ;;  %v6219_v39 = vld [vmem:[%s10298_s10 + $0x520] sm:$0xf] }
 0x3e3   :  { %4082 = vmatmul.bf16.vlgmr.msrb.gmra.mxu0 %v9485_v37  ;;  %4134 = vmatmul.bf16.vlgmr.msra.gmra.mxu3 %v9485_v37  ;;  %v6071_v11 = vld [vmem:[%s10298_s10 + $0x400] sm:$0xf]  ;;  %v6220_v52 = vor.u32 %v6717_v45, %v6219_v39  ;;  %v6108_v45 = vor.u32 %v6689_v0, %v6107_v32 }
 0x3e4   :  { %4139 = vmatpush.bf16.msra.mxu0 %v6212_v51  ;;  %4191 = vmatpush.bf16.msrb.mxu3 %v6216_v40  ;;  %v5597_v51 = vld [vmem:[%s10298_s10 + $0x64] sm:$0xf0]  ;;  %v6072_v40 = vor.u32 %v6681_v49, %v6071_v11  ;;  %v6682_v49 = vld [vmem:[%s10298_s10 + $0x420] sm:$0xf0] }
 0x3e5   :  { %v6079_v11 = vld [vmem:[%s10298_s10 + $0x408] sm:$0xf] }
 0x3e6   :  { %4166 = vmatpush.bf16.msra.mxu1 %v5740_v44  ;;  %4181 = vmatpush.bf16.msra.mxu2 %v5908_v54  ;;  %v6710_v44 = vld [vmem:[%s10298_s10 + $0x500] sm:$0xf0]  ;;  %v5600_v54 = vor.u32 %v6559_v58, %v5597_v51  ;;  %v6080_v58 = vor.u32 %v6682_v49, %v6079_v11  ;;  %v5883_v51 = vld [vmem:[%s10298_s10 + $0x280] sm:$0xf] }
 0x3e7   :  { %v6192_v41 = vor.u32 %v6710_v44, %v6191_v57  ;;  %v6051_v57 = vld [vmem:[%s10298_s10 + $0x3d0] sm:$0xf]  ;;  %v6675_v44 = vld [vmem:[%s10298_s10 + $0x3e8] sm:$0xf0] }
 0x3e8   :  { %4140 = vmatpush.bf16.msra.mxu0 %v6184_v1  ;;  %4192 = vmatpush.bf16.msrb.mxu3 %v6188_v2  ;;  %v5569_v1 = vld [vmem:[%s10298_s10 + $0x2c] sm:$0xf0]  ;;  %v5995_v2 = vld [vmem:[%s10298_s10 + $0x360] sm:$0xf]  ;;  %v6052_v59 = vor.u32 %v6675_v44, %v6051_v57 }
 0x3e9   :  { %v5572_v20 = vor.u32 %v6552_v63, %v5569_v1  ;;  %v6023_v63 = vld [vmem:[%s10298_s10 + $0x398] sm:$0xf]  ;;  %v6668_v1 = vld [vmem:[%s10298_s10 + $0x3b0] sm:$0xf0] }
 0x3ea   :  { %4167 = vmatpush.bf16.msra.mxu1 %v5712_v5  ;;  %4182 = vmatpush.bf16.msra.mxu2 %v5880_v14  ;;  %v6661_v5 = vld [vmem:[%s10298_s10 + $0x378] sm:$0xf0]  ;;  %v6015_v14 = vld [vmem:[%s10298_s10 + $0x390] sm:$0xf]  ;;  %v6024_v9 = vor.u32 %v6668_v1, %v6023_v63 }
 0x3eb   :  { %v6016_v24 = vor.u32 %v6667_v7, %v6015_v14  ;;  %v6619_v14 = vld [vmem:[%s10298_s10 + $0x228] sm:$0xf0] }
 0x3ec   :  { %4141 = vmatpush.bf16.msra.mxu0 %v6156_v23  ;;  %4193 = vmatpush.bf16.msrb.mxu3 %v6160_v21  ;;  %v5967_v23 = vld [vmem:[%s10298_s10 + $0x328] sm:$0xf]  ;;  %v6720_v21 = vld [vmem:[%s10298_s10 + $0x554] sm:$0xf] }
 0x3ed   :  { %6253 = vmatmul.msk.bf16.vlgmr.msrb.gmra.mxu1 %vm1246_vm0, %v9518_v29  ;;  %v5968_v17 = vor.u32 %v6654_v15, %v5967_v23  ;;  %v5799_v23 = vld [vmem:[%s10298_s10 + $0x1d8] sm:$0xf]  ;;  %v6556_v15 = vld [vmem:[%s10298_s10 + $0x30] sm:$0xf0] }
 0x3ee   :  { %4168 = vmatpush.bf16.msra.mxu1 %v5684_v22  ;;  %4183 = vmatpush.bf16.msra.mxu2 %v5852_v34  ;;  %v5996_v22 = vor.u32 %v6661_v5, %v5995_v2  ;;  %v6724_v34 = vld [vmem:[%s10298_s10 + $0x570] sm:$0xf0]  ;;  %v5688_v2 = vor.u32 %v6584_v53, %v5687_v36  ;;  %v6577_v5 = vld [vmem:[%s10298_s10 + $0xd8] sm:$0xf0] }
 0x3ef   :  { %v6248_v48 = vor.u32 %v6724_v34, %v6247_v33 }
 0x3f0   :  { %4142 = vmatpush.bf16.msra.mxu0 %v6128_v16  ;;  %4194 = vmatpush.bf16.msrb.mxu3 %v6132_v30  ;;  %v6244_v16 = vor.u32 %v6720_v21, %v6241_v26  ;;  %v5771_v30 = vld [vmem:[%s10298_s10 + $0x1a0] sm:$0xf]  ;;  %v6612_v21 = vld [vmem:[%s10298_s10 + $0x1f0] sm:$0xf0] }
 0x3f1   :  { %v5800_v26 = vor.u32 %v6612_v21, %v5799_v23 }
 0x3f2   :  { %4169 = vmatpush.bf16.msra.mxu1 %v5656_v18  ;;  %4184 = vmatpush.bf16.msra.mxu2 %v5824_v38  ;;  %v6605_v18 = vld [vmem:[%s10298_s10 + $0x1b8] sm:$0xf0]  ;;  %v5939_v38 = vld [vmem:[%s10298_s10 + $0x2f0] sm:$0xf] }
 0x3f3   :  { %v5772_v3 = vor.u32 %v6605_v18, %v5771_v30  ;;  %v5940_v39 = vor.u32 %v6647_v62, %v5939_v38 }
 0x3f4   :  { %4143 = vmatpush.bf16.msra.mxu0 %v6100_v10  ;;  %4195 = vmatpush.bf16.msrb.mxu3 %v6104_v28  ;;  %v6598_v10 = vld [vmem:[%s10298_s10 + $0x180] sm:$0xf0]  ;;  %v5911_v28 = vld [vmem:[%s10298_s10 + $0x2b8] sm:$0xf] }
 0x3f6   :  { %4170 = vmatpush.bf16.msra.mxu1 %v5628_v46  ;;  %4185 = vmatpush.bf16.msra.mxu2 %v5796_v12  ;;  %v6640_v46 = vld [vmem:[%s10298_s10 + $0x2d0] sm:$0xf0]  ;;  %v5744_v12 = vor.u32 %v6598_v10, %v5743_v6 }
 0x3f8   :  { %4144 = vmatpush.bf16.msra.mxu0 %v6072_v40  ;;  %4196 = vmatpush.bf16.msrb.mxu3 %v6076_v47  ;;  %v6633_v40 = vld [vmem:[%s10298_s10 + $0x298] sm:$0xf0]  ;;  %v5716_v47 = vor.u32 %v6591_v27, %v5715_v35 }
 0x3f9   :  { %4186 = vmatmul.bf16.vlgmr.msra.gmra.mxu2 %v9485_v37 }
 0x3fa   :  { %4243 = vmatpush.bf16.msrb.mxu2 %v6220_v52  ;;  %4171 = vmatpush.bf16.msra.mxu1 %v5600_v54  ;;  %v5912_v52 = vor.u32 %v6640_v46, %v5911_v28  ;;  %v5884_v54 = vor.u32 %v6633_v40, %v5883_v51 }
 0x3fc   :  { %4145 = vmatpush.bf16.msra.mxu0 %v6044_v4  ;;  %4197 = vmatpush.bf16.msrb.mxu3 %v6048_v13  ;;  %v5659_v4 = vld [vmem:[%s10298_s10 + $0xc0] sm:$0xf]  ;;  %v5827_v13 = vld [vmem:[%s10298_s10 + $0x210] sm:$0xf] }
 0x3fd   :  { %v5660_v7 = vor.u32 %v6577_v5, %v5659_v4  ;;  %v5828_v50 = vor.u32 %v6619_v14, %v5827_v13 }
 0x3fe   :  { %4244 = vmatpush.bf16.msrb.mxu2 %v6192_v41  ;;  %4172 = vmatpush.bf16.msra.mxu1 %v5572_v20  ;;  %v6626_v41 = vld [vmem:[%s10298_s10 + $0x260] sm:$0xf0] }
 0x3ff   :  { %v5856_v8 = vor.u32 %v6626_v41, %v5855_v60  ;;  %v6570_v20 = vld [vmem:[%s10298_s10 + $0xa0] sm:$0xf0] }
 0x400   :  { %4146 = vmatpush.bf16.msra.mxu0 %v6016_v24  ;;  %4198 = vmatpush.bf16.msrb.mxu3 %v6020_v55  ;;  %v10267_v24 = vld [vmem:[%s10299_s11] sm:$0x7f] }
 0x401   :  { %4173 = vmatmul.bf16.vlgmr.msra.gmra.mxu1 %v9494_v61  ;;  %v2988_v43 = vperm.slane %v10267_v24, 0  ;;  %v2989_v10 = vperm.slane %v10267_v24, 1  ;;  %v2990_v1 = vperm.slane %v10267_v24, 2 }
 0x402   :  { %4230 = vmatpush.bf16.msrb.mxu1 %v5996_v22  ;;  %4245 = vmatpush.bf16.msrb.mxu2 %v6164_v25  ;;  %v5632_v22 = vor.u32 %v6570_v20, %v5631_v19  ;;  %v5603_v25 = vld [vmem:[%s10298_s10 + $0x50] sm:$0xf] }
 0x403   :  { %4147 = vmatmul.bf16.vlgmr.msra.gmra.mxu0 %v9558_v42  ;;  %4199 = vmatmul.bf16.vlgmr.msrb.gmra.mxu3 %v9558_v42 }
 0x404   :  { %4211 = vmatpush.bf16.msrb.mxu0 %v6244_v16  ;;  %4263 = vmatpush.bf16.msra.mxu3 %v6248_v48 }
 0x406   :  { %4231 = vmatpush.bf16.msrb.mxu1 %v5968_v17  ;;  %4246 = vmatpush.bf16.msrb.mxu2 %v6136_v31 }
 0x408   :  { %4217 = vmatpush.bf16.msra.mxu0 %v5772_v3 }
 0x40a   :  { %4232 = vmatpush.bf16.msrb.mxu1 %v5940_v39  ;;  %4247 = vmatpush.bf16.msrb.mxu2 %v6108_v45 }
 0x40c   :  { %4218 = vmatpush.bf16.msra.mxu0 %v5744_v12 }
 0x40e   :  { %4233 = vmatpush.bf16.msrb.mxu1 %v5912_v52  ;;  %4248 = vmatpush.bf16.msrb.mxu2 %v6080_v58 }
 0x410   :  { %4219 = vmatpush.bf16.msra.mxu0 %v5716_v47 }
 0x412   :  { %4234 = vmatpush.bf16.msrb.mxu1 %v5884_v54  ;;  %4249 = vmatpush.bf16.msrb.mxu2 %v6052_v59  ;;  %v3927_v33 = vpop.f32.mrf.mxu3 }
 0x413   :  { %6254 = vmatmul.msk.bf16.vlgmr.msrb.gmra.mxu0 %vm1246_vm0, %v9518_v29  ;;  %6255 = vmatmul.msk.bf16.vlgmr.msra.gmra.mxu3 %vm1246_vm0, %v9518_v29  ;;  %v6563_v29 = vld [vmem:[%s10298_s10 + $0x68] sm:$0xf0] }
 0x414   :  { %4220 = vmatpush.bf16.msra.mxu0 %v5688_v2  ;;  %v5604_v34 = vor.u32 %v6563_v29, %v5603_v25 }
 0x416   :  { %4235 = vmatpush.bf16.msrb.mxu1 %v5856_v8  ;;  %4250 = vmatpush.bf16.msrb.mxu2 %v6024_v9 }
 0x418   :  { %4221 = vmatpush.bf16.msra.mxu0 %v5660_v7  ;;  %v3914_v55 = vpop.f32.mrf.mxu2 }
 0x419   :  { %4251 = vmatmul.bf16.vlgmr.msrb.gmra.mxu2 %v9558_v42  ;;  %v5575_v42 = vld [vmem:[%s10298_s10 + $0x18] sm:$0xf]  ;;  %v3915_v18 = vadd.f32 %v3914_v55, %v2988_v43  ;;  %v2991_v55 = vperm.slane %v10267_v24, 3  ;;  %s6806_s10 = smov [#allocation3]  }
 0x41a   :  { %4236 = vmatpush.bf16.msrb.mxu1 %v5828_v50  ;;  %v5576_v56 = vor.u32 %v6556_v15, %v5575_v42  ;;  %v3929_v16 = vpop.f32.mrf.mxu3  ;;  %v3953_v30 = vpop.f32.mrf.mxu1  ;;  %s4344_s11 = sshll.u32 %s6806_s10, 4  ;;  %s4345_s11 = int_to_ptr.vmem [resolvable:$true] %s4344_s11 }
 0x41b   :  { %v3928_v48 = vadd.f32 %v3927_v33, %v3915_v18 }
 0x41c   :  { %4222 = vmatpush.bf16.msra.mxu0 %v5632_v22 }
 0x41e   :  { %4237 = vmatpush.bf16.msrb.mxu1 %v5800_v26 }
 0x420   :  { %4223 = vmatpush.bf16.msra.mxu0 %v5604_v34  ;;  %v3916_v17 = vpop.f32.mrf.mxu2  ;;  %v3940_v31 = vpop.f32.mrf.mxu0 }
 0x421   :  { %4238 = vmatmul.bf16.vlgmr.msrb.gmra.mxu1 %v9485_v37  ;;  %v3941_v38 = vadd.f32 %v3940_v31, %v3928_v48 }
 0x422   :  { %v3955_v62 = vpop.f32.mrf.mxu1 }
 0x423   :  { %v3954_v32 = vadd.f32 %v3953_v30, %v3941_v38 }
 0x424   :  { %4224 = vmatpush.bf16.msra.mxu0 %v5576_v56 }
 0x425   :  { %v4269_v0 = vand.u32 2147483647, %v3954_v32  ;;  %vm4311_vm15 = vcmp.ge.f32.partialorder %v3954_v32, 0.0 }
 0x426   :  { %v3992_v3 = vpop.f32.mrf.mxu3 }
 0x427   :  { %4225 = vmatmul.bf16.vlgmr.msra.gmra.mxu0 %v9494_v61  ;;  %v4276_v6 = vsub.f32 0.0, %v4269_v0 }
 0x428   :  { %v3942_v39 = vpop.f32.mrf.mxu0  ;;  %v3979_v37 = vpop.f32.mrf.mxu2 }
 0x429   :  { %v4283_v45 = vmul.f32 1.442695, %v4276_v6 }
 0x42a   :  { %v3966_v28 = vpop.f32.mrf.mxu1 }
 0x42b   :  { %6752 = vpow2.f32 %v4283_v45  ;;  %v3967_v46 = vadd.f32 %v3966_v28, %v2989_v10 }
 0x42d   :  { %v3980_v11 = vadd.f32 %v3979_v37, %v3967_v46 }
 0x42e   :  { %v3994_v49 = vpop.f32.mrf.mxu3 }
 0x42f   :  { %v3993_v61 = vadd.f32 %v3992_v3, %v3980_v11 }
 0x430   :  { %v3981_v12 = vpop.f32.mrf.mxu2  ;;  %v4005_v35 = vpop.f32.mrf.mxu0 }
 0x431   :  { %v6753_v27 = vpop.eup %6752  ;;  %v4006_v52 = vadd.f32 %v4005_v35, %v3993_v61  ;;  %v2992_v12 = vperm.slane %v10267_v24, 4 }
 0x432   :  { %v4297_v58 = vadd.f32 1.0, %v6753_v27  ;;  %v3968_v51 = vpop.f32.mrf.mxu1 }
 0x433   :  { %v4270_v40 = vand.u32 2147483647, %v4006_v52  ;;  %vm4312_vm1 = vcmp.ge.f32.partialorder %v4006_v52, 0.0 }
 0x434   :  { %6754 = vrcp.f32 %v4297_v58 }
 0x435   :  { %v4277_v57 = vsub.f32 0.0, %v4270_v40 }
 0x436   :  { %v4057_v44 = vpop.f32.mrf.mxu3 }
 0x437   :  { %v4285_v47 = vmul.f32 1.442695, %v4277_v57 }
 0x438   :  { %v4007_v36 = vpop.f32.mrf.mxu0  ;;  %v4044_v53 = vpop.f32.mrf.mxu2 }
 0x439   :  { %6756 = vpow2.f32 %v4285_v47 }
 0x43a   :  { %v6755_v54 = vpop.eup %6754  ;;  %v4031_v59 = vpop.f32.mrf.mxu1 }
 0x43b   :  { %v4318_v60 = vmul.f32 %v6755_v54, %v6753_v27 }
 0x43d   :  { %v4325_v41 = vsel %vm4311_vm15, %v6755_v54, %v4318_v60  ;;  %v2993_v54 = vperm.slane %v10267_v24, 5 }
 0x43e   :  { %4332 = vst [vmem:[#allocation3] sm:$0xff] %v4325_v41  ;;  %v4059_v63 = vpop.f32.mrf.mxu3 }
 0x43f   :  { %v6757_v2 = vpop.eup %6756 }
 0x440   :  { %v4298_v4 = vadd.f32 1.0, %v6757_v2  ;;  %v4018_v5 = vpop.f32.mrf.mxu0  ;;  %v4046_v8 = vpop.f32.mrf.mxu2 }
 0x441   :  { %v4019_v9 = vadd.f32 %v4018_v5, %v2990_v1 }
 0x442   :  { %6758 = vrcp.f32 %v4298_v4  ;;  %v4033_v13 = vpop.f32.mrf.mxu1 }
 0x443   :  { %v4032_v14 = vadd.f32 %v4031_v59, %v4019_v9 }
 0x445   :  { %v4045_v7 = vadd.f32 %v4044_v53, %v4032_v14 }
 0x446   :  { %v4070_v19 = vpop.f32.mrf.mxu3 }
 0x447   :  { %v4058_v50 = vadd.f32 %v4057_v44, %v4045_v7  ;;  %v4071_v30 = vadd.f32 %v4070_v19, %v2991_v55 }
 0x448   :  { %v6759_v20 = vpop.eup %6758  ;;  %v4020_v21 = vpop.f32.mrf.mxu0 }
 0x449   :  { %v4319_v23 = vmul.f32 %v6759_v20, %v6757_v2  ;;  %v4109_v22 = vpop.f32.mrf.mxu2  ;;  %v4271_v25 = vand.u32 2147483647, %v4058_v50  ;;  %vm4313_vm2 = vcmp.ge.f32.partialorder %v4058_v50, 0.0 }
 0x44b   :  { %v4326_v29 = vsel %vm4312_vm1, %v6759_v20, %v4319_v23  ;;  %v4278_v26 = vsub.f32 0.0, %v4271_v25 }
 0x44c   :  { %4333 = vst [vmem:[#allocation3 + $0x8] sm:$0xff] %v4326_v29 }
 0x44d   :  { %v4287_v33 = vmul.f32 1.442695, %v4278_v26 }
 0x44e   :  { %v4072_v34 = vpop.f32.mrf.mxu3 }
 0x44f   :  { %6760 = vpow2.f32 %v4287_v33 }
 0x451   :  { %v4111_v42 = vpop.f32.mrf.mxu2 }
 0x452   :  { %v2994_v42 = vperm.slane %v10267_v24, 6 }
 0x455   :  { %v6761_v15 = vpop.eup %6760 }
 0x456   :  { %v4299_v43 = vadd.f32 1.0, %v6761_v15 }
 0x458   :  { %6762 = vrcp.f32 %v4299_v43 }
 0x45a   :  { %v4096_v56 = vpop.f32.mrf.mxu1 }
 0x45c   :  { %v4122_v16 = vpop.f32.mrf.mxu2 }
 0x45d   :  { %v4123_v27 = vadd.f32 %v4122_v16, %v2992_v12 }
 0x45e   :  { %v6763_v17 = vpop.eup %6762 }
 0x45f   :  { %v4320_v38 = vmul.f32 %v6763_v17, %v6761_v15 }
 0x460   :  { %v4083_v18 = vpop.f32.mrf.mxu0 }
 0x461   :  { %v4084_v48 = vadd.f32 %v4083_v18, %v4071_v30  ;;  %v4327_v0 = vsel %vm4313_vm2, %v6763_v17, %v4320_v38 }
 0x462   :  { %v4098_v31 = vpop.f32.mrf.mxu1  ;;  %4334 = vst [vmem:[#allocation3 + $0x10] sm:$0xff] %v4327_v0 }
 0x463   :  { %v4097_v62 = vadd.f32 %v4096_v56, %v4084_v48 }
 0x464   :  { %v4124_v32 = vpop.f32.mrf.mxu2 }
 0x465   :  { %v4110_v3 = vadd.f32 %v4109_v22, %v4097_v62 }
 0x466   :  { %v4135_v10 = vpop.f32.mrf.mxu3 }
 0x467   :  { %v4272_v6 = vand.u32 2147483647, %v4110_v3  ;;  %v4136_v40 = vadd.f32 %v4135_v10, %v4123_v27  ;;  %vm4314_vm3 = vcmp.ge.f32.partialorder %v4110_v3, 0.0 }
 0x468   :  { %v4085_v39 = vpop.f32.mrf.mxu0 }
 0x469   :  { %v4279_v37 = vsub.f32 0.0, %v4272_v6 }
 0x46a   :  { %v4161_v45 = vpop.f32.mrf.mxu1 }
 0x46b   :  { %v4289_v28 = vmul.f32 1.442695, %v4279_v37 }
 0x46d   :  { %6764 = vpow2.f32 %v4289_v28 }
 0x46e   :  { %v4137_v46 = vpop.f32.mrf.mxu3 }
 0x472   :  { %v4163_v11 = vpop.f32.mrf.mxu1 }
 0x473   :  { %v6765_v49 = vpop.eup %6764 }
 0x474   :  { %v4300_v61 = vadd.f32 1.0, %v6765_v49 }
 0x476   :  { %6766 = vrcp.f32 %v4300_v61 }
 0x47c   :  { %v4187_v35 = vpop.f32.mrf.mxu2  ;;  %v6767_v58 = vpop.eup %6766 }
 0x47d   :  { %v4321_v51 = vmul.f32 %v6767_v58, %v6765_v49 }
 0x47e   :  { %v4174_v52 = vpop.f32.mrf.mxu1 }
 0x47f   :  { %v4328_v44 = vsel %vm4314_vm3, %v6767_v58, %v4321_v51  ;;  %v4175_v2 = vadd.f32 %v4174_v52, %v2993_v54 }
 0x480   :  { %v4148_v57 = vpop.f32.mrf.mxu0  ;;  %4335 = vst [vmem:[#allocation3 + $0x18] sm:$0xff] %v4328_v44 }
 0x481   :  { %v4149_v47 = vadd.f32 %v4148_v57, %v4136_v40  ;;  %v4188_v5 = vadd.f32 %v4187_v35, %v4175_v2 }
 0x483   :  { %v4162_v36 = vadd.f32 %v4161_v45, %v4149_v47 }
 0x484   :  { %v4189_v53 = vpop.f32.mrf.mxu2 }
 0x485   :  { %v4273_v59 = vand.u32 2147483647, %v4162_v36  ;;  %vm4315_vm4 = vcmp.ge.f32.partialorder %v4162_v36, 0.0 }
 0x486   :  { %v4176_v60 = vpop.f32.mrf.mxu1  ;;  %v4200_v41 = vpop.f32.mrf.mxu3 }
 0x487   :  { %v4280_v63 = vsub.f32 0.0, %v4273_v59  ;;  %v4201_v9 = vadd.f32 %v4200_v41, %v4188_v5 }
 0x488   :  { %v4150_v1 = vpop.f32.mrf.mxu0 }
 0x489   :  { %v4291_v4 = vmul.f32 1.442695, %v4280_v63 }
 0x48b   :  { %6768 = vpow2.f32 %v4291_v4 }
 0x48e   :  { %v4202_v8 = vpop.f32.mrf.mxu3 }
 0x490   :  { %v4213_v13 = vpop.f32.mrf.mxu0 }
 0x491   :  { %v6769_v14 = vpop.eup %6768  ;;  %v4214_v7 = vadd.f32 %v4213_v13, %v4201_v9 }
 0x492   :  { %v4301_v19 = vadd.f32 1.0, %v6769_v14 }
 0x493   :  { %v4274_v20 = vand.u32 2147483647, %v4214_v7  ;;  %vm4316_vm5 = vcmp.ge.f32.partialorder %v4214_v7, 0.0 }
 0x494   :  { %6770 = vrcp.f32 %v4301_v19 }
 0x495   :  { %v4281_v50 = vsub.f32 0.0, %v4274_v20 }
 0x496   :  { %v4265_v23 = vpop.f32.mrf.mxu3 }
 0x497   :  { %v4293_v21 = vmul.f32 1.442695, %v4281_v50 }
 0x498   :  { %v4215_v22 = vpop.f32.mrf.mxu0 }
 0x499   :  { %6772 = vpow2.f32 %v4293_v21 }
 0x49a   :  { %v6771_v29 = vpop.eup %6770 }
 0x49b   :  { %v4322_v33 = vmul.f32 %v6771_v29, %v6769_v14 }
 0x49c   :  { %v4252_v25 = vpop.f32.mrf.mxu2 }
 0x49d   :  { %v4329_v34 = vsel %vm4315_vm4, %v6771_v29, %v4322_v33 }
 0x49e   :  { %v4239_v26 = vpop.f32.mrf.mxu1  ;;  %4336 = vst [vmem:[#allocation3 + $0x20] sm:$0xff] %v4329_v34  ;;  %v4267_v15 = vpop.f32.mrf.mxu3 }
 0x49f   :  { %v6773_v43 = vpop.eup %6772 }
 0x4a0   :  { %v4302_v56 = vadd.f32 1.0, %v6773_v43 }
 0x4a2   :  { %6774 = vrcp.f32 %v4302_v56 }
 0x4a4   :  { %v4226_v55 = vpop.f32.mrf.mxu0  ;;  %v4254_v16 = vpop.f32.mrf.mxu2 }
 0x4a5   :  { %v4227_v30 = vadd.f32 %v4226_v55, %v2994_v42 }
 0x4a6   :  { %v4241_v18 = vpop.f32.mrf.mxu1 }
 0x4a7   :  { %v4240_v48 = vadd.f32 %v4239_v26, %v4227_v30 }
 0x4a8   :  { %v6775_v38 = vpop.eup %6774 }
 0x4a9   :  { %v4253_v17 = vadd.f32 %v4252_v25, %v4240_v48  ;;  %v4323_v32 = vmul.f32 %v6775_v38, %v6773_v43 }
 0x4ab   :  { %v4266_v31 = vadd.f32 %v4265_v23, %v4253_v17  ;;  %v4330_v3 = vsel %vm4316_vm5, %v6775_v38, %v4323_v32 }
 0x4ac   :  { %v4228_v62 = vpop.f32.mrf.mxu0  ;;  %4337 = vst [vmem:[#allocation3 + $0x28] sm:$0xff] %v4330_v3 }
 0x4ad   :  { %v4275_v0 = vand.u32 2147483647, %v4266_v31  ;;  %vm4317_vm6 = vcmp.ge.f32.partialorder %v4266_v31, 0.0 }
 0x4af   :  { %v4282_v6 = vsub.f32 0.0, %v4275_v0 }
 0x4b1   :  { %v4295_v24 = vmul.f32 1.442695, %v4282_v6 }
 0x4b3   :  { %6776 = vpow2.f32 %v4295_v24 }
 0x4b9   :  { %v6777_v10 = vpop.eup %6776 }
 0x4ba   :  { %v4303_v39 = vadd.f32 1.0, %v6777_v10 }
 0x4bc   :  { %6778 = vrcp.f32 %v4303_v39 }
 0x4c2   :  { %v6779_v37 = vpop.eup %6778 }
 0x4c3   :  { %v4324_v45 = vmul.f32 %v6779_v37, %v6777_v10 }
 0x4c5   :  { %v4331_v28 = vsel %vm4317_vm6, %v6779_v37, %v4324_v45 }
 0x4c6   :  { %4338 = vst.msk [vmem:[#allocation3 + $0x30] sm:$0xff] %vm1246_vm0, %v4331_v28 }
 0x4c7   :  { %4349 = dma.vmem_to_hbm [thread:$0]  %s4345_s11, 896, %s4347_s9, [#allocation4]  }
 0x4c8   :  { %6804 = dma.done.wait [#allocation4], 896  }
 0x4c9   :  { %6805 = vsyncadd [#allocation4], 4294966400 }
 0x4ca   :  { %4358 = vsyncpa [#allocation4], 1 }

</bundles_post_ra>
